<compile_context>
chip_gen: v5e
topology: v5e:2x2
jax: 0.10.0
libtpu: 0.0.40
codegen_flags: <defaults>
</compile_context>

<pallas_src>
import functools
import numpy as np
import jax
import jax.numpy as jnp
from jax.experimental import pallas as pl
from jax.experimental.pallas import tpu as pltpu


def _round_up(x, m):
    return ((x + m - 1) // m) * m


# ----------------------------- Pallas kernel ---------------------------------

def _gates_to_hc(gates, c, gp):
    """PyTorch LSTM cell update from pre-activation gates, gate order (i,f,g,o).
    The i/f/o columns were pre-scaled by 0.5 at weight-prep time, so
    sigmoid(x) == 0.5 + 0.5*tanh(x/2) == 0.5 + 0.5*tanh(gates_prescaled).
    Gate k occupies lanes [k*gp, (k+1)*gp) so slices are 128-aligned vreg picks."""
    i = 0.5 + 0.5 * jnp.tanh(gates[:, 0 * gp:1 * gp])
    f = 0.5 + 0.5 * jnp.tanh(gates[:, 1 * gp:2 * gp])
    g = jnp.tanh(gates[:, 2 * gp:3 * gp])
    o = 0.5 + 0.5 * jnp.tanh(gates[:, 3 * gp:4 * gp])
    c_new = f * c + i * g
    h_new = o * jnp.tanh(c_new)
    return h_new, c_new


def seq2seq_kernel(src_ref,                           # (src_len*bp, ein_p) bf16
                   wih_e_ref, whh_e_ref, b_e_ref,     # encoder LSTM (gate-padded, prescaled)
                   whh_d_ref, b_d_ref,                # decoder LSTM, t = 0 (zero input)
                   wfold_ref, bfold_ref,              # decoder LSTM w/ fc folded in, t >= 1
                   whead_hbm_ref, bhead_ref,          # fused output head (whead stays in HBM)
                   out_ref,
                   whead_vmem, head_sem, hs_ref,      # scratch
                   *, src_len, max_len, bp, mode):
    gp = whh_e_ref.shape[0]                           # padded hidden width (multiple of 128)

    # Start the head-weight DMA immediately; it is only consumed after the whole
    # recurrence, so its HBM->VMEM transfer hides behind the serial encoder/decoder.
    head_cp = pltpu.make_async_copy(whead_hbm_ref, whead_vmem, head_sem)
    head_cp.start()

    wih_e = wih_e_ref[...]
    whh_e = whh_e_ref[...]
    b_e = b_e_ref[...]                                # (1, 4gp) f32 -> sublane-broadcast add
    whh_d = whh_d_ref[...]
    b_d = b_d_ref[...]
    wfold = wfold_ref[...]
    bfold = bfold_ref[...]
    bf16 = jnp.bfloat16

    # ---- encoder: input projection hoisted out of the recurrence (one big matmul) ----
    pre = jnp.dot(src_ref[...], wih_e, preferred_element_type=jnp.float32) + b_e

    c = jnp.zeros((bp, gp), jnp.float32)
    h = None
    for t in range(src_len):
        gates = pre[t * bp:(t + 1) * bp, :]
        if t > 0:   # h == 0 at t == 0, skip the zero matmul entirely
            gates = gates + jnp.dot(h.astype(bf16), whh_e,
                                    preferred_element_type=jnp.float32)
        h, c = _gates_to_hc(gates, c, gp)

    # ---- decoder: autoregressive, fully unrolled, fc folded into the recurrence ----
    # t = 0: decoder input is all zeros  =>  gates = h_enc @ whh_d + b_d
    gates = jnp.dot(h.astype(bf16), whh_d, preferred_element_type=jnp.float32) + b_d
    h, c = _gates_to_hc(gates, c, gp)
    if mode == 'seq':
        hs_ref[0:bp, :] = h
    # t >= 1: input_t = fc(h_{t-1}) folded => gates = h_{t-1} @ (wfc@wih_d + whh_d) + (bfc@wih_d + b_d)
    for t in range(1, max_len):
        gates = jnp.dot(h.astype(bf16), wfold, preferred_element_type=jnp.float32) + bfold
        h, c = _gates_to_hc(gates, c, gp)
        if mode == 'seq':
            hs_ref[t * bp:(t + 1) * bp, :] = h

    # ---- fused output head ----
    head_cp.wait()
    whead = whead_vmem[...]
    bhead = bhead_ref[...]                            # (1, ncp) f32, sublane-broadcast add
    if mode == 'iq':
        # out_iq = final_fc(out_fc(fc(h_last))) with the whole weight chain pre-folded.
        out_ref[...] = (jnp.dot(h.astype(bf16), whead,
                                preferred_element_type=jnp.float32) + bhead)
    else:
        # out_seq[t] = out_fc(fc(h_t)): ONE lane-dense matmul over the contiguous slab.
        h_all = hs_ref[...].astype(bf16)              # (max_len*bp, gp)
        out_ref[...] = (jnp.dot(h_all, whead,
                                preferred_element_type=jnp.float32) + bhead)


# ------------------------------- weight prep -----------------------------------

def _gate_pad_prescale(w, hid, gp):
    """(in, 4*hid) -> (in, 4*gp): gate k lands in cols [k*gp, k*gp+hid), rest zero.
    The i/f/o gate columns are multiplied by 0.5 for the sigmoid->tanh rewrite;
    the g gate is left untouched."""
    out = jnp.zeros((w.shape[0], 4 * gp), jnp.float32)
    for k, s in enumerate((0.5, 0.5, 1.0, 0.5)):      # (i, f, g, o)
        out = out.at[:, k * gp:k * gp + hid].set(s * w[:, k * hid:(k + 1) * hid])
    return out


def _row_pad(w, rows):
    return jnp.zeros((rows, w.shape[1]), w.dtype).at[:w.shape[0], :].set(w)


def make_seq2seq(params, src_len, max_len, batch, dataset='iq'):
    """Does all padding / folding / casting ONCE and returns a jitted callable
    `forward(src) -> outputs` (the latency-critical per-call path only pads src)."""
    mode = 'iq' if dataset == 'iq' else 'seq'
    hid = params['whh_e'].shape[0]
    gp = _round_up(hid, 128)                # per-gate lane width
    enc_in = params['wih_e'].shape[0]
    ein_p = _round_up(enc_in, 128)
    bp = _round_up(batch, 8)                # f32 sublane count
    bf16, f32 = jnp.bfloat16, jnp.float32

    # Encoder LSTM (gate-padded cols, zero-padded rows so padded lanes never leak).
    wih_e = _row_pad(_gate_pad_prescale(params['wih_e'], hid, gp), ein_p).astype(bf16)
    whh_e = _row_pad(_gate_pad_prescale(params['whh_e'], hid, gp), gp).astype(bf16)
    b_e = _gate_pad_prescale(params['b_e'], hid, gp)                       # (1, 4gp) f32

    # Decoder t = 0 (zero input).
    whh_d = _row_pad(_gate_pad_prescale(params['whh_d'], hid, gp), gp).astype(bf16)
    b_d = _gate_pad_prescale(params['b_d'], hid, gp)

    # Decoder t >= 1: fc -> next-input matmul folded into the recurrence.
    wfold_raw = params['wfc'] @ params['wih_d'] + params['whh_d']
    bfold_raw = params['bfc'] @ params['wih_d'] + params['b_d']
    wfold = _row_pad(_gate_pad_prescale(wfold_raw, hid, gp), gp).astype(bf16)
    bfold = _gate_pad_prescale(bfold_raw, hid, gp)

    # Fused output head (pre-folded weight chains).
    if mode == 'iq':
        n_out = params['wfin'].shape[1]
        whead_raw = params['wfc'] @ params['wout'] @ params['wfin']
        bhead_raw = (params['bfc'] @ params['wout'] + params['bout']) @ params['wfin'] + params['bfin']
    else:
        n_out = params['wout'].shape[1]
        whead_raw = params['wfc'] @ params['wout']
        bhead_raw = params['bfc'] @ params['wout'] + params['bout']
    ncp = _round_up(n_out, 128)             # 1000 -> 1024 / 16 -> 128, lane-dense store
    whead = _row_pad(jnp.pad(whead_raw, ((0, 0), (0, ncp - n_out))), gp).astype(bf16)   # (gp, ncp)
    bhead = jnp.pad(bhead_raw, ((0, 0), (0, ncp - n_out))).astype(f32)                  # (1, ncp)

    if mode == 'iq':
        out_shape = jax.ShapeDtypeStruct((bp, ncp), f32)
    else:
        out_shape = jax.ShapeDtypeStruct((max_len * bp, ncp), f32)

    weights = (wih_e, whh_e, b_e, whh_d, b_d, wfold, bfold, whead, bhead)
    weights = tuple(jax.device_put(w) for w in weights)   # device-resident constants

    vmem = pl.BlockSpec(memory_space=pltpu.MemorySpace.VMEM)
    hbm = pl.BlockSpec(memory_space=pl.ANY)               # whead: manual overlapped DMA

    kernel = functools.partial(seq2seq_kernel,
                               src_len=src_len, max_len=max_len, bp=bp, mode=mode)
    call = pl.pallas_call(
        kernel,
        out_shape=out_shape,
        in_specs=[vmem] * 8 + [hbm, vmem],
        out_specs=vmem,
        scratch_shapes=[
            pltpu.VMEM((gp, ncp), bf16),                  # whead landing buffer
            pltpu.SemaphoreType.DMA,                      # its DMA semaphore
            pltpu.VMEM((max_len * bp, gp), f32),          # per-step hidden states ('seq' head)
        ],
    )

    @jax.jit
    def forward(src):
        # Pad batch to a sublane multiple, features to a lane multiple; flatten time
        # into sublanes so the encoder input projection is one matmul in-kernel.
        src_p = (jnp.zeros((src_len, bp, ein_p), bf16)
                 .at[:, :batch, :enc_in].set(src.astype(bf16))
                 .reshape(src_len * bp, ein_p))
        out = call(src_p, *weights)
        if mode == 'iq':
            return out[:batch, :n_out]
        return out.reshape(max_len, bp, ncp)[:, :batch, :n_out]

    return forward


def seq2seq_forward(src, trg, params, dataset='iq'):
    """Convenience one-shot wrapper.  trg values are unused (teacher_forcing_ratio=0.0);
    only its shape matters.  For repeated calls use make_seq2seq()."""
    max_len, batch, _ = trg.shape
    return make_seq2seq(params, src.shape[0], max_len, batch, dataset)(src)


# ----------------------- pure-JAX reference (for checking) --------------------

def seq2seq_ref(src, trg, params, dataset='iq'):
    hid = params['whh_e'].shape[0]
    max_len, batch, _ = trg.shape
    dec_in = params['wih_d'].shape[0]

    def step(x, h, c, wih, whh, b):
        gates = x @ wih + h @ whh + b
        i = jax.nn.sigmoid(gates[:, 0 * hid:1 * hid])
        f = jax.nn.sigmoid(gates[:, 1 * hid:2 * hid])
        g = jnp.tanh(gates[:, 2 * hid:3 * hid])
        o = jax.nn.sigmoid(gates[:, 3 * hid:4 * hid])
        c = f * c + i * g
        return o * jnp.tanh(c), c

    h = jnp.zeros((batch, hid), jnp.float32)
    c = jnp.zeros((batch, hid), jnp.float32)
    for t in range(src.shape[0]):
        h, c = step(src[t], h, c, params['wih_e'], params['whh_e'], params['b_e'])

    inp = jnp.zeros((batch, dec_in), jnp.float32)
    outs = []
    for t in range(max_len):
        h, c = step(inp, h, c, params['wih_d'], params['whh_d'], params['b_d'])
        out = h @ params['wfc'] + params['bfc']
        outs.append(out)
        inp = out
    outputs = jnp.stack(outs, axis=0)                       # [max_len, batch, out_dim]
    outputs = outputs @ params['wout'] + params['bout']     # out_fc
    if dataset == 'iq':
        return outputs[-1] @ params['wfin'] + params['bfin']  # final_fc
    return outputs


# ---------------------------------- main ---------------------------------------

if __name__ == "__main__":
    # Small shapes implied by the module's forward.
    SRC_LEN, MAX_LEN, BATCH = 6, 8, 2
    ENC_IN = 8                 # encoder input feature dim
    HID = 32                   # encoder.hid_dim == decoder.hid_dim
    OUT_DIM = 8                # decoder.output_dim == trg_input_size (fed back as next input)
    FINAL_OUT = 16             # decoder.final_output_dim
    N_CLASSES = 1000           # final_fc output

    key = jax.random.PRNGKey(0)
    ks = jax.random.split(key, 16)
    s = 0.1
    params = {
        'wih_e': s * jax.random.normal(ks[0], (ENC_IN, 4 * HID), jnp.float32),
        'whh_e': s * jax.random.normal(ks[1], (HID, 4 * HID), jnp.float32),
        'b_e':   s * jax.random.normal(ks[2], (1, 4 * HID), jnp.float32),
        'wih_d': s * jax.random.normal(ks[3], (OUT_DIM, 4 * HID), jnp.float32),
        'whh_d': s * jax.random.normal(ks[4], (HID, 4 * HID), jnp.float32),
        'b_d':   s * jax.random.normal(ks[5], (1, 4 * HID), jnp.float32),
        'wfc':   s * jax.random.normal(ks[6], (HID, OUT_DIM), jnp.float32),
        'bfc':   s * jax.random.normal(ks[7], (1, OUT_DIM), jnp.float32),
        'wout':  s * jax.random.normal(ks[8], (OUT_DIM, FINAL_OUT), jnp.float32),
        'bout':  s * jax.random.normal(ks[9], (1, FINAL_OUT), jnp.float32),
        'wfin':  s * jax.random.normal(ks[10], (FINAL_OUT, N_CLASSES), jnp.float32),
        'bfin':  s * jax.random.normal(ks[11], (1, N_CLASSES), jnp.float32),
    }

    src = jax.random.normal(ks[12], (SRC_LEN, BATCH, ENC_IN), jnp.float32)
    trg = jax.random.normal(ks[13], (MAX_LEN, BATCH, OUT_DIM), jnp.float32)  # values unused (tf_ratio=0)

    # Prep/fold weights once per mode; per-call path only pads src + launches the kernel.
    fwd_iq = make_seq2seq(params, SRC_LEN, MAX_LEN, BATCH, dataset='iq')
    fwd_seq = make_seq2seq(params, SRC_LEN, MAX_LEN, BATCH, dataset='other')

    # 'iq' branch: final_fc(outputs[-1]) -> [batch, 1000]
    out_iq = jax.block_until_ready(fwd_iq(src))
    ref_iq = jax.block_until_ready(seq2seq_ref(src, trg, params, dataset='iq'))
    np.testing.assert_allclose(np.asarray(out_iq), np.asarray(ref_iq), rtol=2e-2, atol=2e-2)
    assert out_iq.shape == (BATCH, N_CLASSES)

    # non-'iq' branch: out_fc(outputs) -> [max_len, batch, final_output_dim]
    out_seq = jax.block_until_ready(fwd_seq(src))
    ref_seq = jax.block_until_ready(seq2seq_ref(src, trg, params, dataset='other'))
    np.testing.assert_allclose(np.asarray(out_seq), np.asarray(ref_seq), rtol=2e-2, atol=2e-2)
    assert out_seq.shape == (MAX_LEN, BATCH, FINAL_OUT)

    print("KERNEL_OK")
</pallas_src>

<mosaic_0001>
module attributes {stable_mosaic.version = 11 : i64} {
  func.func @seq2seq_kernel(%arg0: memref<48x128xbf16, #tpu.memory_space<vmem>>, %arg1: memref<128x512xbf16, #tpu.memory_space<vmem>>, %arg2: memref<128x512xbf16, #tpu.memory_space<vmem>>, %arg3: memref<1x512xf32, #tpu.memory_space<vmem>>, %arg4: memref<128x512xbf16, #tpu.memory_space<vmem>>, %arg5: memref<1x512xf32, #tpu.memory_space<vmem>>, %arg6: memref<128x512xbf16, #tpu.memory_space<vmem>>, %arg7: memref<1x512xf32, #tpu.memory_space<vmem>>, %arg8: memref<128x1024xbf16, #tpu.memory_space<any>>, %arg9: memref<1x1024xf32, #tpu.memory_space<vmem>>, %arg10: memref<8x1024xf32, #tpu.memory_space<vmem>>, %arg11: memref<128x1024xbf16, #tpu.memory_space<vmem>>, %arg12: memref<!tpu.dma_semaphore, #tpu.memory_space<semaphore_mem>>, %arg13: memref<64x128xf32, #tpu.memory_space<vmem>>) attributes {dimension_semantics = [], scalar_prefetch = 0 : i64, scratch_operands = 3 : i64, tpu.core_type = #tpu.core_type<tc>} {
    tpu.enqueue_dma source(%arg8 : memref<128x1024xbf16, #tpu.memory_space<any>>) target(%arg11 : memref<128x1024xbf16, #tpu.memory_space<vmem>>) target_semaphore(%arg12 : memref<!tpu.dma_semaphore, #tpu.memory_space<semaphore_mem>>)
    %c0 = arith.constant 0 : index
    %c0_0 = arith.constant 0 : index
    %0 = vector.load %arg1[%c0, %c0_0] : memref<128x512xbf16, #tpu.memory_space<vmem>>, vector<128x512xbf16>
    %c0_1 = arith.constant 0 : index
    %c0_2 = arith.constant 0 : index
    %1 = vector.load %arg2[%c0_1, %c0_2] : memref<128x512xbf16, #tpu.memory_space<vmem>>, vector<128x512xbf16>
    %c0_3 = arith.constant 0 : index
    %c0_4 = arith.constant 0 : index
    %2 = vector.load %arg3[%c0_3, %c0_4] : memref<1x512xf32, #tpu.memory_space<vmem>>, vector<1x512xf32>
    %c0_5 = arith.constant 0 : index
    %c0_6 = arith.constant 0 : index
    %3 = vector.load %arg4[%c0_5, %c0_6] : memref<128x512xbf16, #tpu.memory_space<vmem>>, vector<128x512xbf16>
    %c0_7 = arith.constant 0 : index
    %c0_8 = arith.constant 0 : index
    %4 = vector.load %arg5[%c0_7, %c0_8] : memref<1x512xf32, #tpu.memory_space<vmem>>, vector<1x512xf32>
    %c0_9 = arith.constant 0 : index
    %c0_10 = arith.constant 0 : index
    %5 = vector.load %arg6[%c0_9, %c0_10] : memref<128x512xbf16, #tpu.memory_space<vmem>>, vector<128x512xbf16>
    %c0_11 = arith.constant 0 : index
    %c0_12 = arith.constant 0 : index
    %6 = vector.load %arg7[%c0_11, %c0_12] : memref<1x512xf32, #tpu.memory_space<vmem>>, vector<1x512xf32>
    %c0_13 = arith.constant 0 : index
    %c0_14 = arith.constant 0 : index
    %7 = vector.load %arg0[%c0_13, %c0_14] : memref<48x128xbf16, #tpu.memory_space<vmem>>, vector<48x128xbf16>
    %cst = arith.constant dense<0.000000e+00> : vector<48x512xf32>
    %8 = tpu.matmul %7, %0, %cst {dimension_numbers = #tpu.dot_dimension_numbers<[1], [0], [0], [1], [0, 0, 1, 1], [], []>} : vector<48x128xbf16>, vector<128x512xbf16>, vector<48x512xf32> -> vector<48x512xf32>
    %9 = vector.broadcast %2 : vector<1x512xf32> to vector<48x512xf32>
    %10 = arith.addf %8, %9 : vector<48x512xf32>
    %cst_15 = arith.constant 0.000000e+00 : f32
    %11 = vector.broadcast %cst_15 : f32 to vector<8x128xf32>
    %12 = vector.extract_strided_slice %10 {offsets = [0, 0], sizes = [8, 512], strides = [1, 1]} : vector<48x512xf32> to vector<8x512xf32>
    %13 = vector.extract_strided_slice %12 {offsets = [0, 0], sizes = [8, 128], strides = [1, 1]} : vector<8x512xf32> to vector<8x128xf32>
    %14 = math.tanh %13 : vector<8x128xf32>
    %cst_16 = arith.constant 5.000000e-01 : f32
    %15 = vector.broadcast %cst_16 : f32 to vector<8x128xf32>
    %16 = arith.mulf %15, %14 : vector<8x128xf32>
    %cst_17 = arith.constant 5.000000e-01 : f32
    %17 = vector.broadcast %cst_17 : f32 to vector<8x128xf32>
    %18 = arith.addf %17, %16 : vector<8x128xf32>
    %19 = vector.extract_strided_slice %12 {offsets = [0, 128], sizes = [8, 128], strides = [1, 1]} : vector<8x512xf32> to vector<8x128xf32>
    %20 = math.tanh %19 : vector<8x128xf32>
    %cst_18 = arith.constant 5.000000e-01 : f32
    %21 = vector.broadcast %cst_18 : f32 to vector<8x128xf32>
    %22 = arith.mulf %21, %20 : vector<8x128xf32>
    %cst_19 = arith.constant 5.000000e-01 : f32
    %23 = vector.broadcast %cst_19 : f32 to vector<8x128xf32>
    %24 = arith.addf %23, %22 : vector<8x128xf32>
    %25 = vector.extract_strided_slice %12 {offsets = [0, 256], sizes = [8, 128], strides = [1, 1]} : vector<8x512xf32> to vector<8x128xf32>
    %26 = math.tanh %25 : vector<8x128xf32>
    %27 = vector.extract_strided_slice %12 {offsets = [0, 384], sizes = [8, 128], strides = [1, 1]} : vector<8x512xf32> to vector<8x128xf32>
    %28 = math.tanh %27 : vector<8x128xf32>
    %cst_20 = arith.constant 5.000000e-01 : f32
    %29 = vector.broadcast %cst_20 : f32 to vector<8x128xf32>
    %30 = arith.mulf %29, %28 : vector<8x128xf32>
    %cst_21 = arith.constant 5.000000e-01 : f32
    %31 = vector.broadcast %cst_21 : f32 to vector<8x128xf32>
    %32 = arith.addf %31, %30 : vector<8x128xf32>
    %33 = arith.mulf %24, %11 : vector<8x128xf32>
    %34 = arith.mulf %18, %26 : vector<8x128xf32>
    %35 = arith.addf %33, %34 : vector<8x128xf32>
    %36 = math.tanh %35 : vector<8x128xf32>
    %37 = arith.mulf %32, %36 : vector<8x128xf32>
    %38 = vector.extract_strided_slice %10 {offsets = [8, 0], sizes = [8, 512], strides = [1, 1]} : vector<48x512xf32> to vector<8x512xf32>
    %39 = arith.truncf %37 : vector<8x128xf32> to vector<8x128xbf16>
    %cst_22 = arith.constant dense<0.000000e+00> : vector<8x512xf32>
    %40 = tpu.matmul %39, %1, %cst_22 {dimension_numbers = #tpu.dot_dimension_numbers<[1], [0], [0], [1], [0, 0, 1, 1], [], []>} : vector<8x128xbf16>, vector<128x512xbf16>, vector<8x512xf32> -> vector<8x512xf32>
    %41 = arith.addf %38, %40 : vector<8x512xf32>
    %42 = vector.extract_strided_slice %41 {offsets = [0, 0], sizes = [8, 128], strides = [1, 1]} : vector<8x512xf32> to vector<8x128xf32>
    %43 = math.tanh %42 : vector<8x128xf32>
    %cst_23 = arith.constant 5.000000e-01 : f32
    %44 = vector.broadcast %cst_23 : f32 to vector<8x128xf32>
    %45 = arith.mulf %44, %43 : vector<8x128xf32>
    %cst_24 = arith.constant 5.000000e-01 : f32
    %46 = vector.broadcast %cst_24 : f32 to vector<8x128xf32>
    %47 = arith.addf %46, %45 : vector<8x128xf32>
    %48 = vector.extract_strided_slice %41 {offsets = [0, 128], sizes = [8, 128], strides = [1, 1]} : vector<8x512xf32> to vector<8x128xf32>
    %49 = math.tanh %48 : vector<8x128xf32>
    %cst_25 = arith.constant 5.000000e-01 : f32
    %50 = vector.broadcast %cst_25 : f32 to vector<8x128xf32>
    %51 = arith.mulf %50, %49 : vector<8x128xf32>
    %cst_26 = arith.constant 5.000000e-01 : f32
    %52 = vector.broadcast %cst_26 : f32 to vector<8x128xf32>
    %53 = arith.addf %52, %51 : vector<8x128xf32>
    %54 = vector.extract_strided_slice %41 {offsets = [0, 256], sizes = [8, 128], strides = [1, 1]} : vector<8x512xf32> to vector<8x128xf32>
    %55 = math.tanh %54 : vector<8x128xf32>
    %56 = vector.extract_strided_slice %41 {offsets = [0, 384], sizes = [8, 128], strides = [1, 1]} : vector<8x512xf32> to vector<8x128xf32>
    %57 = math.tanh %56 : vector<8x128xf32>
    %cst_27 = arith.constant 5.000000e-01 : f32
    %58 = vector.broadcast %cst_27 : f32 to vector<8x128xf32>
    %59 = arith.mulf %58, %57 : vector<8x128xf32>
    %cst_28 = arith.constant 5.000000e-01 : f32
    %60 = vector.broadcast %cst_28 : f32 to vector<8x128xf32>
    %61 = arith.addf %60, %59 : vector<8x128xf32>
    %62 = arith.mulf %53, %35 : vector<8x128xf32>
    %63 = arith.mulf %47, %55 : vector<8x128xf32>
    %64 = arith.addf %62, %63 : vector<8x128xf32>
    %65 = math.tanh %64 : vector<8x128xf32>
    %66 = arith.mulf %61, %65 : vector<8x128xf32>
    %67 = vector.extract_strided_slice %10 {offsets = [16, 0], sizes = [8, 512], strides = [1, 1]} : vector<48x512xf32> to vector<8x512xf32>
    %68 = arith.truncf %66 : vector<8x128xf32> to vector<8x128xbf16>
    %cst_29 = arith.constant dense<0.000000e+00> : vector<8x512xf32>
    %69 = tpu.matmul %68, %1, %cst_29 {dimension_numbers = #tpu.dot_dimension_numbers<[1], [0], [0], [1], [0, 0, 1, 1], [], []>} : vector<8x128xbf16>, vector<128x512xbf16>, vector<8x512xf32> -> vector<8x512xf32>
    %70 = arith.addf %67, %69 : vector<8x512xf32>
    %71 = vector.extract_strided_slice %70 {offsets = [0, 0], sizes = [8, 128], strides = [1, 1]} : vector<8x512xf32> to vector<8x128xf32>
    %72 = math.tanh %71 : vector<8x128xf32>
    %cst_30 = arith.constant 5.000000e-01 : f32
    %73 = vector.broadcast %cst_30 : f32 to vector<8x128xf32>
    %74 = arith.mulf %73, %72 : vector<8x128xf32>
    %cst_31 = arith.constant 5.000000e-01 : f32
    %75 = vector.broadcast %cst_31 : f32 to vector<8x128xf32>
    %76 = arith.addf %75, %74 : vector<8x128xf32>
    %77 = vector.extract_strided_slice %70 {offsets = [0, 128], sizes = [8, 128], strides = [1, 1]} : vector<8x512xf32> to vector<8x128xf32>
    %78 = math.tanh %77 : vector<8x128xf32>
    %cst_32 = arith.constant 5.000000e-01 : f32
    %79 = vector.broadcast %cst_32 : f32 to vector<8x128xf32>
    %80 = arith.mulf %79, %78 : vector<8x128xf32>
    %cst_33 = arith.constant 5.000000e-01 : f32
    %81 = vector.broadcast %cst_33 : f32 to vector<8x128xf32>
    %82 = arith.addf %81, %80 : vector<8x128xf32>
    %83 = vector.extract_strided_slice %70 {offsets = [0, 256], sizes = [8, 128], strides = [1, 1]} : vector<8x512xf32> to vector<8x128xf32>
    %84 = math.tanh %83 : vector<8x128xf32>
    %85 = vector.extract_strided_slice %70 {offsets = [0, 384], sizes = [8, 128], strides = [1, 1]} : vector<8x512xf32> to vector<8x128xf32>
    %86 = math.tanh %85 : vector<8x128xf32>
    %cst_34 = arith.constant 5.000000e-01 : f32
    %87 = vector.broadcast %cst_34 : f32 to vector<8x128xf32>
    %88 = arith.mulf %87, %86 : vector<8x128xf32>
    %cst_35 = arith.constant 5.000000e-01 : f32
    %89 = vector.broadcast %cst_35 : f32 to vector<8x128xf32>
    %90 = arith.addf %89, %88 : vector<8x128xf32>
    %91 = arith.mulf %82, %64 : vector<8x128xf32>
    %92 = arith.mulf %76, %84 : vector<8x128xf32>
    %93 = arith.addf %91, %92 : vector<8x128xf32>
    %94 = math.tanh %93 : vector<8x128xf32>
    %95 = arith.mulf %90, %94 : vector<8x128xf32>
    %96 = vector.extract_strided_slice %10 {offsets = [24, 0], sizes = [8, 512], strides = [1, 1]} : vector<48x512xf32> to vector<8x512xf32>
    %97 = arith.truncf %95 : vector<8x128xf32> to vector<8x128xbf16>
    %cst_36 = arith.constant dense<0.000000e+00> : vector<8x512xf32>
    %98 = tpu.matmul %97, %1, %cst_36 {dimension_numbers = #tpu.dot_dimension_numbers<[1], [0], [0], [1], [0, 0, 1, 1], [], []>} : vector<8x128xbf16>, vector<128x512xbf16>, vector<8x512xf32> -> vector<8x512xf32>
    %99 = arith.addf %96, %98 : vector<8x512xf32>
    %100 = vector.extract_strided_slice %99 {offsets = [0, 0], sizes = [8, 128], strides = [1, 1]} : vector<8x512xf32> to vector<8x128xf32>
    %101 = math.tanh %100 : vector<8x128xf32>
    %cst_37 = arith.constant 5.000000e-01 : f32
    %102 = vector.broadcast %cst_37 : f32 to vector<8x128xf32>
    %103 = arith.mulf %102, %101 : vector<8x128xf32>
    %cst_38 = arith.constant 5.000000e-01 : f32
    %104 = vector.broadcast %cst_38 : f32 to vector<8x128xf32>
    %105 = arith.addf %104, %103 : vector<8x128xf32>
    %106 = vector.extract_strided_slice %99 {offsets = [0, 128], sizes = [8, 128], strides = [1, 1]} : vector<8x512xf32> to vector<8x128xf32>
    %107 = math.tanh %106 : vector<8x128xf32>
    %cst_39 = arith.constant 5.000000e-01 : f32
    %108 = vector.broadcast %cst_39 : f32 to vector<8x128xf32>
    %109 = arith.mulf %108, %107 : vector<8x128xf32>
    %cst_40 = arith.constant 5.000000e-01 : f32
    %110 = vector.broadcast %cst_40 : f32 to vector<8x128xf32>
    %111 = arith.addf %110, %109 : vector<8x128xf32>
    %112 = vector.extract_strided_slice %99 {offsets = [0, 256], sizes = [8, 128], strides = [1, 1]} : vector<8x512xf32> to vector<8x128xf32>
    %113 = math.tanh %112 : vector<8x128xf32>
    %114 = vector.extract_strided_slice %99 {offsets = [0, 384], sizes = [8, 128], strides = [1, 1]} : vector<8x512xf32> to vector<8x128xf32>
    %115 = math.tanh %114 : vector<8x128xf32>
    %cst_41 = arith.constant 5.000000e-01 : f32
    %116 = vector.broadcast %cst_41 : f32 to vector<8x128xf32>
    %117 = arith.mulf %116, %115 : vector<8x128xf32>
    %cst_42 = arith.constant 5.000000e-01 : f32
    %118 = vector.broadcast %cst_42 : f32 to vector<8x128xf32>
    %119 = arith.addf %118, %117 : vector<8x128xf32>
    %120 = arith.mulf %111, %93 : vector<8x128xf32>
    %121 = arith.mulf %105, %113 : vector<8x128xf32>
    %122 = arith.addf %120, %121 : vector<8x128xf32>
    %123 = math.tanh %122 : vector<8x128xf32>
    %124 = arith.mulf %119, %123 : vector<8x128xf32>
    %125 = vector.extract_strided_slice %10 {offsets = [32, 0], sizes = [8, 512], strides = [1, 1]} : vector<48x512xf32> to vector<8x512xf32>
    %126 = arith.truncf %124 : vector<8x128xf32> to vector<8x128xbf16>
    %cst_43 = arith.constant dense<0.000000e+00> : vector<8x512xf32>
    %127 = tpu.matmul %126, %1, %cst_43 {dimension_numbers = #tpu.dot_dimension_numbers<[1], [0], [0], [1], [0, 0, 1, 1], [], []>} : vector<8x128xbf16>, vector<128x512xbf16>, vector<8x512xf32> -> vector<8x512xf32>
    %128 = arith.addf %125, %127 : vector<8x512xf32>
    %129 = vector.extract_strided_slice %128 {offsets = [0, 0], sizes = [8, 128], strides = [1, 1]} : vector<8x512xf32> to vector<8x128xf32>
    %130 = math.tanh %129 : vector<8x128xf32>
    %cst_44 = arith.constant 5.000000e-01 : f32
    %131 = vector.broadcast %cst_44 : f32 to vector<8x128xf32>
    %132 = arith.mulf %131, %130 : vector<8x128xf32>
    %cst_45 = arith.constant 5.000000e-01 : f32
    %133 = vector.broadcast %cst_45 : f32 to vector<8x128xf32>
    %134 = arith.addf %133, %132 : vector<8x128xf32>
    %135 = vector.extract_strided_slice %128 {offsets = [0, 128], sizes = [8, 128], strides = [1, 1]} : vector<8x512xf32> to vector<8x128xf32>
    %136 = math.tanh %135 : vector<8x128xf32>
    %cst_46 = arith.constant 5.000000e-01 : f32
    %137 = vector.broadcast %cst_46 : f32 to vector<8x128xf32>
    %138 = arith.mulf %137, %136 : vector<8x128xf32>
    %cst_47 = arith.constant 5.000000e-01 : f32
    %139 = vector.broadcast %cst_47 : f32 to vector<8x128xf32>
    %140 = arith.addf %139, %138 : vector<8x128xf32>
    %141 = vector.extract_strided_slice %128 {offsets = [0, 256], sizes = [8, 128], strides = [1, 1]} : vector<8x512xf32> to vector<8x128xf32>
    %142 = math.tanh %141 : vector<8x128xf32>
    %143 = vector.extract_strided_slice %128 {offsets = [0, 384], sizes = [8, 128], strides = [1, 1]} : vector<8x512xf32> to vector<8x128xf32>
    %144 = math.tanh %143 : vector<8x128xf32>
    %cst_48 = arith.constant 5.000000e-01 : f32
    %145 = vector.broadcast %cst_48 : f32 to vector<8x128xf32>
    %146 = arith.mulf %145, %144 : vector<8x128xf32>
    %cst_49 = arith.constant 5.000000e-01 : f32
    %147 = vector.broadcast %cst_49 : f32 to vector<8x128xf32>
    %148 = arith.addf %147, %146 : vector<8x128xf32>
    %149 = arith.mulf %140, %122 : vector<8x128xf32>
    %150 = arith.mulf %134, %142 : vector<8x128xf32>
    %151 = arith.addf %149, %150 : vector<8x128xf32>
    %152 = math.tanh %151 : vector<8x128xf32>
    %153 = arith.mulf %148, %152 : vector<8x128xf32>
    %154 = vector.extract_strided_slice %10 {offsets = [40, 0], sizes = [8, 512], strides = [1, 1]} : vector<48x512xf32> to vector<8x512xf32>
    %155 = arith.truncf %153 : vector<8x128xf32> to vector<8x128xbf16>
    %cst_50 = arith.constant dense<0.000000e+00> : vector<8x512xf32>
    %156 = tpu.matmul %155, %1, %cst_50 {dimension_numbers = #tpu.dot_dimension_numbers<[1], [0], [0], [1], [0, 0, 1, 1], [], []>} : vector<8x128xbf16>, vector<128x512xbf16>, vector<8x512xf32> -> vector<8x512xf32>
    %157 = arith.addf %154, %156 : vector<8x512xf32>
    %158 = vector.extract_strided_slice %157 {offsets = [0, 0], sizes = [8, 128], strides = [1, 1]} : vector<8x512xf32> to vector<8x128xf32>
    %159 = math.tanh %158 : vector<8x128xf32>
    %cst_51 = arith.constant 5.000000e-01 : f32
    %160 = vector.broadcast %cst_51 : f32 to vector<8x128xf32>
    %161 = arith.mulf %160, %159 : vector<8x128xf32>
    %cst_52 = arith.constant 5.000000e-01 : f32
    %162 = vector.broadcast %cst_52 : f32 to vector<8x128xf32>
    %163 = arith.addf %162, %161 : vector<8x128xf32>
    %164 = vector.extract_strided_slice %157 {offsets = [0, 128], sizes = [8, 128], strides = [1, 1]} : vector<8x512xf32> to vector<8x128xf32>
    %165 = math.tanh %164 : vector<8x128xf32>
    %cst_53 = arith.constant 5.000000e-01 : f32
    %166 = vector.broadcast %cst_53 : f32 to vector<8x128xf32>
    %167 = arith.mulf %166, %165 : vector<8x128xf32>
    %cst_54 = arith.constant 5.000000e-01 : f32
    %168 = vector.broadcast %cst_54 : f32 to vector<8x128xf32>
    %169 = arith.addf %168, %167 : vector<8x128xf32>
    %170 = vector.extract_strided_slice %157 {offsets = [0, 256], sizes = [8, 128], strides = [1, 1]} : vector<8x512xf32> to vector<8x128xf32>
    %171 = math.tanh %170 : vector<8x128xf32>
    %172 = vector.extract_strided_slice %157 {offsets = [0, 384], sizes = [8, 128], strides = [1, 1]} : vector<8x512xf32> to vector<8x128xf32>
    %173 = math.tanh %172 : vector<8x128xf32>
    %cst_55 = arith.constant 5.000000e-01 : f32
    %174 = vector.broadcast %cst_55 : f32 to vector<8x128xf32>
    %175 = arith.mulf %174, %173 : vector<8x128xf32>
    %cst_56 = arith.constant 5.000000e-01 : f32
    %176 = vector.broadcast %cst_56 : f32 to vector<8x128xf32>
    %177 = arith.addf %176, %175 : vector<8x128xf32>
    %178 = arith.mulf %169, %151 : vector<8x128xf32>
    %179 = arith.mulf %163, %171 : vector<8x128xf32>
    %180 = arith.addf %178, %179 : vector<8x128xf32>
    %181 = math.tanh %180 : vector<8x128xf32>
    %182 = arith.mulf %177, %181 : vector<8x128xf32>
    %183 = arith.truncf %182 : vector<8x128xf32> to vector<8x128xbf16>
    %cst_57 = arith.constant dense<0.000000e+00> : vector<8x512xf32>
    %184 = tpu.matmul %183, %3, %cst_57 {dimension_numbers = #tpu.dot_dimension_numbers<[1], [0], [0], [1], [0, 0, 1, 1], [], []>} : vector<8x128xbf16>, vector<128x512xbf16>, vector<8x512xf32> -> vector<8x512xf32>
    %185 = vector.broadcast %4 : vector<1x512xf32> to vector<8x512xf32>
    %186 = arith.addf %184, %185 : vector<8x512xf32>
    %187 = vector.extract_strided_slice %186 {offsets = [0, 0], sizes = [8, 128], strides = [1, 1]} : vector<8x512xf32> to vector<8x128xf32>
    %188 = math.tanh %187 : vector<8x128xf32>
    %cst_58 = arith.constant 5.000000e-01 : f32
    %189 = vector.broadcast %cst_58 : f32 to vector<8x128xf32>
    %190 = arith.mulf %189, %188 : vector<8x128xf32>
    %cst_59 = arith.constant 5.000000e-01 : f32
    %191 = vector.broadcast %cst_59 : f32 to vector<8x128xf32>
    %192 = arith.addf %191, %190 : vector<8x128xf32>
    %193 = vector.extract_strided_slice %186 {offsets = [0, 128], sizes = [8, 128], strides = [1, 1]} : vector<8x512xf32> to vector<8x128xf32>
    %194 = math.tanh %193 : vector<8x128xf32>
    %cst_60 = arith.constant 5.000000e-01 : f32
    %195 = vector.broadcast %cst_60 : f32 to vector<8x128xf32>
    %196 = arith.mulf %195, %194 : vector<8x128xf32>
    %cst_61 = arith.constant 5.000000e-01 : f32
    %197 = vector.broadcast %cst_61 : f32 to vector<8x128xf32>
    %198 = arith.addf %197, %196 : vector<8x128xf32>
    %199 = vector.extract_strided_slice %186 {offsets = [0, 256], sizes = [8, 128], strides = [1, 1]} : vector<8x512xf32> to vector<8x128xf32>
    %200 = math.tanh %199 : vector<8x128xf32>
    %201 = vector.extract_strided_slice %186 {offsets = [0, 384], sizes = [8, 128], strides = [1, 1]} : vector<8x512xf32> to vector<8x128xf32>
    %202 = math.tanh %201 : vector<8x128xf32>
    %cst_62 = arith.constant 5.000000e-01 : f32
    %203 = vector.broadcast %cst_62 : f32 to vector<8x128xf32>
    %204 = arith.mulf %203, %202 : vector<8x128xf32>
    %cst_63 = arith.constant 5.000000e-01 : f32
    %205 = vector.broadcast %cst_63 : f32 to vector<8x128xf32>
    %206 = arith.addf %205, %204 : vector<8x128xf32>
    %207 = arith.mulf %198, %180 : vector<8x128xf32>
    %208 = arith.mulf %192, %200 : vector<8x128xf32>
    %209 = arith.addf %207, %208 : vector<8x128xf32>
    %210 = math.tanh %209 : vector<8x128xf32>
    %211 = arith.mulf %206, %210 : vector<8x128xf32>
    %212 = arith.truncf %211 : vector<8x128xf32> to vector<8x128xbf16>
    %cst_64 = arith.constant dense<0.000000e+00> : vector<8x512xf32>
    %213 = tpu.matmul %212, %5, %cst_64 {dimension_numbers = #tpu.dot_dimension_numbers<[1], [0], [0], [1], [0, 0, 1, 1], [], []>} : vector<8x128xbf16>, vector<128x512xbf16>, vector<8x512xf32> -> vector<8x512xf32>
    %214 = vector.broadcast %6 : vector<1x512xf32> to vector<8x512xf32>
    %215 = arith.addf %213, %214 : vector<8x512xf32>
    %216 = vector.extract_strided_slice %215 {offsets = [0, 0], sizes = [8, 128], strides = [1, 1]} : vector<8x512xf32> to vector<8x128xf32>
    %217 = math.tanh %216 : vector<8x128xf32>
    %cst_65 = arith.constant 5.000000e-01 : f32
    %218 = vector.broadcast %cst_65 : f32 to vector<8x128xf32>
    %219 = arith.mulf %218, %217 : vector<8x128xf32>
    %cst_66 = arith.constant 5.000000e-01 : f32
    %220 = vector.broadcast %cst_66 : f32 to vector<8x128xf32>
    %221 = arith.addf %220, %219 : vector<8x128xf32>
    %222 = vector.extract_strided_slice %215 {offsets = [0, 128], sizes = [8, 128], strides = [1, 1]} : vector<8x512xf32> to vector<8x128xf32>
    %223 = math.tanh %222 : vector<8x128xf32>
    %cst_67 = arith.constant 5.000000e-01 : f32
    %224 = vector.broadcast %cst_67 : f32 to vector<8x128xf32>
    %225 = arith.mulf %224, %223 : vector<8x128xf32>
    %cst_68 = arith.constant 5.000000e-01 : f32
    %226 = vector.broadcast %cst_68 : f32 to vector<8x128xf32>
    %227 = arith.addf %226, %225 : vector<8x128xf32>
    %228 = vector.extract_strided_slice %215 {offsets = [0, 256], sizes = [8, 128], strides = [1, 1]} : vector<8x512xf32> to vector<8x128xf32>
    %229 = math.tanh %228 : vector<8x128xf32>
    %230 = vector.extract_strided_slice %215 {offsets = [0, 384], sizes = [8, 128], strides = [1, 1]} : vector<8x512xf32> to vector<8x128xf32>
    %231 = math.tanh %230 : vector<8x128xf32>
    %cst_69 = arith.constant 5.000000e-01 : f32
    %232 = vector.broadcast %cst_69 : f32 to vector<8x128xf32>
    %233 = arith.mulf %232, %231 : vector<8x128xf32>
    %cst_70 = arith.constant 5.000000e-01 : f32
    %234 = vector.broadcast %cst_70 : f32 to vector<8x128xf32>
    %235 = arith.addf %234, %233 : vector<8x128xf32>
    %236 = arith.mulf %227, %209 : vector<8x128xf32>
    %237 = arith.mulf %221, %229 : vector<8x128xf32>
    %238 = arith.addf %236, %237 : vector<8x128xf32>
    %239 = math.tanh %238 : vector<8x128xf32>
    %240 = arith.mulf %235, %239 : vector<8x128xf32>
    %241 = arith.truncf %240 : vector<8x128xf32> to vector<8x128xbf16>
    %cst_71 = arith.constant dense<0.000000e+00> : vector<8x512xf32>
    %242 = tpu.matmul %241, %5, %cst_71 {dimension_numbers = #tpu.dot_dimension_numbers<[1], [0], [0], [1], [0, 0, 1, 1], [], []>} : vector<8x128xbf16>, vector<128x512xbf16>, vector<8x512xf32> -> vector<8x512xf32>
    %243 = vector.broadcast %6 : vector<1x512xf32> to vector<8x512xf32>
    %244 = arith.addf %242, %243 : vector<8x512xf32>
    %245 = vector.extract_strided_slice %244 {offsets = [0, 0], sizes = [8, 128], strides = [1, 1]} : vector<8x512xf32> to vector<8x128xf32>
    %246 = math.tanh %245 : vector<8x128xf32>
    %cst_72 = arith.constant 5.000000e-01 : f32
    %247 = vector.broadcast %cst_72 : f32 to vector<8x128xf32>
    %248 = arith.mulf %247, %246 : vector<8x128xf32>
    %cst_73 = arith.constant 5.000000e-01 : f32
    %249 = vector.broadcast %cst_73 : f32 to vector<8x128xf32>
    %250 = arith.addf %249, %248 : vector<8x128xf32>
    %251 = vector.extract_strided_slice %244 {offsets = [0, 128], sizes = [8, 128], strides = [1, 1]} : vector<8x512xf32> to vector<8x128xf32>
    %252 = math.tanh %251 : vector<8x128xf32>
    %cst_74 = arith.constant 5.000000e-01 : f32
    %253 = vector.broadcast %cst_74 : f32 to vector<8x128xf32>
    %254 = arith.mulf %253, %252 : vector<8x128xf32>
    %cst_75 = arith.constant 5.000000e-01 : f32
    %255 = vector.broadcast %cst_75 : f32 to vector<8x128xf32>
    %256 = arith.addf %255, %254 : vector<8x128xf32>
    %257 = vector.extract_strided_slice %244 {offsets = [0, 256], sizes = [8, 128], strides = [1, 1]} : vector<8x512xf32> to vector<8x128xf32>
    %258 = math.tanh %257 : vector<8x128xf32>
    %259 = vector.extract_strided_slice %244 {offsets = [0, 384], sizes = [8, 128], strides = [1, 1]} : vector<8x512xf32> to vector<8x128xf32>
    %260 = math.tanh %259 : vector<8x128xf32>
    %cst_76 = arith.constant 5.000000e-01 : f32
    %261 = vector.broadcast %cst_76 : f32 to vector<8x128xf32>
    %262 = arith.mulf %261, %260 : vector<8x128xf32>
    %cst_77 = arith.constant 5.000000e-01 : f32
    %263 = vector.broadcast %cst_77 : f32 to vector<8x128xf32>
    %264 = arith.addf %263, %262 : vector<8x128xf32>
    %265 = arith.mulf %256, %238 : vector<8x128xf32>
    %266 = arith.mulf %250, %258 : vector<8x128xf32>
    %267 = arith.addf %265, %266 : vector<8x128xf32>
    %268 = math.tanh %267 : vector<8x128xf32>
    %269 = arith.mulf %264, %268 : vector<8x128xf32>
    %270 = arith.truncf %269 : vector<8x128xf32> to vector<8x128xbf16>
    %cst_78 = arith.constant dense<0.000000e+00> : vector<8x512xf32>
    %271 = tpu.matmul %270, %5, %cst_78 {dimension_numbers = #tpu.dot_dimension_numbers<[1], [0], [0], [1], [0, 0, 1, 1], [], []>} : vector<8x128xbf16>, vector<128x512xbf16>, vector<8x512xf32> -> vector<8x512xf32>
    %272 = vector.broadcast %6 : vector<1x512xf32> to vector<8x512xf32>
    %273 = arith.addf %271, %272 : vector<8x512xf32>
    %274 = vector.extract_strided_slice %273 {offsets = [0, 0], sizes = [8, 128], strides = [1, 1]} : vector<8x512xf32> to vector<8x128xf32>
    %275 = math.tanh %274 : vector<8x128xf32>
    %cst_79 = arith.constant 5.000000e-01 : f32
    %276 = vector.broadcast %cst_79 : f32 to vector<8x128xf32>
    %277 = arith.mulf %276, %275 : vector<8x128xf32>
    %cst_80 = arith.constant 5.000000e-01 : f32
    %278 = vector.broadcast %cst_80 : f32 to vector<8x128xf32>
    %279 = arith.addf %278, %277 : vector<8x128xf32>
    %280 = vector.extract_strided_slice %273 {offsets = [0, 128], sizes = [8, 128], strides = [1, 1]} : vector<8x512xf32> to vector<8x128xf32>
    %281 = math.tanh %280 : vector<8x128xf32>
    %cst_81 = arith.constant 5.000000e-01 : f32
    %282 = vector.broadcast %cst_81 : f32 to vector<8x128xf32>
    %283 = arith.mulf %282, %281 : vector<8x128xf32>
    %cst_82 = arith.constant 5.000000e-01 : f32
    %284 = vector.broadcast %cst_82 : f32 to vector<8x128xf32>
    %285 = arith.addf %284, %283 : vector<8x128xf32>
    %286 = vector.extract_strided_slice %273 {offsets = [0, 256], sizes = [8, 128], strides = [1, 1]} : vector<8x512xf32> to vector<8x128xf32>
    %287 = math.tanh %286 : vector<8x128xf32>
    %288 = vector.extract_strided_slice %273 {offsets = [0, 384], sizes = [8, 128], strides = [1, 1]} : vector<8x512xf32> to vector<8x128xf32>
    %289 = math.tanh %288 : vector<8x128xf32>
    %cst_83 = arith.constant 5.000000e-01 : f32
    %290 = vector.broadcast %cst_83 : f32 to vector<8x128xf32>
    %291 = arith.mulf %290, %289 : vector<8x128xf32>
    %cst_84 = arith.constant 5.000000e-01 : f32
    %292 = vector.broadcast %cst_84 : f32 to vector<8x128xf32>
    %293 = arith.addf %292, %291 : vector<8x128xf32>
    %294 = arith.mulf %285, %267 : vector<8x128xf32>
    %295 = arith.mulf %279, %287 : vector<8x128xf32>
    %296 = arith.addf %294, %295 : vector<8x128xf32>
    %297 = math.tanh %296 : vector<8x128xf32>
    %298 = arith.mulf %293, %297 : vector<8x128xf32>
    %299 = arith.truncf %298 : vector<8x128xf32> to vector<8x128xbf16>
    %cst_85 = arith.constant dense<0.000000e+00> : vector<8x512xf32>
    %300 = tpu.matmul %299, %5, %cst_85 {dimension_numbers = #tpu.dot_dimension_numbers<[1], [0], [0], [1], [0, 0, 1, 1], [], []>} : vector<8x128xbf16>, vector<128x512xbf16>, vector<8x512xf32> -> vector<8x512xf32>
    %301 = vector.broadcast %6 : vector<1x512xf32> to vector<8x512xf32>
    %302 = arith.addf %300, %301 : vector<8x512xf32>
    %303 = vector.extract_strided_slice %302 {offsets = [0, 0], sizes = [8, 128], strides = [1, 1]} : vector<8x512xf32> to vector<8x128xf32>
    %304 = math.tanh %303 : vector<8x128xf32>
    %cst_86 = arith.constant 5.000000e-01 : f32
    %305 = vector.broadcast %cst_86 : f32 to vector<8x128xf32>
    %306 = arith.mulf %305, %304 : vector<8x128xf32>
    %cst_87 = arith.constant 5.000000e-01 : f32
    %307 = vector.broadcast %cst_87 : f32 to vector<8x128xf32>
    %308 = arith.addf %307, %306 : vector<8x128xf32>
    %309 = vector.extract_strided_slice %302 {offsets = [0, 128], sizes = [8, 128], strides = [1, 1]} : vector<8x512xf32> to vector<8x128xf32>
    %310 = math.tanh %309 : vector<8x128xf32>
    %cst_88 = arith.constant 5.000000e-01 : f32
    %311 = vector.broadcast %cst_88 : f32 to vector<8x128xf32>
    %312 = arith.mulf %311, %310 : vector<8x128xf32>
    %cst_89 = arith.constant 5.000000e-01 : f32
    %313 = vector.broadcast %cst_89 : f32 to vector<8x128xf32>
    %314 = arith.addf %313, %312 : vector<8x128xf32>
    %315 = vector.extract_strided_slice %302 {offsets = [0, 256], sizes = [8, 128], strides = [1, 1]} : vector<8x512xf32> to vector<8x128xf32>
    %316 = math.tanh %315 : vector<8x128xf32>
    %317 = vector.extract_strided_slice %302 {offsets = [0, 384], sizes = [8, 128], strides = [1, 1]} : vector<8x512xf32> to vector<8x128xf32>
    %318 = math.tanh %317 : vector<8x128xf32>
    %cst_90 = arith.constant 5.000000e-01 : f32
    %319 = vector.broadcast %cst_90 : f32 to vector<8x128xf32>
    %320 = arith.mulf %319, %318 : vector<8x128xf32>
    %cst_91 = arith.constant 5.000000e-01 : f32
    %321 = vector.broadcast %cst_91 : f32 to vector<8x128xf32>
    %322 = arith.addf %321, %320 : vector<8x128xf32>
    %323 = arith.mulf %314, %296 : vector<8x128xf32>
    %324 = arith.mulf %308, %316 : vector<8x128xf32>
    %325 = arith.addf %323, %324 : vector<8x128xf32>
    %326 = math.tanh %325 : vector<8x128xf32>
    %327 = arith.mulf %322, %326 : vector<8x128xf32>
    %328 = arith.truncf %327 : vector<8x128xf32> to vector<8x128xbf16>
    %cst_92 = arith.constant dense<0.000000e+00> : vector<8x512xf32>
    %329 = tpu.matmul %328, %5, %cst_92 {dimension_numbers = #tpu.dot_dimension_numbers<[1], [0], [0], [1], [0, 0, 1, 1], [], []>} : vector<8x128xbf16>, vector<128x512xbf16>, vector<8x512xf32> -> vector<8x512xf32>
    %330 = vector.broadcast %6 : vector<1x512xf32> to vector<8x512xf32>
    %331 = arith.addf %329, %330 : vector<8x512xf32>
    %332 = vector.extract_strided_slice %331 {offsets = [0, 0], sizes = [8, 128], strides = [1, 1]} : vector<8x512xf32> to vector<8x128xf32>
    %333 = math.tanh %332 : vector<8x128xf32>
    %cst_93 = arith.constant 5.000000e-01 : f32
    %334 = vector.broadcast %cst_93 : f32 to vector<8x128xf32>
    %335 = arith.mulf %334, %333 : vector<8x128xf32>
    %cst_94 = arith.constant 5.000000e-01 : f32
    %336 = vector.broadcast %cst_94 : f32 to vector<8x128xf32>
    %337 = arith.addf %336, %335 : vector<8x128xf32>
    %338 = vector.extract_strided_slice %331 {offsets = [0, 128], sizes = [8, 128], strides = [1, 1]} : vector<8x512xf32> to vector<8x128xf32>
    %339 = math.tanh %338 : vector<8x128xf32>
    %cst_95 = arith.constant 5.000000e-01 : f32
    %340 = vector.broadcast %cst_95 : f32 to vector<8x128xf32>
    %341 = arith.mulf %340, %339 : vector<8x128xf32>
    %cst_96 = arith.constant 5.000000e-01 : f32
    %342 = vector.broadcast %cst_96 : f32 to vector<8x128xf32>
    %343 = arith.addf %342, %341 : vector<8x128xf32>
    %344 = vector.extract_strided_slice %331 {offsets = [0, 256], sizes = [8, 128], strides = [1, 1]} : vector<8x512xf32> to vector<8x128xf32>
    %345 = math.tanh %344 : vector<8x128xf32>
    %346 = vector.extract_strided_slice %331 {offsets = [0, 384], sizes = [8, 128], strides = [1, 1]} : vector<8x512xf32> to vector<8x128xf32>
    %347 = math.tanh %346 : vector<8x128xf32>
    %cst_97 = arith.constant 5.000000e-01 : f32
    %348 = vector.broadcast %cst_97 : f32 to vector<8x128xf32>
    %349 = arith.mulf %348, %347 : vector<8x128xf32>
    %cst_98 = arith.constant 5.000000e-01 : f32
    %350 = vector.broadcast %cst_98 : f32 to vector<8x128xf32>
    %351 = arith.addf %350, %349 : vector<8x128xf32>
    %352 = arith.mulf %343, %325 : vector<8x128xf32>
    %353 = arith.mulf %337, %345 : vector<8x128xf32>
    %354 = arith.addf %352, %353 : vector<8x128xf32>
    %355 = math.tanh %354 : vector<8x128xf32>
    %356 = arith.mulf %351, %355 : vector<8x128xf32>
    %357 = arith.truncf %356 : vector<8x128xf32> to vector<8x128xbf16>
    %cst_99 = arith.constant dense<0.000000e+00> : vector<8x512xf32>
    %358 = tpu.matmul %357, %5, %cst_99 {dimension_numbers = #tpu.dot_dimension_numbers<[1], [0], [0], [1], [0, 0, 1, 1], [], []>} : vector<8x128xbf16>, vector<128x512xbf16>, vector<8x512xf32> -> vector<8x512xf32>
    %359 = vector.broadcast %6 : vector<1x512xf32> to vector<8x512xf32>
    %360 = arith.addf %358, %359 : vector<8x512xf32>
    %361 = vector.extract_strided_slice %360 {offsets = [0, 0], sizes = [8, 128], strides = [1, 1]} : vector<8x512xf32> to vector<8x128xf32>
    %362 = math.tanh %361 : vector<8x128xf32>
    %cst_100 = arith.constant 5.000000e-01 : f32
    %363 = vector.broadcast %cst_100 : f32 to vector<8x128xf32>
    %364 = arith.mulf %363, %362 : vector<8x128xf32>
    %cst_101 = arith.constant 5.000000e-01 : f32
    %365 = vector.broadcast %cst_101 : f32 to vector<8x128xf32>
    %366 = arith.addf %365, %364 : vector<8x128xf32>
    %367 = vector.extract_strided_slice %360 {offsets = [0, 128], sizes = [8, 128], strides = [1, 1]} : vector<8x512xf32> to vector<8x128xf32>
    %368 = math.tanh %367 : vector<8x128xf32>
    %cst_102 = arith.constant 5.000000e-01 : f32
    %369 = vector.broadcast %cst_102 : f32 to vector<8x128xf32>
    %370 = arith.mulf %369, %368 : vector<8x128xf32>
    %cst_103 = arith.constant 5.000000e-01 : f32
    %371 = vector.broadcast %cst_103 : f32 to vector<8x128xf32>
    %372 = arith.addf %371, %370 : vector<8x128xf32>
    %373 = vector.extract_strided_slice %360 {offsets = [0, 256], sizes = [8, 128], strides = [1, 1]} : vector<8x512xf32> to vector<8x128xf32>
    %374 = math.tanh %373 : vector<8x128xf32>
    %375 = vector.extract_strided_slice %360 {offsets = [0, 384], sizes = [8, 128], strides = [1, 1]} : vector<8x512xf32> to vector<8x128xf32>
    %376 = math.tanh %375 : vector<8x128xf32>
    %cst_104 = arith.constant 5.000000e-01 : f32
    %377 = vector.broadcast %cst_104 : f32 to vector<8x128xf32>
    %378 = arith.mulf %377, %376 : vector<8x128xf32>
    %cst_105 = arith.constant 5.000000e-01 : f32
    %379 = vector.broadcast %cst_105 : f32 to vector<8x128xf32>
    %380 = arith.addf %379, %378 : vector<8x128xf32>
    %381 = arith.mulf %372, %354 : vector<8x128xf32>
    %382 = arith.mulf %366, %374 : vector<8x128xf32>
    %383 = arith.addf %381, %382 : vector<8x128xf32>
    %384 = math.tanh %383 : vector<8x128xf32>
    %385 = arith.mulf %380, %384 : vector<8x128xf32>
    %386 = arith.truncf %385 : vector<8x128xf32> to vector<8x128xbf16>
    %cst_106 = arith.constant dense<0.000000e+00> : vector<8x512xf32>
    %387 = tpu.matmul %386, %5, %cst_106 {dimension_numbers = #tpu.dot_dimension_numbers<[1], [0], [0], [1], [0, 0, 1, 1], [], []>} : vector<8x128xbf16>, vector<128x512xbf16>, vector<8x512xf32> -> vector<8x512xf32>
    %388 = vector.broadcast %6 : vector<1x512xf32> to vector<8x512xf32>
    %389 = arith.addf %387, %388 : vector<8x512xf32>
    %390 = vector.extract_strided_slice %389 {offsets = [0, 0], sizes = [8, 128], strides = [1, 1]} : vector<8x512xf32> to vector<8x128xf32>
    %391 = math.tanh %390 : vector<8x128xf32>
    %cst_107 = arith.constant 5.000000e-01 : f32
    %392 = vector.broadcast %cst_107 : f32 to vector<8x128xf32>
    %393 = arith.mulf %392, %391 : vector<8x128xf32>
    %cst_108 = arith.constant 5.000000e-01 : f32
    %394 = vector.broadcast %cst_108 : f32 to vector<8x128xf32>
    %395 = arith.addf %394, %393 : vector<8x128xf32>
    %396 = vector.extract_strided_slice %389 {offsets = [0, 128], sizes = [8, 128], strides = [1, 1]} : vector<8x512xf32> to vector<8x128xf32>
    %397 = math.tanh %396 : vector<8x128xf32>
    %cst_109 = arith.constant 5.000000e-01 : f32
    %398 = vector.broadcast %cst_109 : f32 to vector<8x128xf32>
    %399 = arith.mulf %398, %397 : vector<8x128xf32>
    %cst_110 = arith.constant 5.000000e-01 : f32
    %400 = vector.broadcast %cst_110 : f32 to vector<8x128xf32>
    %401 = arith.addf %400, %399 : vector<8x128xf32>
    %402 = vector.extract_strided_slice %389 {offsets = [0, 256], sizes = [8, 128], strides = [1, 1]} : vector<8x512xf32> to vector<8x128xf32>
    %403 = math.tanh %402 : vector<8x128xf32>
    %404 = vector.extract_strided_slice %389 {offsets = [0, 384], sizes = [8, 128], strides = [1, 1]} : vector<8x512xf32> to vector<8x128xf32>
    %405 = math.tanh %404 : vector<8x128xf32>
    %cst_111 = arith.constant 5.000000e-01 : f32
    %406 = vector.broadcast %cst_111 : f32 to vector<8x128xf32>
    %407 = arith.mulf %406, %405 : vector<8x128xf32>
    %cst_112 = arith.constant 5.000000e-01 : f32
    %408 = vector.broadcast %cst_112 : f32 to vector<8x128xf32>
    %409 = arith.addf %408, %407 : vector<8x128xf32>
    %410 = arith.mulf %401, %383 : vector<8x128xf32>
    %411 = arith.mulf %395, %403 : vector<8x128xf32>
    %412 = arith.addf %410, %411 : vector<8x128xf32>
    %413 = math.tanh %412 : vector<8x128xf32>
    %414 = arith.mulf %409, %413 : vector<8x128xf32>
    tpu.wait_dma2 semaphore(%arg12 : memref<!tpu.dma_semaphore, #tpu.memory_space<semaphore_mem>>) src(%arg8 : memref<128x1024xbf16, #tpu.memory_space<any>>) dst(%arg11 : memref<128x1024xbf16, #tpu.memory_space<vmem>>)
    %c0_113 = arith.constant 0 : index
    %c0_114 = arith.constant 0 : index
    %415 = vector.load %arg11[%c0_113, %c0_114] : memref<128x1024xbf16, #tpu.memory_space<vmem>>, vector<128x1024xbf16>
    %c0_115 = arith.constant 0 : index
    %c0_116 = arith.constant 0 : index
    %416 = vector.load %arg9[%c0_115, %c0_116] : memref<1x1024xf32, #tpu.memory_space<vmem>>, vector<1x1024xf32>
    %417 = arith.truncf %414 : vector<8x128xf32> to vector<8x128xbf16>
    %cst_117 = arith.constant dense<0.000000e+00> : vector<8x1024xf32>
    %418 = tpu.matmul %417, %415, %cst_117 {dimension_numbers = #tpu.dot_dimension_numbers<[1], [0], [0], [1], [0, 0, 1, 1], [], []>} : vector<8x128xbf16>, vector<128x1024xbf16>, vector<8x1024xf32> -> vector<8x1024xf32>
    %419 = vector.broadcast %416 : vector<1x1024xf32> to vector<8x1024xf32>
    %420 = arith.addf %418, %419 : vector<8x1024xf32>
    %c0_118 = arith.constant 0 : index
    %c0_119 = arith.constant 0 : index
    %421 = vector.load %arg10[%c0_118, %c0_119] : memref<8x1024xf32, #tpu.memory_space<vmem>>, vector<8x1024xf32>
    tpu.vector_store %arg10[%c0_118, %c0_119], %420 {strides = array<i32>} : memref<8x1024xf32, #tpu.memory_space<vmem>>, vector<8x1024xf32>,
    return
  }
}

</mosaic_0001>

<bundles_post_ra>
// kernel: forward.1
= control target key start
LH: loop header
LB: loop body
LE: loop exit
PB: predicated region body
PF: predicated region fallthrough
CT: control target
= control target key end

     0   :  { %15 = vsyncpa [#allocation6], 0  ;;  %s4533_s0 = inlined_call_operand.vmem [shape: bf16[48,128], index: 0, kind: input, shape index: {}]   ;;  %s4534_s1 = inlined_call_operand.hbm [shape: bf16[128,512], index: 1, kind: input, shape index: {}]   ;;  %s4535_s2 = inlined_call_operand.hbm [shape: bf16[128,512], index: 2, kind: input, shape index: {}]   ;;  %s4536_s3 = inlined_call_operand.vmem [shape: f32[1,512], index: 3, kind: input, shape index: {}]   ;;  %s4537_s4 = inlined_call_operand.hbm [shape: bf16[128,512], index: 4, kind: input, shape index: {}]   ;;  %s4538_s5 = inlined_call_operand.vmem [shape: f32[1,512], index: 5, kind: input, shape index: {}]   ;;  %s4539_s6 = inlined_call_operand.hbm [shape: bf16[128,512], index: 6, kind: input, shape index: {}]   ;;  %s4540_s7 = inlined_call_operand.vmem [shape: f32[1,512], index: 7, kind: input, shape index: {}]   ;;  %s4541_s8 = inlined_call_operand.hbm [shape: bf16[128,1024], index: 8, kind: input, shape index: {}]   ;;  %s4542_s9 = inlined_call_operand.vmem [shape: f32[1,1024], index: 9, kind: input, shape index: {}]   ;;  %s4543_s10 = inlined_call_operand.vmem [shape: f32[8,1024], index: 10, kind: output, shape index: {}]  }
   0x1   :  { %16 = vsyncpa [#allocation8], 0 }
   0x2   :  { %17 = vsyncpa [#allocation11], 0  ;;  %s37_s15 = sshll.u32 %s4535_s2, 4  ;;  %s3729_s16 = smov [#allocation7]   ;;  %s38_s15 = int_to_ptr.hbm [resolvable:$true] %s37_s15 }
   0x3   :  { %s39_s17 = sshll.u32 %s3729_s16, 4  ;;  %s24_s20 = sshll.u32 %s4534_s1, 4  ;;  %s40_s17 = int_to_ptr.vmem [resolvable:$true] %s39_s17  ;;  %s25_s20 = int_to_ptr.hbm [resolvable:$true] %s24_s20 }
   0x4   :  { %s3730_s21 = smov 256   ;;  %s3731_s22 = smov 16  }
   0x5   :  { %45 = dma.hbm_to_vmem [thread:$0]  %s38_s15, 4096, %s40_s17, [#allocation8], %s3730_s21, %s3730_s21, %s3731_s22  }
   0x6   :  { %s3732_s23 = smov [#allocation5]   ;;  %s52_s27 = sshll.u32 %s4537_s4, 4  ;;  %s53_s27 = int_to_ptr.hbm [resolvable:$true] %s52_s27 }
   0x7   :  { %s26_s24 = sshll.u32 %s3732_s23, 4  ;;  %s67_s29 = sshll.u32 %s4539_s6, 4  ;;  %s27_s24 = int_to_ptr.vmem [resolvable:$true] %s26_s24  ;;  %s68_s29 = int_to_ptr.hbm [resolvable:$true] %s67_s29 }
   0x8   :  { %32 = dma.hbm_to_vmem [thread:$0]  %s25_s20, 4096, %s27_s24, [#allocation6], %s3730_s21, %s3730_s21, %s3731_s22  }
   0x9   :  { %s3733_s30 = smov [#allocation9]   ;;  %s3734_s1 = smov [#allocation10]  }
   0xa   :  { %s54_s11 = sshll.u32 %s3733_s30, 4  ;;  %s69_s12 = sshll.u32 %s3734_s1, 4  ;;  %s55_s11 = int_to_ptr.vmem [resolvable:$true] %s54_s11  ;;  %s70_s12 = int_to_ptr.vmem [resolvable:$true] %s69_s12 }
   0xb   :  { %60 = dma.hbm_to_vmem [thread:$0]  %s53_s27, 4096, %s55_s11, [#allocation8], %s3730_s21, %s3730_s21, %s3731_s22  }
   0xc   :  { %75 = dma.hbm_to_vmem [thread:$0]  %s68_s29, 4096, %s70_s12, [#allocation11], %s3730_s21, %s3730_s21, %s3731_s22  }
   0xd   :  { %3721 = dma.done.wait [#allocation6], 4096  }
   0xe   :  { %3722 = vsyncadd [#allocation6], 4294963200 }
   0xf   :  { %3723 = dma.done.wait [#allocation8], 8192  }
  0x10   :  { %3724 = vsyncadd [#allocation8], 4294959104 }
  0x11   :  { %3725 = dma.done.wait [#allocation11], 4096  }
  0x12   :  { %3726 = vsyncadd [#allocation11], 4294963200  ;;  %v2604_v0 = vld [vmem:[#allocation5 + $0xe0] sm:$0xf]  ;;  %v3289_v1 = vld [vmem:[#allocation5 + $0xec] sm:$0xf0] }
  0x13   :  { %v3287_v2 = vld [vmem:[#allocation5 + $0xe4] sm:$0xf]  ;;  %v2605_v3 = vor.u32 %v3289_v1, %v2604_v0  ;;  %v2606_v4 = vld [vmem:[#allocation5 + $0xf0] sm:$0xf0]  ;;  %v2612_v5 = vld [vmem:[#allocation5 + $0xe8] sm:$0xf] }
  0x14   :  { %v3290_v6 = vld [vmem:[#allocation5 + $0xf4] sm:$0xf0]  ;;  %v2609_v7 = vor.u32 %v3287_v2, %v2606_v4  ;;  %v3288_v9 = vld [vmem:[#allocation5 + $0xec] sm:$0xf]  ;;  %v2614_v10 = vld [vmem:[#allocation5 + $0xf8] sm:$0xf0] }
  0x15   :  { %v2613_v8 = vor.u32 %v3290_v6, %v2612_v5  ;;  %v2588_v11 = vld [vmem:[#allocation5 + $0xc0] sm:$0xf]  ;;  %433 = vmatpush.bf16.msra.mxu0 %v2605_v3  ;;  %v2617_v12 = vor.u32 %v3288_v9, %v2614_v10  ;;  %v3285_v13 = vld [vmem:[#allocation5 + $0xcc] sm:$0xf0]  ;;  %v3283_v14 = vld [vmem:[#allocation5 + $0xc4] sm:$0xf] }
  0x16   :  { %v2590_v15 = vld [vmem:[#allocation5 + $0xd0] sm:$0xf0]  ;;  %457 = vmatpush.bf16.msra.mxu1 %v2609_v7  ;;  %v2589_v16 = vor.u32 %v3285_v13, %v2588_v11  ;;  %v2596_v18 = vld [vmem:[#allocation5 + $0xc8] sm:$0xf]  ;;  %v3286_v19 = vld [vmem:[#allocation5 + $0xd4] sm:$0xf0] }
  0x17   :  { %481 = vmatpush.bf16.msra.mxu2 %v2613_v8  ;;  %v2593_v17 = vor.u32 %v3283_v14, %v2590_v15  ;;  %v3284_v20 = vld [vmem:[#allocation5 + $0xcc] sm:$0xf]  ;;  %505 = vmatpush.bf16.msra.mxu3 %v2617_v12  ;;  %v2597_v21 = vor.u32 %v3286_v19, %v2596_v18  ;;  %v2598_v22 = vld [vmem:[#allocation5 + $0xd8] sm:$0xf0]  ;;  %v2572_v23 = vld [vmem:[#allocation5 + $0xa0] sm:$0xf] }
  0x18   :  { %v3281_v24 = vld [vmem:[#allocation5 + $0xac] sm:$0xf0]  ;;  %v2601_v25 = vor.u32 %v3284_v20, %v2598_v22  ;;  %v3279_v26 = vld [vmem:[#allocation5 + $0xa4] sm:$0xf]  ;;  %v2574_v27 = vld [vmem:[#allocation5 + $0xb0] sm:$0xf0] }
  0x19   :  { %v2580_v28 = vld [vmem:[#allocation5 + $0xa8] sm:$0xf]  ;;  %434 = vmatpush.bf16.msra.mxu0 %v2589_v16  ;;  %v2573_v29 = vor.u32 %v3281_v24, %v2572_v23  ;;  %v3282_v30 = vld [vmem:[#allocation5 + $0xb4] sm:$0xf0]  ;;  %v3280_v31 = vld [vmem:[#allocation5 + $0xac] sm:$0xf]  ;;  %v2577_v33 = vor.u32 %v3279_v26, %v2574_v27 }
  0x1a   :  { %v2582_v32 = vld [vmem:[#allocation5 + $0xb8] sm:$0xf0]  ;;  %458 = vmatpush.bf16.msra.mxu1 %v2593_v17  ;;  %v2581_v34 = vor.u32 %v3282_v30, %v2580_v28  ;;  %v2556_v35 = vld [vmem:[#allocation5 + $0x80] sm:$0xf]  ;;  %v3277_v36 = vld [vmem:[#allocation5 + $0x8c] sm:$0xf0] }
  0x1b   :  { %482 = vmatpush.bf16.msra.mxu2 %v2597_v21  ;;  %v3275_v37 = vld [vmem:[#allocation5 + $0x84] sm:$0xf]  ;;  %506 = vmatpush.bf16.msra.mxu3 %v2601_v25  ;;  %v2585_v38 = vor.u32 %v3280_v31, %v2582_v32  ;;  %v2558_v39 = vld [vmem:[#allocation5 + $0x90] sm:$0xf0]  ;;  %v2564_v40 = vld [vmem:[#allocation5 + $0x88] sm:$0xf]  ;;  %v2557_v44 = vor.u32 %v3277_v36, %v2556_v35 }
  0x1c   :  { %v3278_v41 = vld [vmem:[#allocation5 + $0x94] sm:$0xf0]  ;;  %v3276_v42 = vld [vmem:[#allocation5 + $0x8c] sm:$0xf]  ;;  %v2566_v43 = vld [vmem:[#allocation5 + $0x98] sm:$0xf0]  ;;  %v2561_v45 = vor.u32 %v3275_v37, %v2558_v39 }
  0x1d   :  { %435 = vmatpush.bf16.msra.mxu0 %v2573_v29  ;;  %v2565_v46 = vor.u32 %v3278_v41, %v2564_v40  ;;  %v2540_v47 = vld [vmem:[#allocation5 + $0x60] sm:$0xf]  ;;  %v3273_v48 = vld [vmem:[#allocation5 + $0x6c] sm:$0xf0]  ;;  %v3271_v49 = vld [vmem:[#allocation5 + $0x64] sm:$0xf]  ;;  %v2569_v50 = vor.u32 %v3276_v42, %v2566_v43 }
  0x1e   :  { %459 = vmatpush.bf16.msra.mxu1 %v2577_v33  ;;  %v2542_v51 = vld [vmem:[#allocation5 + $0x70] sm:$0xf0]  ;;  %v2548_v52 = vld [vmem:[#allocation5 + $0x68] sm:$0xf]  ;;  %v3274_v53 = vld [vmem:[#allocation5 + $0x74] sm:$0xf0]  ;;  %v2541_v56 = vor.u32 %v3273_v48, %v2540_v47 }
  0x1f   :  { %483 = vmatpush.bf16.msra.mxu2 %v2581_v34  ;;  %507 = vmatpush.bf16.msra.mxu3 %v2585_v38  ;;  %v3272_v54 = vld [vmem:[#allocation5 + $0x6c] sm:$0xf]  ;;  %v2550_v55 = vld [vmem:[#allocation5 + $0x78] sm:$0xf0]  ;;  %v2545_v57 = vor.u32 %v3271_v49, %v2542_v51  ;;  %v2549_v58 = vor.u32 %v3274_v53, %v2548_v52  ;;  %v2524_v59 = vld [vmem:[#allocation5 + $0x40] sm:$0xf] }
  0x20   :  { %v3269_v60 = vld [vmem:[#allocation5 + $0x4c] sm:$0xf0]  ;;  %v3267_v61 = vld [vmem:[#allocation5 + $0x44] sm:$0xf]  ;;  %v2553_v62 = vor.u32 %v3272_v54, %v2550_v55  ;;  %v2526_v63 = vld [vmem:[#allocation5 + $0x50] sm:$0xf0] }
  0x21   :  { %436 = vmatpush.bf16.msra.mxu0 %v2557_v44  ;;  %v2532_v0 = vld [vmem:[#allocation5 + $0x48] sm:$0xf]  ;;  %v3270_v1 = vld [vmem:[#allocation5 + $0x54] sm:$0xf0]  ;;  %v3268_v2 = vld [vmem:[#allocation5 + $0x4c] sm:$0xf]  ;;  %v2525_v4 = vor.u32 %v3269_v60, %v2524_v59  ;;  %v2529_v5 = vor.u32 %v3267_v61, %v2526_v63 }
  0x22   :  { %460 = vmatpush.bf16.msra.mxu1 %v2561_v45  ;;  %v2534_v3 = vld [vmem:[#allocation5 + $0x58] sm:$0xf0]  ;;  %v2533_v6 = vor.u32 %v3270_v1, %v2532_v0  ;;  %v2508_v7 = vld [vmem:[#allocation5 + $0x20] sm:$0xf]  ;;  %v3265_v8 = vld [vmem:[#allocation5 + $0x2c] sm:$0xf0] }
  0x23   :  { %484 = vmatpush.bf16.msra.mxu2 %v2565_v46  ;;  %508 = vmatpush.bf16.msra.mxu3 %v2569_v50  ;;  %v3263_v9 = vld [vmem:[#allocation5 + $0x24] sm:$0xf]  ;;  %v2537_v10 = vor.u32 %v3268_v2, %v2534_v3  ;;  %v2510_v11 = vld [vmem:[#allocation5 + $0x30] sm:$0xf0]  ;;  %v2516_v12 = vld [vmem:[#allocation5 + $0x28] sm:$0xf]  ;;  %v2509_v16 = vor.u32 %v3265_v8, %v2508_v7 }
  0x24   :  { %v3266_v13 = vld [vmem:[#allocation5 + $0x34] sm:$0xf0]  ;;  %v3264_v14 = vld [vmem:[#allocation5 + $0x2c] sm:$0xf]  ;;  %v2518_v15 = vld [vmem:[#allocation5 + $0x38] sm:$0xf0]  ;;  %v2513_v18 = vor.u32 %v3263_v9, %v2510_v11 }
  0x25   :  { %437 = vmatpush.bf16.msra.mxu0 %v2541_v56  ;;  %v2492_v17 = vld [vmem:[#allocation5] sm:$0xf]  ;;  %v2517_v19 = vor.u32 %v3266_v13, %v2516_v12  ;;  %v3261_v20 = vld [vmem:[#allocation5 + $0xc] sm:$0xf0]  ;;  %v3259_v21 = vld [vmem:[#allocation5 + $0x4] sm:$0xf]  ;;  %v2521_v23 = vor.u32 %v3264_v14, %v2518_v15 }
  0x26   :  { %461 = vmatpush.bf16.msra.mxu1 %v2545_v57  ;;  %v2494_v22 = vld [vmem:[#allocation5 + $0x10] sm:$0xf0]  ;;  %v2500_v24 = vld [vmem:[#allocation5 + $0x8] sm:$0xf]  ;;  %v3262_v25 = vld [vmem:[#allocation5 + $0x14] sm:$0xf0]  ;;  %v2493_v30 = vor.u32 %v3261_v20, %v2492_v17 }
  0x27   :  { %485 = vmatpush.bf16.msra.mxu2 %v2549_v58  ;;  %509 = vmatpush.bf16.msra.mxu3 %v2553_v62  ;;  %v3260_v26 = vld [vmem:[#allocation5 + $0xc] sm:$0xf]  ;;  %v2502_v27 = vld [vmem:[#allocation5 + $0x18] sm:$0xf0]  ;;  %v2740_v28 = vld [vmem:[#allocation7 + $0xe8] sm:$0xf]  ;;  %v2497_v33 = vor.u32 %v3259_v21, %v2494_v22  ;;  %v2501_v34 = vor.u32 %v3262_v25, %v2500_v24 }
  0x28   :  { %v3322_v29 = vld [vmem:[#allocation7 + $0xf4] sm:$0xf0]  ;;  %v3319_v31 = vld [vmem:[#allocation7 + $0xe4] sm:$0xf]  ;;  %v2734_v32 = vld [vmem:[#allocation7 + $0xf0] sm:$0xf0]  ;;  %v2505_v36 = vor.u32 %v3260_v26, %v2502_v27 }
  0x29   :  { %438 = vmatpush.bf16.msra.mxu0 %v2525_v4  ;;  %v3387_v35 = vld [vmem:[%s4533_s0] sm:$0xff]  ;;  %v3806_v37 = vor.u32 %v3322_v29, %v2740_v28  ;;  %v3321_v39 = vld [vmem:[#allocation7 + $0xec] sm:$0xf0]  ;;  %v2724_v40 = vld [vmem:[#allocation7 + $0xc8] sm:$0xf]  ;;  %v3808_v41 = vor.u32 %v3319_v31, %v2734_v32  ;;  %s103_s21 = sshll.u32 %s4541_s8, 4  ;;  %s104_s21 = int_to_ptr.hbm [resolvable:$true] %s103_s21 }
  0x2a   :  { %462 = vmatpush.bf16.msra.mxu1 %v2529_v5  ;;  %v2732_v38 = vld [vmem:[#allocation7 + $0xe0] sm:$0xf]  ;;  %v3318_v42 = vld [vmem:[#allocation7 + $0xd4] sm:$0xf0]  ;;  %v3320_v43 = vld [vmem:[#allocation7 + $0xec] sm:$0xf] }
  0x2b   :  { %486 = vmatpush.bf16.msra.mxu2 %v2533_v6  ;;  %510 = vmatpush.bf16.msra.mxu3 %v2537_v10  ;;  %v2742_v44 = vld [vmem:[#allocation7 + $0xf8] sm:$0xf0]  ;;  %v3315_v45 = vld [vmem:[#allocation7 + $0xc4] sm:$0xf]  ;;  %v2718_v46 = vld [vmem:[#allocation7 + $0xd0] sm:$0xf0]  ;;  %v3810_v47 = vor.u32 %v3321_v39, %v2732_v38  ;;  %v3813_v48 = vor.u32 %v3318_v42, %v2724_v40 }
  0x2c   :  { %v3815_v49 = vor.u32 %v3320_v43, %v2742_v44  ;;  %v2716_v50 = vld [vmem:[#allocation7 + $0xc0] sm:$0xf]  ;;  %v3317_v51 = vld [vmem:[#allocation7 + $0xcc] sm:$0xf0]  ;;  %v2708_v52 = vld [vmem:[#allocation7 + $0xa8] sm:$0xf]  ;;  %v3818_v53 = vor.u32 %v3315_v45, %v2718_v46 }
  0x2d   :  { %439 = vmatpush.bf16.msra.mxu0 %v2509_v16  ;;  %v3314_v54 = vld [vmem:[#allocation7 + $0xb4] sm:$0xf0]  ;;  %v3316_v55 = vld [vmem:[#allocation7 + $0xcc] sm:$0xf]  ;;  %v2726_v56 = vld [vmem:[#allocation7 + $0xd8] sm:$0xf0]  ;;  %v3821_v59 = vor.u32 %v3317_v51, %v2716_v50 }
  0x2e   :  { %463 = vmatpush.bf16.msra.mxu1 %v2513_v18  ;;  %v3311_v57 = vld [vmem:[#allocation7 + $0xa4] sm:$0xf]  ;;  %v2702_v58 = vld [vmem:[#allocation7 + $0xb0] sm:$0xf0]  ;;  %v3825_v60 = vor.u32 %v3314_v54, %v2708_v52  ;;  %v3827_v61 = vor.u32 %v3316_v55, %v2726_v56  ;;  %v2700_v62 = vld [vmem:[#allocation7 + $0xa0] sm:$0xf] }
  0x2f   :  { %487 = vmatpush.bf16.msra.mxu2 %v2517_v19  ;;  %511 = vmatpush.bf16.msra.mxu3 %v2521_v23  ;;  %v3313_v63 = vld [vmem:[#allocation7 + $0xac] sm:$0xf0]  ;;  %v3830_v0 = vor.u32 %v3311_v57, %v2702_v58  ;;  %v3388_v2 = vld [vmem:[%s4533_s0 + $0x8] sm:$0xff]  ;;  %v2710_v4 = vld [vmem:[#allocation7 + $0xb8] sm:$0xf0]  ;;  %s3735_s22 = smov [#allocation2]  }
  0x30   :  { %v3833_v1 = vor.u32 %v3313_v63, %v2700_v62  ;;  %v3312_v3 = vld [vmem:[#allocation7 + $0xac] sm:$0xf]  ;;  %v3389_v5 = vld [vmem:[%s4533_s0 + $0x10] sm:$0xff]  ;;  %v2692_v7 = vld [vmem:[#allocation7 + $0x88] sm:$0xf]  ;;  %s105_s23 = sshll.u32 %s3735_s22, 4  ;;  %s106_s23 = int_to_ptr.vmem [resolvable:$true] %s105_s23 }
  0x31   :  { %440 = vmatpush.bf16.msra.mxu0 %v2493_v30  ;;  %v3845_v6 = vor.u32 %v3312_v3, %v2710_v4  ;;  %v3310_v8 = vld [vmem:[#allocation7 + $0x94] sm:$0xf0]  ;;  %v2684_v9 = vld [vmem:[#allocation7 + $0x80] sm:$0xf]  ;;  %v3309_v11 = vld [vmem:[#allocation7 + $0x8c] sm:$0xf0] }
  0x32   :  { %464 = vmatpush.bf16.msra.mxu1 %v2497_v33  ;;  %v3848_v10 = vor.u32 %v3310_v8, %v2692_v7  ;;  %v3307_v12 = vld [vmem:[#allocation7 + $0x84] sm:$0xf]  ;;  %v2686_v13 = vld [vmem:[#allocation7 + $0x90] sm:$0xf0]  ;;  %v3850_v14 = vor.u32 %v3309_v11, %v2684_v9  ;;  %v3308_v16 = vld [vmem:[#allocation7 + $0x8c] sm:$0xf] }
  0x33   :  { %488 = vmatpush.bf16.msra.mxu2 %v2501_v34  ;;  %512 = vmatpush.bf16.msra.mxu3 %v2505_v36  ;;  %v3852_v15 = vor.u32 %v3307_v12, %v2686_v13  ;;  %v2694_v17 = vld [vmem:[#allocation7 + $0x98] sm:$0xf0]  ;;  %v2676_v19 = vld [vmem:[#allocation7 + $0x68] sm:$0xf]  ;;  %v3306_v20 = vld [vmem:[#allocation7 + $0x74] sm:$0xf0] }
  0x34   :  { %441 = vmatmul.bf16.vlgmr.msra.gmra.mxu0 %v3387_v35  ;;  %v3855_v18 = vor.u32 %v3308_v16, %v2694_v17  ;;  %v2668_v21 = vld [vmem:[#allocation7 + $0x60] sm:$0xf]  ;;  %v3859_v22 = vor.u32 %v3306_v20, %v2676_v19  ;;  %v3305_v23 = vld [vmem:[#allocation7 + $0x6c] sm:$0xf0]  ;;  %v3303_v24 = vld [vmem:[#allocation7 + $0x64] sm:$0xf] }
  0x35   :  { %465 = vmatmul.bf16.vlgmr.msra.gmra.mxu1 %v3387_v35  ;;  %705 = vmatpush.bf16.msrb.mxu0 %v3810_v47  ;;  %v2670_v25 = vld [vmem:[#allocation7 + $0x70] sm:$0xf0]  ;;  %v3862_v26 = vor.u32 %v3305_v23, %v2668_v21  ;;  %v3304_v28 = vld [vmem:[#allocation7 + $0x6c] sm:$0xf]  ;;  %v2678_v29 = vld [vmem:[#allocation7 + $0x78] sm:$0xf0] }
  0x36   :  { %718 = vmatpush.bf16.msrb.mxu1 %v3808_v41  ;;  %489 = vmatmul.bf16.vlgmr.msra.gmra.mxu2 %v3387_v35  ;;  %v3864_v27 = vor.u32 %v3303_v24, %v2670_v25  ;;  %v3867_v30 = vor.u32 %v3304_v28, %v2678_v29  ;;  %v2660_v31 = vld [vmem:[#allocation7 + $0x48] sm:$0xf]  ;;  %v3302_v32 = vld [vmem:[#allocation7 + $0x54] sm:$0xf0]  ;;  %v2652_v33 = vld [vmem:[#allocation7 + $0x40] sm:$0xf] }
  0x37   :  { %731 = vmatpush.bf16.msrb.mxu2 %v3806_v37  ;;  %513 = vmatmul.bf16.vlgmr.msra.gmra.mxu3 %v3387_v35  ;;  %v3871_v34 = vor.u32 %v3302_v32, %v2660_v31  ;;  %v3301_v35 = vld [vmem:[#allocation7 + $0x4c] sm:$0xf0]  ;;  %v3299_v36 = vld [vmem:[#allocation7 + $0x44] sm:$0xf]  ;;  %v2654_v38 = vld [vmem:[#allocation7 + $0x50] sm:$0xf0] }
  0x38   :  { %744 = vmatpush.bf16.msrb.mxu3 %v3815_v49  ;;  %v3874_v39 = vor.u32 %v3301_v35, %v2652_v33  ;;  %v3876_v40 = vor.u32 %v3299_v36, %v2654_v38  ;;  %v3300_v42 = vld [vmem:[#allocation7 + $0x4c] sm:$0xf]  ;;  %v2662_v43 = vld [vmem:[#allocation7 + $0x58] sm:$0xf0]  ;;  %v2644_v45 = vld [vmem:[#allocation7 + $0x28] sm:$0xf] }
  0x39   :  { %706 = vmatpush.bf16.msrb.mxu0 %v3821_v59  ;;  %v3879_v44 = vor.u32 %v3300_v42, %v2662_v43  ;;  %v3298_v46 = vld [vmem:[#allocation7 + $0x34] sm:$0xf0]  ;;  %v2636_v50 = vld [vmem:[#allocation7 + $0x20] sm:$0xf]  ;;  %v3297_v52 = vld [vmem:[#allocation7 + $0x2c] sm:$0xf0] }
  0x3a   :  { %719 = vmatpush.bf16.msrb.mxu1 %v3818_v53  ;;  %v3883_v51 = vor.u32 %v3298_v46, %v2644_v45  ;;  %v3295_v54 = vld [vmem:[#allocation7 + $0x24] sm:$0xf]  ;;  %v2638_v55 = vld [vmem:[#allocation7 + $0x30] sm:$0xf0]  ;;  %v3886_v56 = vor.u32 %v3297_v52, %v2636_v50  ;;  %v3296_v58 = vld [vmem:[#allocation7 + $0x2c] sm:$0xf] }
  0x3b   :  { %732 = vmatpush.bf16.msrb.mxu2 %v3813_v48  ;;  %v3888_v57 = vor.u32 %v3295_v54, %v2638_v55  ;;  %v2646_v62 = vld [vmem:[#allocation7 + $0x38] sm:$0xf0]  ;;  %v173_v63 = vld [vmem:[%s4536_s3] sm:$0xf]  ;;  %v2628_v3 = vld [vmem:[#allocation7 + $0x8] sm:$0xf] }
  0x3c   :  { %745 = vmatpush.bf16.msrb.mxu3 %v3827_v61  ;;  %v3294_v4 = vld [vmem:[#allocation7 + $0x14] sm:$0xf0]  ;;  %v3293_v8 = vld [vmem:[#allocation7 + $0xc] sm:$0xf0]  ;;  %v3291_v9 = vld [vmem:[#allocation7 + $0x4] sm:$0xf] }
  0x3d   :  { %707 = vmatpush.bf16.msrb.mxu0 %v3833_v1  ;;  %v3899_v7 = vor.u32 %v3294_v4, %v2628_v3  ;;  %v2622_v11 = vld [vmem:[#allocation7 + $0x10] sm:$0xf0]  ;;  %v3901_v12 = vperm.slane %v173_v63, 0  ;;  %v3292_v17 = vld [vmem:[#allocation7 + $0xc] sm:$0xf]  ;;  %v3907_v20 = vperm.slane %v173_v63, 1 }
  0x3e   :  { %720 = vmatpush.bf16.msrb.mxu1 %v3830_v0  ;;  %v3905_v16 = vor.u32 %v3291_v9, %v2622_v11  ;;  %v2630_v19 = vld [vmem:[#allocation7 + $0x18] sm:$0xf0]  ;;  %v3921_v29 = vperm.slane %v173_v63, 2  ;;  %v3924_v31 = vperm.slane %v173_v63, 3  ;;  %108 = dma.hbm_to_vmem [thread:$0]  %s104_s21, 8192, %s106_s23, [#allocation3] }
  0x3f   :  { %733 = vmatpush.bf16.msrb.mxu2 %v3825_v60  ;;  %v3910_v21 = vor.u32 %v3292_v17, %v2630_v19 }
  0x40   :  { %746 = vmatpush.bf16.msrb.mxu3 %v3845_v6 }
  0x41   :  { %708 = vmatpush.bf16.msrb.mxu0 %v3850_v14 }
  0x42   :  { %721 = vmatpush.bf16.msrb.mxu1 %v3852_v15 }
  0x43   :  { %734 = vmatpush.bf16.msrb.mxu2 %v3848_v10 }
  0x44   :  { %446 = vmatmul.bf16.gmra.mxu0 %v3388_v2  ;;  %747 = vmatpush.bf16.msrb.mxu3 %v3855_v18 }
  0x45   :  { %470 = vmatmul.bf16.gmra.mxu1 %v3388_v2  ;;  %709 = vmatpush.bf16.msrb.mxu0 %v3862_v26 }
  0x46   :  { %494 = vmatmul.bf16.gmra.mxu2 %v3388_v2  ;;  %722 = vmatpush.bf16.msrb.mxu1 %v3864_v27 }
  0x47   :  { %518 = vmatmul.bf16.gmra.mxu3 %v3388_v2  ;;  %735 = vmatpush.bf16.msrb.mxu2 %v3859_v22  ;;  %v3894_v2 = vor.u32 %v3296_v58, %v2646_v62 }
  0x48   :  { %748 = vmatpush.bf16.msrb.mxu3 %v3867_v30 }
  0x49   :  { %710 = vmatpush.bf16.msrb.mxu0 %v3874_v39 }
  0x4a   :  { %723 = vmatpush.bf16.msrb.mxu1 %v3876_v40 }
  0x4b   :  { %736 = vmatpush.bf16.msrb.mxu2 %v3871_v34 }
  0x4c   :  { %749 = vmatpush.bf16.msrb.mxu3 %v3879_v44 }
  0x4d   :  { %711 = vmatpush.bf16.msrb.mxu0 %v3886_v56 }
  0x4e   :  { %724 = vmatpush.bf16.msrb.mxu1 %v3888_v57 }
  0x4f   :  { %737 = vmatpush.bf16.msrb.mxu2 %v3883_v51 }
  0x50   :  { %750 = vmatpush.bf16.msrb.mxu3 %v3894_v2 }
  0x52   :  { %725 = vmatpush.bf16.msrb.mxu1 %v3905_v16 }
  0x53   :  { %738 = vmatpush.bf16.msrb.mxu2 %v3899_v7 }
  0x54   :  { %451 = vmatmul.bf16.gmra.mxu0 %v3389_v5  ;;  %751 = vmatpush.bf16.msrb.mxu3 %v3910_v21 }
  0x55   :  { %475 = vmatmul.bf16.gmra.mxu1 %v3389_v5 }
  0x56   :  { %499 = vmatmul.bf16.gmra.mxu2 %v3389_v5  ;;  %790 = vmatpush.bf16.msra.mxu1 %v3808_v41 }
  0x57   :  { %523 = vmatmul.bf16.gmra.mxu3 %v3389_v5  ;;  %v2620_v5 = vld [vmem:[#allocation7] sm:$0xf]  ;;  %803 = vmatpush.bf16.msra.mxu2 %v3806_v37 }
  0x58   :  { %v3903_v13 = vor.u32 %v3293_v8, %v2620_v5  ;;  %816 = vmatpush.bf16.msra.mxu3 %v3815_v49 }
  0x5a   :  { %712 = vmatpush.bf16.msrb.mxu0 %v3903_v13  ;;  %791 = vmatpush.bf16.msra.mxu1 %v3818_v53 }
  0x5b   :  { %804 = vmatpush.bf16.msra.mxu2 %v3813_v48 }
  0x5c   :  { %817 = vmatpush.bf16.msra.mxu3 %v3827_v61 }
  0x5e   :  { %777 = vmatpush.bf16.msra.mxu0 %v3810_v47  ;;  %792 = vmatpush.bf16.msra.mxu1 %v3830_v0 }
  0x5f   :  { %805 = vmatpush.bf16.msra.mxu2 %v3825_v60 }
  0x60   :  { %818 = vmatpush.bf16.msra.mxu3 %v3845_v6 }
  0x62   :  { %778 = vmatpush.bf16.msra.mxu0 %v3821_v59  ;;  %793 = vmatpush.bf16.msra.mxu1 %v3852_v15 }
  0x63   :  { %806 = vmatpush.bf16.msra.mxu2 %v3848_v10 }
  0x64   :  { %819 = vmatpush.bf16.msra.mxu3 %v3855_v18 }
  0x66   :  { %779 = vmatpush.bf16.msra.mxu0 %v3833_v1  ;;  %794 = vmatpush.bf16.msra.mxu1 %v3864_v27 }
  0x67   :  { %807 = vmatpush.bf16.msra.mxu2 %v3859_v22 }
  0x68   :  { %820 = vmatpush.bf16.msra.mxu3 %v3867_v30 }
  0x6a   :  { %780 = vmatpush.bf16.msra.mxu0 %v3850_v14  ;;  %795 = vmatpush.bf16.msra.mxu1 %v3876_v40 }
  0x6b   :  { %808 = vmatpush.bf16.msra.mxu2 %v3871_v34 }
  0x6c   :  { %821 = vmatpush.bf16.msra.mxu3 %v3879_v44 }
  0x6e   :  { %781 = vmatpush.bf16.msra.mxu0 %v3862_v26  ;;  %796 = vmatpush.bf16.msra.mxu1 %v3888_v57 }
  0x6f   :  { %809 = vmatpush.bf16.msra.mxu2 %v3883_v51 }
  0x70   :  { %822 = vmatpush.bf16.msra.mxu3 %v3894_v2 }
  0x72   :  { %782 = vmatpush.bf16.msra.mxu0 %v3874_v39  ;;  %797 = vmatpush.bf16.msra.mxu1 %v3905_v16 }
  0x73   :  { %810 = vmatpush.bf16.msra.mxu2 %v3899_v7 }
  0x74   :  { %823 = vmatpush.bf16.msra.mxu3 %v3910_v21 }
  0x76   :  { %783 = vmatpush.bf16.msra.mxu0 %v3886_v56 }
  0x7a   :  { %784 = vmatpush.bf16.msra.mxu0 %v3903_v13 }
  0xb1   :  { %v442_v23 = vpop.f32.mrf.mxu0 }
  0xb2   :  { %v443_v24 = vadd.f32 %v442_v23, %v3901_v12  ;;  %v466_v25 = vpop.f32.mrf.mxu1 }
  0xb3   :  { %v467_v28 = vadd.f32 %v466_v25, %v3907_v20 }
  0xb4   :  { %3461 = vtanh.f32 %v443_v24 }
  0xb5   :  { %3463 = vtanh.f32 %v467_v28 }
  0xb9   :  { %v490_v32 = vpop.f32.mrf.mxu2  ;;  %v444_v9 = vpop.f32.mrf.mxu0 }
  0xba   :  { %v491_v33 = vadd.f32 %v490_v32, %v3921_v29  ;;  %v514_v35 = vpop.f32.mrf.mxu3  ;;  %v3462_v36 = vpop.eup %3461 }
  0xbb   :  { %v515_v38 = vadd.f32 %v514_v35, %v3924_v31  ;;  %v3464_v42 = vpop.eup %3463  ;;  %v530_v43 = vmul.f32 0.5, %v3462_v36  ;;  %v468_v11 = vpop.f32.mrf.mxu1 }
  0xbc   :  { %3465 = vtanh.f32 %v491_v33  ;;  %v533_v45 = vmul.f32 0.5, %v3464_v42 }
  0xbd   :  { %3467 = vtanh.f32 %v515_v38  ;;  %v531_v46 = vadd.f32 0.5, %v530_v43 }
  0xbe   :  { %v534_v50 = vadd.f32 0.5, %v533_v45 }
  0xc0   :  { %v539_v52 = vmul.f32 0.0, %v534_v50 }
  0xc1   :  { %v492_v19 = vpop.f32.mrf.mxu2  ;;  %v3990_v23 = vpop.f32.mrf.mxu0 }
  0xc2   :  { %v3466_v54 = vpop.eup %3465  ;;  %v516_v17 = vpop.f32.mrf.mxu3 }
  0xc3   :  { %v3468_v55 = vpop.eup %3467  ;;  %v540_v58 = vmul.f32 %v3466_v54, %v531_v46  ;;  %v3992_v24 = vpop.f32.mrf.mxu1  ;;  %v445_v54 = vadd.f32 %v444_v9, %v3901_v12 }
  0xc4   :  { %v537_v63 = vmul.f32 0.5, %v3468_v55  ;;  %v469_v55 = vadd.f32 %v468_v11, %v3907_v20 }
  0xc5   :  { %v3943_v62 = vadd.f32 %v540_v58, %v539_v52 }
  0xc6   :  { %v538_v3 = vadd.f32 0.5, %v537_v63 }
  0xc7   :  { %3469 = vtanh.f32 %v3943_v62 }
  0xc9   :  { %v3996_v28 = vpop.f32.mrf.mxu2  ;;  %v3998_v32 = vpop.f32.mrf.mxu0 }
  0xca   :  { %v3994_v25 = vpop.f32.mrf.mxu3 }
  0xcb   :  { %v4000_v33 = vpop.f32.mrf.mxu1 }
  0xcd   :  { %v3470_v4 = vpop.eup %3469 }
  0xce   :  { %v543_v5 = vmul.f32 %v3470_v4, %v538_v3 }
  0xd0   :  { %v544_v8 = vpack.c.bf16 %v543_v5, %v543_v5 }
  0xd1   :  { %v4004_v36 = vpop.f32.mrf.mxu2  ;;  %v4006_v38 = vpop.f32.mrf.mxu0 }
  0xd2   :  { %713 = vmatmul.bf16.vlgmr.msrb.gmra.mxu0 %v544_v8  ;;  %726 = vmatmul.bf16.vlgmr.msrb.gmra.mxu1 %v544_v8  ;;  %v4002_v35 = vpop.f32.mrf.mxu3  ;;  %4545 = vst [vmem:[#allocation21_spill] sm:$0xff] %v4004_v36 }
  0xd3   :  { %739 = vmatmul.bf16.vlgmr.msrb.gmra.mxu2 %v544_v8  ;;  %752 = vmatmul.bf16.vlgmr.msrb.gmra.mxu3 %v544_v8  ;;  %4544 = vst [vmem:[#allocation20_spill] sm:$0xff] %v4002_v35  ;;  %v4008_v42 = vpop.f32.mrf.mxu1  ;;  %v493_v8 = vadd.f32 %v492_v19, %v3921_v29 }
  0xd4   :  { %849 = vmatpush.bf16.msrb.mxu0 %v3810_v47  ;;  %862 = vmatpush.bf16.msrb.mxu1 %v3808_v41  ;;  %4546 = vst [vmem:[#allocation22_spill] sm:$0xff] %v4006_v38 }
  0xd5   :  { %875 = vmatpush.bf16.msrb.mxu2 %v3806_v37  ;;  %888 = vmatpush.bf16.msrb.mxu3 %v3815_v49  ;;  %4547 = vst [vmem:[#allocation23_spill] sm:$0xff] %v4008_v42 }
  0xd8   :  { %850 = vmatpush.bf16.msrb.mxu0 %v3821_v59  ;;  %863 = vmatpush.bf16.msrb.mxu1 %v3818_v53 }
  0xd9   :  { %876 = vmatpush.bf16.msrb.mxu2 %v3813_v48  ;;  %889 = vmatpush.bf16.msrb.mxu3 %v3827_v61  ;;  %v4012_v45 = vpop.f32.mrf.mxu2  ;;  %v4014_v46 = vpop.f32.mrf.mxu0 }
  0xda   :  { %v4010_v43 = vpop.f32.mrf.mxu3  ;;  %4549 = vst [vmem:[#allocation25_spill] sm:$0xff] %v4012_v45 }
  0xdb   :  { %4548 = vst [vmem:[#allocation24_spill] sm:$0xff] %v4010_v43  ;;  %v4016_v50 = vpop.f32.mrf.mxu1 }
  0xdc   :  { %851 = vmatpush.bf16.msrb.mxu0 %v3833_v1  ;;  %864 = vmatpush.bf16.msrb.mxu1 %v3830_v0  ;;  %4550 = vst [vmem:[#allocation26_spill] sm:$0xff] %v4014_v46  ;;  %v517_v46 = vadd.f32 %v516_v17, %v3924_v31 }
  0xdd   :  { %877 = vmatpush.bf16.msrb.mxu2 %v3825_v60  ;;  %890 = vmatpush.bf16.msrb.mxu3 %v3845_v6  ;;  %4551 = vst [vmem:[#allocation27_spill] sm:$0xff] %v4016_v50 }
  0xe0   :  { %852 = vmatpush.bf16.msrb.mxu0 %v3850_v14  ;;  %865 = vmatpush.bf16.msrb.mxu1 %v3852_v15 }
  0xe1   :  { %878 = vmatpush.bf16.msrb.mxu2 %v3848_v10  ;;  %891 = vmatpush.bf16.msrb.mxu3 %v3855_v18  ;;  %v4022_v58 = vpop.f32.mrf.mxu2 }
  0xe2   :  { %v4018_v52 = vpop.f32.mrf.mxu3  ;;  %4553 = vst [vmem:[#allocation29_spill] sm:$0xff] %v4022_v58 }
  0xe3   :  { %4552 = vst [vmem:[#allocation28_spill] sm:$0xff] %v4018_v52 }
  0xe4   :  { %853 = vmatpush.bf16.msrb.mxu0 %v3862_v26  ;;  %866 = vmatpush.bf16.msrb.mxu1 %v3864_v27 }
  0xe5   :  { %879 = vmatpush.bf16.msrb.mxu2 %v3859_v22  ;;  %892 = vmatpush.bf16.msrb.mxu3 %v3867_v30 }
  0xe8   :  { %854 = vmatpush.bf16.msrb.mxu0 %v3874_v39  ;;  %867 = vmatpush.bf16.msrb.mxu1 %v3876_v40 }
  0xe9   :  { %880 = vmatpush.bf16.msrb.mxu2 %v3871_v34  ;;  %893 = vmatpush.bf16.msrb.mxu3 %v3879_v44 }
  0xec   :  { %855 = vmatpush.bf16.msrb.mxu0 %v3886_v56  ;;  %868 = vmatpush.bf16.msrb.mxu1 %v3888_v57 }
  0xed   :  { %881 = vmatpush.bf16.msrb.mxu2 %v3883_v51  ;;  %894 = vmatpush.bf16.msrb.mxu3 %v3894_v2 }
  0xf0   :  { %856 = vmatpush.bf16.msrb.mxu0 %v3903_v13  ;;  %869 = vmatpush.bf16.msrb.mxu1 %v3905_v16 }
  0xf1   :  { %882 = vmatpush.bf16.msrb.mxu2 %v3899_v7  ;;  %895 = vmatpush.bf16.msrb.mxu3 %v3910_v21 }
 0x14f   :  { %v714_v63 = vpop.f32.mrf.mxu0  ;;  %v727_v3 = vpop.f32.mrf.mxu1 }
 0x150   :  { %v757_v4 = vadd.f32 %v714_v63, %v445_v54  ;;  %v758_v5 = vadd.f32 %v727_v3, %v469_v55 }
 0x152   :  { %3471 = vtanh.f32 %v757_v4 }
 0x153   :  { %3473 = vtanh.f32 %v758_v5 }
 0x156   :  { %v740_v43 = vpop.f32.mrf.mxu2  ;;  %v753_v50 = vpop.f32.mrf.mxu3 }
 0x157   :  { %v759_v45 = vadd.f32 %v740_v43, %v493_v8  ;;  %v716_v52 = vpop.f32.mrf.mxu0  ;;  %v729_v42 = vpop.f32.mrf.mxu1  ;;  %v760_v38 = vadd.f32 %v753_v50, %v517_v46  ;;  %v496_v8 = vadd.f32 %v3996_v28, %v3921_v29 }
 0x158   :  { %v3472_v9 = vpop.eup %3471 }
 0x159   :  { %v3474_v11 = vpop.eup %3473  ;;  %3475 = vtanh.f32 %v759_v45  ;;  %v762_v58 = vmul.f32 0.5, %v3472_v9  ;;  %v520_v9 = vadd.f32 %v3994_v25, %v3924_v31 }
 0x15a   :  { %v765_v35 = vmul.f32 0.5, %v3474_v11  ;;  %3477 = vtanh.f32 %v760_v38 }
 0x15b   :  { %v763_v54 = vadd.f32 0.5, %v762_v58 }
 0x15c   :  { %v766_v36 = vadd.f32 0.5, %v765_v35  ;;  %v472_v35 = vadd.f32 %v3992_v24, %v3907_v20 }
 0x15e   :  { %v742_v55 = vpop.f32.mrf.mxu2  ;;  %v755_v63 = vpop.f32.mrf.mxu3  ;;  %v771_v19 = vmul.f32 %v766_v36, %v3943_v62  ;;  %v448_v62 = vadd.f32 %v3990_v23, %v3901_v12 }
 0x15f   :  { %v3476_v3 = vpop.eup %3475 }
 0x160   :  { %v772_v17 = vmul.f32 %v3476_v3, %v763_v54  ;;  %v3478_v4 = vpop.eup %3477 }
 0x161   :  { %v769_v42 = vmul.f32 0.5, %v3478_v4 }
 0x162   :  { %v4027_v5 = vadd.f32 %v772_v17, %v771_v19 }
 0x163   :  { %v770_v43 = vadd.f32 0.5, %v769_v42 }
 0x164   :  { %3479 = vtanh.f32 %v4027_v5 }
 0x16a   :  { %v3480_v46 = vpop.eup %3479 }
 0x16b   :  { %v775_v45 = vmul.f32 %v3480_v46, %v770_v43 }
 0x16d   :  { %v776_v50 = vpack.c.bf16 %v775_v45, %v775_v45 }
 0x16f   :  { %785 = vmatmul.bf16.vlgmr.msra.gmra.mxu0 %v776_v50  ;;  %798 = vmatmul.bf16.vlgmr.msra.gmra.mxu1 %v776_v50 }
 0x170   :  { %811 = vmatmul.bf16.vlgmr.msra.gmra.mxu2 %v776_v50  ;;  %824 = vmatmul.bf16.vlgmr.msra.gmra.mxu3 %v776_v50 }
 0x171   :  { %921 = vmatpush.bf16.msra.mxu0 %v3810_v47  ;;  %934 = vmatpush.bf16.msra.mxu1 %v3808_v41 }
 0x172   :  { %947 = vmatpush.bf16.msra.mxu2 %v3806_v37  ;;  %960 = vmatpush.bf16.msra.mxu3 %v3815_v49 }
 0x175   :  { %922 = vmatpush.bf16.msra.mxu0 %v3821_v59  ;;  %935 = vmatpush.bf16.msra.mxu1 %v3818_v53 }
 0x176   :  { %948 = vmatpush.bf16.msra.mxu2 %v3813_v48  ;;  %961 = vmatpush.bf16.msra.mxu3 %v3827_v61 }
 0x179   :  { %923 = vmatpush.bf16.msra.mxu0 %v3833_v1  ;;  %936 = vmatpush.bf16.msra.mxu1 %v3830_v0 }
 0x17a   :  { %949 = vmatpush.bf16.msra.mxu2 %v3825_v60  ;;  %962 = vmatpush.bf16.msra.mxu3 %v3845_v6 }
 0x17d   :  { %924 = vmatpush.bf16.msra.mxu0 %v3850_v14  ;;  %937 = vmatpush.bf16.msra.mxu1 %v3852_v15 }
 0x17e   :  { %950 = vmatpush.bf16.msra.mxu2 %v3848_v10  ;;  %963 = vmatpush.bf16.msra.mxu3 %v3855_v18 }
 0x181   :  { %925 = vmatpush.bf16.msra.mxu0 %v3862_v26  ;;  %938 = vmatpush.bf16.msra.mxu1 %v3864_v27 }
 0x182   :  { %951 = vmatpush.bf16.msra.mxu2 %v3859_v22  ;;  %964 = vmatpush.bf16.msra.mxu3 %v3867_v30 }
 0x185   :  { %926 = vmatpush.bf16.msra.mxu0 %v3874_v39  ;;  %939 = vmatpush.bf16.msra.mxu1 %v3876_v40 }
 0x186   :  { %952 = vmatpush.bf16.msra.mxu2 %v3871_v34  ;;  %965 = vmatpush.bf16.msra.mxu3 %v3879_v44 }
 0x189   :  { %927 = vmatpush.bf16.msra.mxu0 %v3886_v56  ;;  %940 = vmatpush.bf16.msra.mxu1 %v3888_v57 }
 0x18a   :  { %953 = vmatpush.bf16.msra.mxu2 %v3883_v51  ;;  %966 = vmatpush.bf16.msra.mxu3 %v3894_v2 }
 0x18d   :  { %928 = vmatpush.bf16.msra.mxu0 %v3903_v13  ;;  %941 = vmatpush.bf16.msra.mxu1 %v3905_v16 }
 0x18e   :  { %954 = vmatpush.bf16.msra.mxu2 %v3899_v7  ;;  %967 = vmatpush.bf16.msra.mxu3 %v3910_v21 }
 0x1ec   :  { %v786_v36 = vpop.f32.mrf.mxu0  ;;  %v799_v38 = vpop.f32.mrf.mxu1 }
 0x1ed   :  { %v829_v52 = vadd.f32 %v786_v36, %v448_v62  ;;  %v830_v58 = vadd.f32 %v799_v38, %v472_v35 }
 0x1ef   :  { %3481 = vtanh.f32 %v829_v52 }
 0x1f0   :  { %3483 = vtanh.f32 %v830_v58 }
 0x1f3   :  { %v812_v11 = vpop.f32.mrf.mxu2  ;;  %v825_v54 = vpop.f32.mrf.mxu3 }
 0x1f4   :  { %v831_v55 = vadd.f32 %v812_v11, %v496_v8  ;;  %v788_v63 = vpop.f32.mrf.mxu0  ;;  %v801_v23 = vpop.f32.mrf.mxu1  ;;  %v832_v19 = vadd.f32 %v825_v54, %v520_v9  ;;  %v4557_v11 = vld [vmem:[#allocation23_spill] sm:$0xff] }
 0x1f5   :  { %v3482_v3 = vpop.eup %3481  ;;  %v477_v54 = vadd.f32 %v4557_v11, %v3907_v20  ;;  %v3343_v11 = vld [vmem:[#allocation9 + $0xa4] sm:$0xf] }
 0x1f6   :  { %v3484_v24 = vpop.eup %3483  ;;  %3485 = vtanh.f32 %v831_v55  ;;  %v834_v17 = vmul.f32 0.5, %v3482_v3 }
 0x1f7   :  { %v837_v4 = vmul.f32 0.5, %v3484_v24  ;;  %3487 = vtanh.f32 %v832_v19  ;;  %v4558_v19 = vld [vmem:[#allocation25_spill] sm:$0xff] }
 0x1f8   :  { %v835_v43 = vadd.f32 0.5, %v834_v17  ;;  %v501_v24 = vadd.f32 %v4558_v19, %v3921_v29  ;;  %v4559_v17 = vld [vmem:[#allocation24_spill] sm:$0xff] }
 0x1f9   :  { %v838_v42 = vadd.f32 0.5, %v837_v4  ;;  %v525_v4 = vadd.f32 %v4559_v17, %v3924_v31  ;;  %v2838_v17 = vld [vmem:[#allocation9 + $0xb8] sm:$0xf0] }
 0x1fb   :  { %v814_v46 = vpop.f32.mrf.mxu2  ;;  %v827_v45 = vpop.f32.mrf.mxu3  ;;  %v843_v50 = vmul.f32 %v838_v42, %v4027_v5  ;;  %v4556_v5 = vld [vmem:[#allocation22_spill] sm:$0xff] }
 0x1fc   :  { %v3486_v28 = vpop.eup %3485  ;;  %v453_v9 = vadd.f32 %v4556_v5, %v3901_v12  ;;  %v2828_v5 = vld [vmem:[#allocation9 + $0xa0] sm:$0xf] }
 0x1fd   :  { %v844_v25 = vmul.f32 %v3486_v28, %v835_v43  ;;  %v3488_v62 = vpop.eup %3487 }
 0x1fe   :  { %v841_v36 = vmul.f32 0.5, %v3488_v62 }
 0x1ff   :  { %v4071_v35 = vadd.f32 %v844_v25, %v843_v50 }
 0x200   :  { %v842_v38 = vadd.f32 0.5, %v841_v36 }
 0x201   :  { %3489 = vtanh.f32 %v4071_v35 }
 0x207   :  { %v3490_v52 = vpop.eup %3489 }
 0x208   :  { %v847_v58 = vmul.f32 %v3490_v52, %v842_v38 }
 0x20a   :  { %v848_v8 = vpack.c.bf16 %v847_v58, %v847_v58 }
 0x20c   :  { %857 = vmatmul.bf16.vlgmr.msrb.gmra.mxu0 %v848_v8  ;;  %870 = vmatmul.bf16.vlgmr.msrb.gmra.mxu1 %v848_v8 }
 0x20d   :  { %883 = vmatmul.bf16.vlgmr.msrb.gmra.mxu2 %v848_v8  ;;  %896 = vmatmul.bf16.vlgmr.msrb.gmra.mxu3 %v848_v8 }
 0x20e   :  { %993 = vmatpush.bf16.msrb.mxu0 %v3810_v47  ;;  %1006 = vmatpush.bf16.msrb.mxu1 %v3808_v41  ;;  %v474_v41 = vadd.f32 %v4000_v33, %v3907_v20 }
 0x20f   :  { %1019 = vmatpush.bf16.msrb.mxu2 %v3806_v37  ;;  %1032 = vmatpush.bf16.msrb.mxu3 %v3815_v49  ;;  %v450_v37 = vadd.f32 %v3998_v32, %v3901_v12 }
 0x212   :  { %994 = vmatpush.bf16.msrb.mxu0 %v3821_v59  ;;  %1007 = vmatpush.bf16.msrb.mxu1 %v3818_v53  ;;  %v4554_v59 = vld [vmem:[#allocation21_spill] sm:$0xff] }
 0x213   :  { %1020 = vmatpush.bf16.msrb.mxu2 %v3813_v48  ;;  %1033 = vmatpush.bf16.msrb.mxu3 %v3827_v61  ;;  %v4555_v61 = vld [vmem:[#allocation20_spill] sm:$0xff] }
 0x216   :  { %995 = vmatpush.bf16.msrb.mxu0 %v3833_v1  ;;  %1008 = vmatpush.bf16.msrb.mxu1 %v3830_v0  ;;  %v522_v0 = vadd.f32 %v4555_v61, %v3924_v31 }
 0x217   :  { %1021 = vmatpush.bf16.msrb.mxu2 %v3825_v60  ;;  %1034 = vmatpush.bf16.msrb.mxu3 %v3845_v6  ;;  %v498_v60 = vadd.f32 %v4554_v59, %v3921_v29 }
 0x21a   :  { %996 = vmatpush.bf16.msrb.mxu0 %v3850_v14  ;;  %1009 = vmatpush.bf16.msrb.mxu1 %v3852_v15 }
 0x21b   :  { %1022 = vmatpush.bf16.msrb.mxu2 %v3848_v10  ;;  %1035 = vmatpush.bf16.msrb.mxu3 %v3855_v18 }
 0x21e   :  { %997 = vmatpush.bf16.msrb.mxu0 %v3862_v26  ;;  %1010 = vmatpush.bf16.msrb.mxu1 %v3864_v27 }
 0x21f   :  { %1023 = vmatpush.bf16.msrb.mxu2 %v3859_v22  ;;  %1036 = vmatpush.bf16.msrb.mxu3 %v3867_v30 }
 0x222   :  { %998 = vmatpush.bf16.msrb.mxu0 %v3874_v39  ;;  %1011 = vmatpush.bf16.msrb.mxu1 %v3876_v40 }
 0x223   :  { %1024 = vmatpush.bf16.msrb.mxu2 %v3871_v34  ;;  %1037 = vmatpush.bf16.msrb.mxu3 %v3879_v44 }
 0x226   :  { %999 = vmatpush.bf16.msrb.mxu0 %v3886_v56  ;;  %1012 = vmatpush.bf16.msrb.mxu1 %v3888_v57 }
 0x227   :  { %1025 = vmatpush.bf16.msrb.mxu2 %v3883_v51  ;;  %1038 = vmatpush.bf16.msrb.mxu3 %v3894_v2 }
 0x22a   :  { %1000 = vmatpush.bf16.msrb.mxu0 %v3903_v13  ;;  %1013 = vmatpush.bf16.msrb.mxu1 %v3905_v16 }
 0x22b   :  { %1026 = vmatpush.bf16.msrb.mxu2 %v3899_v7  ;;  %1039 = vmatpush.bf16.msrb.mxu3 %v3910_v21 }
 0x289   :  { %v858_v47 = vpop.f32.mrf.mxu0  ;;  %v871_v48 = vpop.f32.mrf.mxu1 }
 0x28a   :  { %v901_v49 = vadd.f32 %v858_v47, %v450_v37  ;;  %v902_v53 = vadd.f32 %v871_v48, %v474_v41 }
 0x28c   :  { %3491 = vtanh.f32 %v901_v49 }
 0x28d   :  { %3493 = vtanh.f32 %v902_v53 }
 0x290   :  { %v884_v1 = vpop.f32.mrf.mxu2  ;;  %v897_v6 = vpop.f32.mrf.mxu3 }
 0x291   :  { %v903_v10 = vadd.f32 %v884_v1, %v498_v60  ;;  %v860_v14 = vpop.f32.mrf.mxu0  ;;  %v873_v15 = vpop.f32.mrf.mxu1  ;;  %v904_v22 = vadd.f32 %v897_v6, %v522_v0  ;;  %v2860_v1 = vld [vmem:[#allocation9 + $0xe0] sm:$0xf]  ;;  %v3353_v6 = vld [vmem:[#allocation9 + $0xec] sm:$0xf0] }
 0x292   :  { %v3492_v18 = vpop.eup %3491  ;;  %v2861_v14 = vor.u32 %v3353_v6, %v2860_v1  ;;  %v2862_v15 = vld [vmem:[#allocation9 + $0xf0] sm:$0xf0]  ;;  %v2780_v6 = vld [vmem:[#allocation9 + $0x40] sm:$0xf] }
 0x293   :  { %v3494_v26 = vpop.eup %3493  ;;  %3495 = vtanh.f32 %v903_v10  ;;  %v906_v27 = vmul.f32 0.5, %v3492_v18  ;;  %v3351_v10 = vld [vmem:[#allocation9 + $0xe4] sm:$0xf]  ;;  %v2868_v18 = vld [vmem:[#allocation9 + $0xe8] sm:$0xf] }
 0x294   :  { %v909_v30 = vmul.f32 0.5, %v3494_v26  ;;  %3497 = vtanh.f32 %v904_v22  ;;  %v3354_v22 = vld [vmem:[#allocation9 + $0xf4] sm:$0xf0]  ;;  %v2865_v26 = vor.u32 %v3351_v10, %v2862_v15  ;;  %v3333_v10 = vld [vmem:[#allocation9 + $0x4c] sm:$0xf0] }
 0x295   :  { %v907_v39 = vadd.f32 0.5, %v906_v27  ;;  %v2869_v27 = vor.u32 %v3354_v22, %v2868_v18  ;;  %v2781_v15 = vor.u32 %v3333_v10, %v2780_v6  ;;  %v2782_v18 = vld [vmem:[#allocation9 + $0x50] sm:$0xf0]  ;;  %v2788_v22 = vld [vmem:[#allocation9 + $0x48] sm:$0xf] }
 0x296   :  { %v910_v34 = vadd.f32 0.5, %v909_v30  ;;  %v3352_v30 = vld [vmem:[#allocation9 + $0xec] sm:$0xf] }
 0x298   :  { %v886_v40 = vpop.f32.mrf.mxu2  ;;  %v899_v44 = vpop.f32.mrf.mxu3  ;;  %v915_v56 = vmul.f32 %v910_v34, %v4071_v35  ;;  %v2870_v34 = vld [vmem:[#allocation9 + $0xf8] sm:$0xf0] }
 0x299   :  { %v3496_v51 = vpop.eup %3495  ;;  %v2844_v40 = vld [vmem:[#allocation9 + $0xc0] sm:$0xf]  ;;  %v3349_v44 = vld [vmem:[#allocation9 + $0xcc] sm:$0xf0] }
 0x29a   :  { %v916_v57 = vmul.f32 %v3496_v51, %v907_v39  ;;  %v3498_v2 = vpop.eup %3497  ;;  %v2873_v39 = vor.u32 %v3352_v30, %v2870_v34  ;;  %v3347_v51 = vld [vmem:[#allocation9 + $0xc4] sm:$0xf]  ;;  %v3332_v34 = vld [vmem:[#allocation9 + $0x4c] sm:$0xf] }
 0x29b   :  { %v913_v13 = vmul.f32 0.5, %v3498_v2  ;;  %v2852_v2 = vld [vmem:[#allocation9 + $0xc8] sm:$0xf] }
 0x29c   :  { %v917_v7 = vadd.f32 %v916_v57, %v915_v56  ;;  %v2845_v56 = vor.u32 %v3349_v44, %v2844_v40  ;;  %v2846_v57 = vld [vmem:[#allocation9 + $0xd0] sm:$0xf0]  ;;  %v2764_v44 = vld [vmem:[#allocation9 + $0x20] sm:$0xf] }
 0x29d   :  { %v914_v16 = vadd.f32 0.5, %v913_v13  ;;  %v2849_v13 = vor.u32 %v3347_v51, %v2846_v57  ;;  %v3329_v51 = vld [vmem:[#allocation9 + $0x2c] sm:$0xf0] }
 0x29e   :  { %3499 = vtanh.f32 %v917_v7  ;;  %v2765_v57 = vor.u32 %v3329_v51, %v2764_v44  ;;  %v2996_v51 = vld [vmem:[#allocation10 + $0xe8] sm:$0xf] }
 0x2a4   :  { %v3500_v21 = vpop.eup %3499 }
 0x2a5   :  { %v919_v32 = vmul.f32 %v3500_v21, %v914_v16  ;;  %v3348_v21 = vld [vmem:[#allocation9 + $0xcc] sm:$0xf] }
 0x2a7   :  { %v920_v33 = vpack.c.bf16 %v919_v32, %v919_v32  ;;  %v2854_v32 = vld [vmem:[#allocation9 + $0xd8] sm:$0xf0] }
 0x2a9   :  { %929 = vmatmul.bf16.vlgmr.msra.gmra.mxu0 %v920_v33  ;;  %942 = vmatmul.bf16.vlgmr.msra.gmra.mxu1 %v920_v33 }
 0x2aa   :  { %955 = vmatmul.bf16.vlgmr.msra.gmra.mxu2 %v920_v33  ;;  %968 = vmatmul.bf16.vlgmr.msra.gmra.mxu3 %v920_v33  ;;  %v2857_v33 = vor.u32 %v3348_v21, %v2854_v32  ;;  %v3328_v32 = vld [vmem:[#allocation9 + $0x2c] sm:$0xf] }
 0x2ab   :  { %1234 = vmatpush.bf16.msra.mxu0 %v2861_v14  ;;  %1247 = vmatpush.bf16.msra.mxu1 %v2865_v26  ;;  %v3331_v14 = vld [vmem:[#allocation9 + $0x44] sm:$0xf]  ;;  %v3334_v26 = vld [vmem:[#allocation9 + $0x54] sm:$0xf0] }
 0x2ac   :  { %1260 = vmatpush.bf16.msra.mxu2 %v2869_v27  ;;  %1273 = vmatpush.bf16.msra.mxu3 %v2873_v39  ;;  %v2785_v27 = vor.u32 %v3331_v14, %v2782_v18  ;;  %v2789_v30 = vor.u32 %v3334_v26, %v2788_v22  ;;  %v2790_v39 = vld [vmem:[#allocation9 + $0x58] sm:$0xf0] }
 0x2ad   :  { %v2793_v40 = vor.u32 %v3332_v34, %v2790_v39  ;;  %v2988_v34 = vld [vmem:[#allocation10 + $0xe0] sm:$0xf]  ;;  %v3385_v39 = vld [vmem:[#allocation10 + $0xec] sm:$0xf0] }
 0x2ae   :  { %v4138_v44 = vor.u32 %v3385_v39, %v2988_v34  ;;  %v2910_v39 = vld [vmem:[#allocation10 + $0x50] sm:$0xf0] }
 0x2af   :  { %1235 = vmatpush.bf16.msra.mxu0 %v2845_v56  ;;  %1248 = vmatpush.bf16.msra.mxu1 %v2849_v13  ;;  %v3327_v56 = vld [vmem:[#allocation9 + $0x24] sm:$0xf]  ;;  %v3330_v13 = vld [vmem:[#allocation9 + $0x34] sm:$0xf0] }
 0x2b0   :  { %1274 = vmatpush.bf16.msra.mxu3 %v2857_v33  ;;  %v2774_v33 = vld [vmem:[#allocation9 + $0x38] sm:$0xf0] }
 0x326   :  { %v930_v55 = vpop.f32.mrf.mxu0  ;;  %v943_v63 = vpop.f32.mrf.mxu1 }
 0x327   :  { %v973_v23 = vadd.f32 %v930_v55, %v453_v9  ;;  %v974_v3 = vadd.f32 %v943_v63, %v477_v54  ;;  %v3345_v9 = vld [vmem:[#allocation9 + $0xac] sm:$0xf0]  ;;  %v2830_v55 = vld [vmem:[#allocation9 + $0xb0] sm:$0xf0]  ;;  %v2836_v63 = vld [vmem:[#allocation9 + $0xa8] sm:$0xf] }
 0x328   :  { %v2829_v54 = vor.u32 %v3345_v9, %v2828_v5  ;;  %v2777_v5 = vor.u32 %v3328_v32, %v2774_v33  ;;  %v2748_v9 = vld [vmem:[#allocation9] sm:$0xf]  ;;  %v3381_v32 = vld [vmem:[#allocation10 + $0xcc] sm:$0xf0]  ;;  %v3379_v33 = vld [vmem:[#allocation10 + $0xc4] sm:$0xf] }
 0x329   :  { %3501 = vtanh.f32 %v973_v23  ;;  %v3346_v23 = vld [vmem:[#allocation9 + $0xb4] sm:$0xf0] }
 0x32a   :  { %3503 = vtanh.f32 %v974_v3  ;;  %v2833_v3 = vor.u32 %v3343_v11, %v2830_v55  ;;  %v2837_v19 = vor.u32 %v3346_v23, %v2836_v63  ;;  %1236 = vmatpush.bf16.msra.mxu0 %v2829_v54  ;;  %v3325_v11 = vld [vmem:[#allocation9 + $0xc] sm:$0xf0]  ;;  %v3323_v54 = vld [vmem:[#allocation9 + $0x4] sm:$0xf]  ;;  %v2750_v63 = vld [vmem:[#allocation9 + $0x10] sm:$0xf0] }
 0x32b   :  { %v2749_v55 = vor.u32 %v3325_v11, %v2748_v9  ;;  %v2756_v23 = vld [vmem:[#allocation9 + $0x8] sm:$0xf]  ;;  %v2974_v9 = vld [vmem:[#allocation10 + $0xd0] sm:$0xf0] }
 0x32c   :  { %1249 = vmatpush.bf16.msra.mxu1 %v2833_v3  ;;  %v3326_v3 = vld [vmem:[#allocation9 + $0x14] sm:$0xf0]  ;;  %v2980_v11 = vld [vmem:[#allocation10 + $0xc8] sm:$0xf] }
 0x32d   :  { %v956_v42 = vpop.f32.mrf.mxu2  ;;  %v969_v43 = vpop.f32.mrf.mxu3 }
 0x32e   :  { %v975_v46 = vadd.f32 %v956_v42, %v501_v24  ;;  %v932_v45 = vpop.f32.mrf.mxu0  ;;  %v945_v28 = vpop.f32.mrf.mxu1  ;;  %v976_v25 = vadd.f32 %v969_v43, %v525_v4  ;;  %v3344_v24 = vld [vmem:[#allocation9 + $0xac] sm:$0xf]  ;;  %v2812_v42 = vld [vmem:[#allocation9 + $0x80] sm:$0xf]  ;;  %v3341_v43 = vld [vmem:[#allocation9 + $0x8c] sm:$0xf0] }
 0x32f   :  { %v3502_v50 = vpop.eup %3501  ;;  %v2841_v4 = vor.u32 %v3344_v24, %v2838_v17  ;;  %v2813_v45 = vor.u32 %v3341_v43, %v2812_v42  ;;  %v2814_v28 = vld [vmem:[#allocation9 + $0x90] sm:$0xf0]  ;;  %v2757_v24 = vor.u32 %v3326_v3, %v2756_v23  ;;  %v3324_v17 = vld [vmem:[#allocation9 + $0xc] sm:$0xf]  ;;  %v2982_v3 = vld [vmem:[#allocation10 + $0xd8] sm:$0xf0] }
 0x330   :  { %v3504_v62 = vpop.eup %3503  ;;  %3505 = vtanh.f32 %v975_v46  ;;  %v978_v35 = vmul.f32 0.5, %v3502_v50  ;;  %v3339_v46 = vld [vmem:[#allocation9 + $0x84] sm:$0xf]  ;;  %v2820_v50 = vld [vmem:[#allocation9 + $0x88] sm:$0xf]  ;;  %v4560_v43 = vld [vmem:[#allocation26_spill] sm:$0xff] }
 0x331   :  { %v981_v36 = vmul.f32 0.5, %v3504_v62  ;;  %3507 = vtanh.f32 %v976_v25  ;;  %1275 = vmatpush.bf16.msra.mxu3 %v2841_v4  ;;  %v3342_v25 = vld [vmem:[#allocation9 + $0x94] sm:$0xf0]  ;;  %v2817_v62 = vor.u32 %v3339_v46, %v2814_v28  ;;  %1237 = vmatpush.bf16.msra.mxu0 %v2813_v45  ;;  %v2758_v4 = vld [vmem:[#allocation9 + $0x18] sm:$0xf0]  ;;  %v455_v46 = vadd.f32 %v4560_v43, %v3901_v12 }
 0x332   :  { %v979_v52 = vadd.f32 0.5, %v978_v35  ;;  %v2821_v35 = vor.u32 %v3342_v25, %v2820_v50  ;;  %v2761_v42 = vor.u32 %v3324_v17, %v2758_v4  ;;  %v4561_v45 = vld [vmem:[#allocation27_spill] sm:$0xff]  ;;  %v3380_v23 = vld [vmem:[#allocation10 + $0xcc] sm:$0xf]  ;;  %v3377_v17 = vld [vmem:[#allocation10 + $0xac] sm:$0xf0] }
 0x333   :  { %v982_v38 = vadd.f32 0.5, %v981_v36  ;;  %v3340_v36 = vld [vmem:[#allocation9 + $0x8c] sm:$0xf]  ;;  %1250 = vmatpush.bf16.msra.mxu1 %v2817_v62  ;;  %v479_v28 = vadd.f32 %v4561_v45, %v3907_v20  ;;  %v3375_v4 = vld [vmem:[#allocation10 + $0xa4] sm:$0xf] }
 0x334   :  { %v2958_v43 = vld [vmem:[#allocation10 + $0xb0] sm:$0xf0]  ;;  %v3378_v45 = vld [vmem:[#allocation10 + $0xb4] sm:$0xf0] }
 0x335   :  { %v958_v58 = vpop.f32.mrf.mxu2  ;;  %v971_v8 = vpop.f32.mrf.mxu3  ;;  %v987_v41 = vmul.f32 %v982_v38, %v917_v7  ;;  %v3350_v7 = vld [vmem:[#allocation9 + $0xd4] sm:$0xf0]  ;;  %v2822_v38 = vld [vmem:[#allocation9 + $0x98] sm:$0xf0] }
 0x336   :  { %v3506_v37 = vpop.eup %3505  ;;  %v2853_v16 = vor.u32 %v3350_v7, %v2852_v2  ;;  %v2796_v58 = vld [vmem:[#allocation9 + $0x60] sm:$0xf]  ;;  %v3337_v8 = vld [vmem:[#allocation9 + $0x6c] sm:$0xf0]  ;;  %v2766_v2 = vld [vmem:[#allocation9 + $0x30] sm:$0xf0] }
 0x337   :  { %v988_v47 = vmul.f32 %v3506_v37, %v979_v52  ;;  %v3508_v48 = vpop.eup %3507  ;;  %v2825_v52 = vor.u32 %v3340_v36, %v2822_v38  ;;  %v3335_v37 = vld [vmem:[#allocation9 + $0x64] sm:$0xf]  ;;  %v2772_v7 = vld [vmem:[#allocation9 + $0x28] sm:$0xf] }
 0x338   :  { %v985_v53 = vmul.f32 0.5, %v3508_v48  ;;  %1261 = vmatpush.bf16.msra.mxu2 %v2853_v16  ;;  %v2804_v48 = vld [vmem:[#allocation9 + $0x68] sm:$0xf]  ;;  %v2769_v16 = vor.u32 %v3327_v56, %v2766_v2  ;;  %v2773_v21 = vor.u32 %v3330_v13, %v2772_v7  ;;  %v3386_v56 = vld [vmem:[#allocation10 + $0xf4] sm:$0xf0] }
 0x339   :  { %v4123_v49 = vadd.f32 %v988_v47, %v987_v41  ;;  %1276 = vmatpush.bf16.msra.mxu3 %v2825_v52  ;;  %v2797_v41 = vor.u32 %v3337_v8, %v2796_v58  ;;  %v2798_v47 = vld [vmem:[#allocation9 + $0x70] sm:$0xf0]  ;;  %v4562_v36 = vld [vmem:[#allocation29_spill] sm:$0xff]  ;;  %v4563_v52 = vld [vmem:[#allocation28_spill] sm:$0xff]  ;;  %v4142_v2 = vor.u32 %v3386_v56, %v2996_v51 }
 0x33a   :  { %v986_v59 = vadd.f32 0.5, %v985_v53  ;;  %v3338_v53 = vld [vmem:[#allocation9 + $0x74] sm:$0xf0]  ;;  %v503_v38 = vadd.f32 %v4562_v36, %v3921_v29  ;;  %v527_v58 = vadd.f32 %v4563_v52, %v3924_v31  ;;  %v3384_v7 = vld [vmem:[#allocation10 + $0xec] sm:$0xf] }
 0x33b   :  { %3509 = vtanh.f32 %v4123_v49  ;;  %1238 = vmatpush.bf16.msra.mxu0 %v2797_v41  ;;  %v2998_v13 = vld [vmem:[#allocation10 + $0xf8] sm:$0xf0]  ;;  %v2940_v36 = vld [vmem:[#allocation10 + $0x80] sm:$0xf]  ;;  %v3371_v52 = vld [vmem:[#allocation10 + $0x84] sm:$0xf] }
 0x33c   :  { %1262 = vmatpush.bf16.msra.mxu2 %v2837_v19  ;;  %v2753_v19 = vor.u32 %v3323_v54, %v2750_v63  ;;  %v3382_v54 = vld [vmem:[#allocation10 + $0xd4] sm:$0xf0] }
 0x33d   :  { %v4154_v63 = vor.u32 %v3382_v54, %v2980_v11  ;;  %v2894_v54 = vld [vmem:[#allocation10 + $0x30] sm:$0xf0] }
 0x33f   :  { %1239 = vmatpush.bf16.msra.mxu0 %v2781_v15 }
 0x340   :  { %1263 = vmatpush.bf16.msra.mxu2 %v2821_v35 }
 0x341   :  { %v3510_v60 = vpop.eup %3509 }
 0x342   :  { %v991_v61 = vmul.f32 %v3510_v60, %v986_v59  ;;  %v2801_v59 = vor.u32 %v3335_v37, %v2798_v47  ;;  %v2805_v60 = vor.u32 %v3338_v53, %v2804_v48 }
 0x343   :  { %1240 = vmatpush.bf16.msra.mxu0 %v2765_v57 }
 0x344   :  { %v992_v0 = vpack.c.bf16 %v991_v61, %v991_v61  ;;  %v3336_v61 = vld [vmem:[#allocation9 + $0x6c] sm:$0xf]  ;;  %1251 = vmatpush.bf16.msra.mxu1 %v2801_v59  ;;  %1264 = vmatpush.bf16.msra.mxu2 %v2805_v60 }
 0x346   :  { %1001 = vmatmul.bf16.vlgmr.msrb.gmra.mxu0 %v992_v0  ;;  %1014 = vmatmul.bf16.vlgmr.msrb.gmra.mxu1 %v992_v0 }
 0x347   :  { %1027 = vmatmul.bf16.vlgmr.msrb.gmra.mxu2 %v992_v0  ;;  %1040 = vmatmul.bf16.vlgmr.msrb.gmra.mxu3 %v992_v0  ;;  %v2806_v0 = vld [vmem:[#allocation9 + $0x78] sm:$0xf0] }
 0x348   :  { %v2809_v1 = vor.u32 %v3336_v61, %v2806_v0  ;;  %1252 = vmatpush.bf16.msra.mxu1 %v2785_v27  ;;  %1265 = vmatpush.bf16.msra.mxu2 %v2789_v30 }
 0x349   :  { %1241 = vmatpush.bf16.msra.mxu0 %v2749_v55  ;;  %v4152_v55 = vor.u32 %v3379_v33, %v2974_v9  ;;  %v3361_v33 = vld [vmem:[#allocation10 + $0x2c] sm:$0xf0]  ;;  %v3359_v9 = vld [vmem:[#allocation10 + $0x24] sm:$0xf] }
 0x34a   :  { %1277 = vmatpush.bf16.msra.mxu3 %v2809_v1 }
 0x34c   :  { %1253 = vmatpush.bf16.msra.mxu1 %v2769_v16  ;;  %1266 = vmatpush.bf16.msra.mxu2 %v2773_v21  ;;  %v4145_v16 = vor.u32 %v3384_v7, %v2998_v13  ;;  %v2972_v21 = vld [vmem:[#allocation10 + $0xc0] sm:$0xf]  ;;  %v3364_v7 = vld [vmem:[#allocation10 + $0x4c] sm:$0xf]  ;;  %v2918_v13 = vld [vmem:[#allocation10 + $0x58] sm:$0xf0] }
 0x34d   :  { %1471 = vmatpush.bf16.msrb.mxu0 %v4138_v44 }
 0x34e   :  { %1278 = vmatpush.bf16.msra.mxu3 %v2793_v40  ;;  %v3383_v40 = vld [vmem:[#allocation10 + $0xe4] sm:$0xf] }
 0x350   :  { %1254 = vmatpush.bf16.msra.mxu1 %v2753_v19  ;;  %1267 = vmatpush.bf16.msra.mxu2 %v2757_v24  ;;  %v4157_v19 = vor.u32 %v3380_v23, %v2982_v3  ;;  %v2956_v24 = vld [vmem:[#allocation10 + $0xa0] sm:$0xf]  ;;  %v2900_v23 = vld [vmem:[#allocation10 + $0x28] sm:$0xf]  ;;  %v3362_v3 = vld [vmem:[#allocation10 + $0x34] sm:$0xf0] }
 0x352   :  { %1279 = vmatpush.bf16.msra.mxu3 %v2777_v5  ;;  %v4150_v5 = vor.u32 %v3381_v32, %v2972_v21  ;;  %v4205_v21 = vor.u32 %v3364_v7, %v2918_v13  ;;  %v2892_v32 = vld [vmem:[#allocation10 + $0x20] sm:$0xf] }
 0x353   :  { %v4210_v11 = vor.u32 %v3361_v33, %v2892_v32 }
 0x354   :  { %1497 = vmatpush.bf16.msrb.mxu2 %v4142_v2  ;;  %1472 = vmatpush.bf16.msrb.mxu0 %v4150_v5 }
 0x356   :  { %1280 = vmatpush.bf16.msra.mxu3 %v2761_v42  ;;  %v4162_v42 = vor.u32 %v3377_v17, %v2956_v24  ;;  %v4212_v24 = vor.u32 %v3359_v9, %v2894_v54  ;;  %v4214_v17 = vor.u32 %v3362_v3, %v2900_v23 }
 0x358   :  { %1498 = vmatpush.bf16.msrb.mxu2 %v4154_v63  ;;  %1473 = vmatpush.bf16.msrb.mxu0 %v4162_v42 }
 0x35a   :  { %1510 = vmatpush.bf16.msrb.mxu3 %v4145_v16 }
 0x35e   :  { %1511 = vmatpush.bf16.msrb.mxu3 %v4157_v19 }
 0x3c3   :  { %v1002_v50 = vpop.f32.mrf.mxu0  ;;  %v1015_v25 = vpop.f32.mrf.mxu1 }
 0x3c4   :  { %v1045_v62 = vadd.f32 %v1002_v50, %v455_v46  ;;  %v1046_v35 = vadd.f32 %v1015_v25, %v479_v28  ;;  %v2964_v46 = vld [vmem:[#allocation10 + $0xa8] sm:$0xf]  ;;  %v4164_v28 = vor.u32 %v3375_v4, %v2958_v43  ;;  %v3376_v25 = vld [vmem:[#allocation10 + $0xac] sm:$0xf]  ;;  %v2902_v43 = vld [vmem:[#allocation10 + $0x38] sm:$0xf0] }
 0x3c5   :  { %v4166_v50 = vor.u32 %v3378_v45, %v2964_v46  ;;  %v3360_v4 = vld [vmem:[#allocation10 + $0x2c] sm:$0xf]  ;;  %v206_v46 = vld [vmem:[%s4538_s5] sm:$0xf] }
 0x3c6   :  { %3511 = vtanh.f32 %v1045_v62  ;;  %v2966_v62 = vld [vmem:[#allocation10 + $0xb8] sm:$0xf0]  ;;  %v4220_v45 = vor.u32 %v3360_v4, %v2902_v43 }
 0x3c7   :  { %3513 = vtanh.f32 %v1046_v35  ;;  %v4169_v35 = vor.u32 %v3376_v25, %v2966_v62  ;;  %1499 = vmatpush.bf16.msrb.mxu2 %v4166_v50  ;;  %v2876_v25 = vld [vmem:[#allocation10] sm:$0xf]  ;;  %v3357_v62 = vld [vmem:[#allocation10 + $0xc] sm:$0xf0] }
 0x3c9   :  { %1512 = vmatpush.bf16.msrb.mxu3 %v4169_v35 }
 0x3ca   :  { %v1028_v8 = vpop.f32.mrf.mxu2  ;;  %v1041_v12 = vpop.f32.mrf.mxu3 }
 0x3cb   :  { %v1047_v37 = vadd.f32 %v1028_v8, %v503_v38  ;;  %v1004_v41 = vpop.f32.mrf.mxu0  ;;  %v1017_v20 = vpop.f32.mrf.mxu1  ;;  %v1048_v48 = vadd.f32 %v1041_v12, %v527_v58  ;;  %v3373_v38 = vld [vmem:[#allocation10 + $0x8c] sm:$0xf0]  ;;  %v2942_v8 = vld [vmem:[#allocation10 + $0x90] sm:$0xf0]  ;;  %v2948_v12 = vld [vmem:[#allocation10 + $0x88] sm:$0xf] }
 0x3cc   :  { %v3512_v47 = vpop.eup %3511  ;;  %v4174_v58 = vor.u32 %v3373_v38, %v2940_v36  ;;  %v4176_v41 = vor.u32 %v3371_v52, %v2942_v8  ;;  %v3355_v36 = vld [vmem:[#allocation10 + $0x4] sm:$0xf]  ;;  %v4225_v38 = vor.u32 %v3357_v62, %v2876_v25  ;;  %v2878_v52 = vld [vmem:[#allocation10 + $0x10] sm:$0xf0]  ;;  %v2884_v8 = vld [vmem:[#allocation10 + $0x8] sm:$0xf] }
 0x3cd   :  { %v3514_v53 = vpop.eup %3513  ;;  %3515 = vtanh.f32 %v1047_v37  ;;  %v1050_v59 = vmul.f32 0.5, %v3512_v47  ;;  %v3374_v37 = vld [vmem:[#allocation10 + $0x94] sm:$0xf0]  ;;  %v3372_v47 = vld [vmem:[#allocation10 + $0x8c] sm:$0xf] }
 0x3ce   :  { %v1053_v60 = vmul.f32 0.5, %v3514_v53  ;;  %3517 = vtanh.f32 %v1048_v48  ;;  %v4178_v20 = vor.u32 %v3374_v37, %v2948_v12  ;;  %v2950_v48 = vld [vmem:[#allocation10 + $0x98] sm:$0xf0]  ;;  %1474 = vmatpush.bf16.msrb.mxu0 %v4174_v58  ;;  %v3358_v12 = vld [vmem:[#allocation10 + $0x14] sm:$0xf0]  ;;  %v1066_v37 = vperm.slane %v206_v46, 0 }
 0x3cf   :  { %v1051_v0 = vadd.f32 0.5, %v1050_v59  ;;  %v4181_v53 = vor.u32 %v3372_v47, %v2950_v48  ;;  %v2924_v59 = vld [vmem:[#allocation10 + $0x60] sm:$0xf]  ;;  %v1067_v47 = vperm.slane %v206_v46, 1  ;;  %v4227_v48 = vor.u32 %v3355_v36, %v2878_v52 }
 0x3d0   :  { %v1054_v61 = vadd.f32 0.5, %v1053_v60  ;;  %1500 = vmatpush.bf16.msrb.mxu2 %v4178_v20  ;;  %v3369_v60 = vld [vmem:[#allocation10 + $0x6c] sm:$0xf0] }
 0x3d1   :  { %1513 = vmatpush.bf16.msrb.mxu3 %v4181_v53 }
 0x3d2   :  { %v1030_v1 = vpop.f32.mrf.mxu2  ;;  %v1043_v6 = vpop.f32.mrf.mxu3  ;;  %v1059_v10 = vmul.f32 %v1054_v61, %v4123_v49  ;;  %v2990_v49 = vld [vmem:[#allocation10 + $0xf0] sm:$0xf0]  ;;  %v3367_v61 = vld [vmem:[#allocation10 + $0x64] sm:$0xf] }
 0x3d3   :  { %v3516_v29 = vpop.eup %3515  ;;  %v4140_v57 = vor.u32 %v3383_v40, %v2990_v49  ;;  %v2926_v1 = vld [vmem:[#allocation10 + $0x70] sm:$0xf0]  ;;  %v2932_v6 = vld [vmem:[#allocation10 + $0x68] sm:$0xf]  ;;  %v3366_v49 = vld [vmem:[#allocation10 + $0x54] sm:$0xf0] }
 0x3d4   :  { %v1060_v31 = vmul.f32 %v3516_v29, %v1051_v0  ;;  %v3518_v14 = vpop.eup %3517  ;;  %v4186_v0 = vor.u32 %v3369_v60, %v2924_v59  ;;  %v3370_v29 = vld [vmem:[#allocation10 + $0x74] sm:$0xf0]  ;;  %v2916_v40 = vld [vmem:[#allocation10 + $0x48] sm:$0xf]  ;;  %v4229_v59 = vor.u32 %v3358_v12, %v2884_v8  ;;  %v3356_v60 = vld [vmem:[#allocation10 + $0xc] sm:$0xf] }
 0x3d5   :  { %v1057_v18 = vmul.f32 0.5, %v3518_v14  ;;  %1484 = vmatpush.bf16.msrb.mxu1 %v4140_v57  ;;  %v3368_v14 = vld [vmem:[#allocation10 + $0x6c] sm:$0xf]  ;;  %v4202_v56 = vor.u32 %v3366_v49, %v2916_v40 }
 0x3d6   :  { %v4135_v15 = vadd.f32 %v1060_v31, %v1059_v10  ;;  %v4188_v10 = vor.u32 %v3367_v61, %v2926_v1  ;;  %v4190_v31 = vor.u32 %v3370_v29, %v2932_v6  ;;  %1475 = vmatpush.bf16.msrb.mxu0 %v4186_v0  ;;  %v2886_v61 = vld [vmem:[#allocation10 + $0x18] sm:$0xf0] }
 0x3d7   :  { %v1058_v22 = vadd.f32 0.5, %v1057_v18  ;;  %v2934_v18 = vld [vmem:[#allocation10 + $0x78] sm:$0xf0]  ;;  %v4232_v1 = vor.u32 %v3356_v60, %v2886_v61  ;;  %v239_v60 = vld [vmem:[%s4540_s7] sm:$0xf] }
 0x3d8   :  { %3519 = vtanh.f32 %v4135_v15  ;;  %1501 = vmatpush.bf16.msrb.mxu2 %v4190_v31  ;;  %v4308_v61 = vperm.slane %v239_v60, 0 }
 0x3d9   :  { %1485 = vmatpush.bf16.msrb.mxu1 %v4152_v55 }
 0x3dc   :  { %1502 = vmatpush.bf16.msrb.mxu2 %v4202_v56 }
 0x3dd   :  { %1486 = vmatpush.bf16.msrb.mxu1 %v4164_v28 }
 0x3de   :  { %v3520_v26 = vpop.eup %3519 }
 0x3df   :  { %v1063_v27 = vmul.f32 %v3520_v26, %v1058_v22  ;;  %v4193_v22 = vor.u32 %v3368_v14, %v2934_v18  ;;  %v2908_v26 = vld [vmem:[#allocation10 + $0x40] sm:$0xf] }
 0x3e0   :  { %1503 = vmatpush.bf16.msrb.mxu2 %v4214_v17 }
 0x3e1   :  { %v1064_v30 = vpack.c.bf16 %v1063_v27, %v1063_v27  ;;  %1487 = vmatpush.bf16.msrb.mxu1 %v4176_v41  ;;  %v3365_v27 = vld [vmem:[#allocation10 + $0x4c] sm:$0xf0]  ;;  %1514 = vmatpush.bf16.msrb.mxu3 %v4193_v22 }
 0x3e2   :  { %v4198_v34 = vor.u32 %v3365_v27, %v2908_v26  ;;  %v1068_v26 = vperm.slane %v206_v46, 2  ;;  %v1069_v27 = vperm.slane %v206_v46, 3 }
 0x3e3   :  { %1242 = vmatmul.bf16.vlgmr.msra.gmra.mxu0 %v1064_v30  ;;  %1255 = vmatmul.bf16.vlgmr.msra.gmra.mxu1 %v1064_v30 }
 0x3e4   :  { %1268 = vmatmul.bf16.vlgmr.msra.gmra.mxu2 %v1064_v30  ;;  %1281 = vmatmul.bf16.vlgmr.msra.gmra.mxu3 %v1064_v30  ;;  %v3363_v30 = vld [vmem:[#allocation10 + $0x44] sm:$0xf] }
 0x3e5   :  { %1488 = vmatpush.bf16.msrb.mxu1 %v4188_v10  ;;  %v4200_v51 = vor.u32 %v3363_v30, %v2910_v39  ;;  %1476 = vmatpush.bf16.msrb.mxu0 %v4198_v34 }
 0x3e6   :  { %1515 = vmatpush.bf16.msrb.mxu3 %v4205_v21  ;;  %1504 = vmatpush.bf16.msrb.mxu2 %v4229_v59 }
 0x3e9   :  { %1489 = vmatpush.bf16.msrb.mxu1 %v4200_v51  ;;  %1477 = vmatpush.bf16.msrb.mxu0 %v4210_v11 }
 0x3ea   :  { %1516 = vmatpush.bf16.msrb.mxu3 %v4220_v45  ;;  %1565 = vmatpush.bf16.msra.mxu2 %v4142_v2 }
 0x3ed   :  { %1490 = vmatpush.bf16.msrb.mxu1 %v4212_v24  ;;  %1478 = vmatpush.bf16.msrb.mxu0 %v4225_v38 }
 0x3ee   :  { %1517 = vmatpush.bf16.msrb.mxu3 %v4232_v1  ;;  %1566 = vmatpush.bf16.msra.mxu2 %v4154_v63 }
 0x3f1   :  { %1491 = vmatpush.bf16.msrb.mxu1 %v4227_v48  ;;  %1539 = vmatpush.bf16.msra.mxu0 %v4138_v44 }
 0x3f2   :  { %1578 = vmatpush.bf16.msra.mxu3 %v4145_v16  ;;  %1567 = vmatpush.bf16.msra.mxu2 %v4166_v50 }
 0x3f5   :  { %1552 = vmatpush.bf16.msra.mxu1 %v4140_v57  ;;  %1540 = vmatpush.bf16.msra.mxu0 %v4150_v5 }
 0x3f6   :  { %1579 = vmatpush.bf16.msra.mxu3 %v4157_v19  ;;  %1568 = vmatpush.bf16.msra.mxu2 %v4178_v20 }
 0x3f9   :  { %1553 = vmatpush.bf16.msra.mxu1 %v4152_v55  ;;  %1541 = vmatpush.bf16.msra.mxu0 %v4162_v42 }
 0x3fa   :  { %1580 = vmatpush.bf16.msra.mxu3 %v4169_v35  ;;  %1569 = vmatpush.bf16.msra.mxu2 %v4190_v31 }
 0x3fd   :  { %1554 = vmatpush.bf16.msra.mxu1 %v4164_v28  ;;  %1542 = vmatpush.bf16.msra.mxu0 %v4174_v58 }
 0x3fe   :  { %1581 = vmatpush.bf16.msra.mxu3 %v4181_v53  ;;  %1570 = vmatpush.bf16.msra.mxu2 %v4202_v56 }
 0x401   :  { %1555 = vmatpush.bf16.msra.mxu1 %v4176_v41  ;;  %1543 = vmatpush.bf16.msra.mxu0 %v4186_v0 }
 0x402   :  { %1582 = vmatpush.bf16.msra.mxu3 %v4193_v22  ;;  %1571 = vmatpush.bf16.msra.mxu2 %v4214_v17 }
 0x405   :  { %1556 = vmatpush.bf16.msra.mxu1 %v4188_v10  ;;  %1544 = vmatpush.bf16.msra.mxu0 %v4198_v34 }
 0x406   :  { %1583 = vmatpush.bf16.msra.mxu3 %v4205_v21  ;;  %1572 = vmatpush.bf16.msra.mxu2 %v4229_v59 }
 0x409   :  { %1557 = vmatpush.bf16.msra.mxu1 %v4200_v51  ;;  %1545 = vmatpush.bf16.msra.mxu0 %v4210_v11 }
 0x40a   :  { %1584 = vmatpush.bf16.msra.mxu3 %v4220_v45 }
 0x40d   :  { %1558 = vmatpush.bf16.msra.mxu1 %v4212_v24  ;;  %1546 = vmatpush.bf16.msra.mxu0 %v4225_v38 }
 0x40e   :  { %1585 = vmatpush.bf16.msra.mxu3 %v4232_v1 }
 0x411   :  { %1559 = vmatpush.bf16.msra.mxu1 %v4227_v48 }
 0x460   :  { %v1243_v6 = vpop.f32.mrf.mxu0  ;;  %v1256_v29 = vpop.f32.mrf.mxu1 }
 0x461   :  { %v1244_v14 = vadd.f32 %v1243_v6, %v1066_v37  ;;  %v1257_v18 = vadd.f32 %v1256_v29, %v1067_v47  ;;  %v4310_v6 = vperm.slane %v239_v60, 1 }
 0x463   :  { %3521 = vtanh.f32 %v1244_v14 }
 0x464   :  { %3523 = vtanh.f32 %v1257_v18 }
 0x467   :  { %v1269_v30 = vpop.f32.mrf.mxu2  ;;  %v1282_v39 = vpop.f32.mrf.mxu3 }
 0x468   :  { %v1270_v40 = vadd.f32 %v1269_v30, %v1068_v26  ;;  %v1245_v49 = vpop.f32.mrf.mxu0  ;;  %v1258_v7 = vpop.f32.mrf.mxu1  ;;  %v1283_v32 = vadd.f32 %v1282_v39, %v1069_v27  ;;  %v4314_v27 = vperm.slane %v239_v60, 2  ;;  %v4316_v30 = vperm.slane %v239_v60, 3 }
 0x469   :  { %v3522_v13 = vpop.eup %3521 }
 0x46a   :  { %v3524_v33 = vpop.eup %3523  ;;  %3525 = vtanh.f32 %v1270_v40  ;;  %v1287_v9 = vmul.f32 0.5, %v3522_v13 }
 0x46b   :  { %v1290_v54 = vmul.f32 0.5, %v3524_v33  ;;  %3527 = vtanh.f32 %v1283_v32 }
 0x46c   :  { %v1288_v3 = vadd.f32 0.5, %v1287_v9 }
 0x46d   :  { %v1291_v23 = vadd.f32 0.5, %v1290_v54 }
 0x46f   :  { %v1271_v4 = vpop.f32.mrf.mxu2  ;;  %v1284_v43 = vpop.f32.mrf.mxu3  ;;  %v1296_v25 = vmul.f32 %v1291_v23, %v4135_v15 }
 0x470   :  { %v3526_v46 = vpop.eup %3525 }
 0x471   :  { %v1297_v62 = vmul.f32 %v3526_v46, %v1288_v3  ;;  %v3528_v36 = vpop.eup %3527 }
 0x472   :  { %v1294_v8 = vmul.f32 0.5, %v3528_v36 }
 0x473   :  { %v4258_v52 = vadd.f32 %v1297_v62, %v1296_v25 }
 0x474   :  { %v1295_v15 = vadd.f32 0.5, %v1294_v8 }
 0x475   :  { %3529 = vtanh.f32 %v4258_v52 }
 0x47b   :  { %v3530_v12 = vpop.eup %3529 }
 0x47c   :  { %v1300_v37 = vmul.f32 %v3530_v12, %v1295_v15 }
 0x47e   :  { %v1301_v47 = vpack.c.bf16 %v1300_v37, %v1300_v37 }
 0x480   :  { %1479 = vmatmul.bf16.vlgmr.msrb.gmra.mxu0 %v1301_v47  ;;  %1492 = vmatmul.bf16.vlgmr.msrb.gmra.mxu1 %v1301_v47 }
 0x481   :  { %1505 = vmatmul.bf16.vlgmr.msrb.gmra.mxu2 %v1301_v47  ;;  %1518 = vmatmul.bf16.vlgmr.msrb.gmra.mxu3 %v1301_v47 }
 0x482   :  { %1607 = vmatpush.bf16.msrb.mxu0 %v4138_v44  ;;  %1620 = vmatpush.bf16.msrb.mxu1 %v4140_v57 }
 0x483   :  { %1633 = vmatpush.bf16.msrb.mxu2 %v4142_v2  ;;  %1646 = vmatpush.bf16.msrb.mxu3 %v4145_v16 }
 0x486   :  { %1608 = vmatpush.bf16.msrb.mxu0 %v4150_v5  ;;  %1621 = vmatpush.bf16.msrb.mxu1 %v4152_v55 }
 0x487   :  { %1634 = vmatpush.bf16.msrb.mxu2 %v4154_v63  ;;  %1647 = vmatpush.bf16.msrb.mxu3 %v4157_v19 }
 0x48a   :  { %1609 = vmatpush.bf16.msrb.mxu0 %v4162_v42  ;;  %1622 = vmatpush.bf16.msrb.mxu1 %v4164_v28 }
 0x48b   :  { %1635 = vmatpush.bf16.msrb.mxu2 %v4166_v50  ;;  %1648 = vmatpush.bf16.msrb.mxu3 %v4169_v35 }
 0x48e   :  { %1610 = vmatpush.bf16.msrb.mxu0 %v4174_v58  ;;  %1623 = vmatpush.bf16.msrb.mxu1 %v4176_v41 }
 0x48f   :  { %1636 = vmatpush.bf16.msrb.mxu2 %v4178_v20  ;;  %1649 = vmatpush.bf16.msrb.mxu3 %v4181_v53 }
 0x492   :  { %1611 = vmatpush.bf16.msrb.mxu0 %v4186_v0  ;;  %1624 = vmatpush.bf16.msrb.mxu1 %v4188_v10 }
 0x493   :  { %1637 = vmatpush.bf16.msrb.mxu2 %v4190_v31  ;;  %1650 = vmatpush.bf16.msrb.mxu3 %v4193_v22 }
 0x496   :  { %1612 = vmatpush.bf16.msrb.mxu0 %v4198_v34  ;;  %1625 = vmatpush.bf16.msrb.mxu1 %v4200_v51 }
 0x497   :  { %1638 = vmatpush.bf16.msrb.mxu2 %v4202_v56  ;;  %1651 = vmatpush.bf16.msrb.mxu3 %v4205_v21 }
 0x49a   :  { %1613 = vmatpush.bf16.msrb.mxu0 %v4210_v11  ;;  %1626 = vmatpush.bf16.msrb.mxu1 %v4212_v24 }
 0x49b   :  { %1639 = vmatpush.bf16.msrb.mxu2 %v4214_v17  ;;  %1652 = vmatpush.bf16.msrb.mxu3 %v4220_v45 }
 0x49e   :  { %1614 = vmatpush.bf16.msrb.mxu0 %v4225_v38  ;;  %1627 = vmatpush.bf16.msrb.mxu1 %v4227_v48 }
 0x49f   :  { %1640 = vmatpush.bf16.msrb.mxu2 %v4229_v59  ;;  %1653 = vmatpush.bf16.msrb.mxu3 %v4232_v1 }
 0x4fd   :  { %v1480_v29 = vpop.f32.mrf.mxu0  ;;  %v1493_v14 = vpop.f32.mrf.mxu1 }
 0x4fe   :  { %v1481_v18 = vadd.f32 %v1480_v29, %v4308_v61  ;;  %v1494_v26 = vadd.f32 %v1493_v14, %v4310_v6 }
 0x500   :  { %3531 = vtanh.f32 %v1481_v18 }
 0x501   :  { %3533 = vtanh.f32 %v1494_v26 }
 0x504   :  { %v1506_v39 = vpop.f32.mrf.mxu2  ;;  %v1519_v40 = vpop.f32.mrf.mxu3 }
 0x505   :  { %v1507_v49 = vadd.f32 %v1506_v39, %v4314_v27  ;;  %v1482_v7 = vpop.f32.mrf.mxu0  ;;  %v1495_v13 = vpop.f32.mrf.mxu1  ;;  %v1520_v33 = vadd.f32 %v1519_v40, %v4316_v30 }
 0x506   :  { %v3532_v32 = vpop.eup %3531 }
 0x507   :  { %v3534_v9 = vpop.eup %3533  ;;  %3535 = vtanh.f32 %v1507_v49  ;;  %v1524_v54 = vmul.f32 0.5, %v3532_v32 }
 0x508   :  { %v1527_v23 = vmul.f32 0.5, %v3534_v9  ;;  %3537 = vtanh.f32 %v1520_v33 }
 0x509   :  { %v1525_v4 = vadd.f32 0.5, %v1524_v54 }
 0x50a   :  { %v1528_v3 = vadd.f32 0.5, %v1527_v23 }
 0x50c   :  { %v1508_v43 = vpop.f32.mrf.mxu2  ;;  %v1521_v46 = vpop.f32.mrf.mxu3  ;;  %v1533_v62 = vmul.f32 %v1528_v3, %v4258_v52 }
 0x50d   :  { %v3536_v25 = vpop.eup %3535 }
 0x50e   :  { %v1534_v36 = vmul.f32 %v3536_v25, %v1525_v4  ;;  %v3538_v8 = vpop.eup %3537 }
 0x50f   :  { %v1531_v12 = vmul.f32 0.5, %v3538_v8 }
 0x510   :  { %v4321_v15 = vadd.f32 %v1534_v36, %v1533_v62 }
 0x511   :  { %v1532_v37 = vadd.f32 0.5, %v1531_v12 }
 0x512   :  { %3539 = vtanh.f32 %v4321_v15 }
 0x518   :  { %v3540_v47 = vpop.eup %3539 }
 0x519   :  { %v1537_v60 = vmul.f32 %v3540_v47, %v1532_v37 }
 0x51b   :  { %v1538_v29 = vpack.c.bf16 %v1537_v60, %v1537_v60 }
 0x51d   :  { %1547 = vmatmul.bf16.vlgmr.msra.gmra.mxu0 %v1538_v29  ;;  %1560 = vmatmul.bf16.vlgmr.msra.gmra.mxu1 %v1538_v29 }
 0x51e   :  { %1573 = vmatmul.bf16.vlgmr.msra.gmra.mxu2 %v1538_v29  ;;  %1586 = vmatmul.bf16.vlgmr.msra.gmra.mxu3 %v1538_v29 }
 0x51f   :  { %1675 = vmatpush.bf16.msra.mxu0 %v4138_v44  ;;  %1688 = vmatpush.bf16.msra.mxu1 %v4140_v57 }
 0x520   :  { %1701 = vmatpush.bf16.msra.mxu2 %v4142_v2  ;;  %1714 = vmatpush.bf16.msra.mxu3 %v4145_v16 }
 0x523   :  { %1676 = vmatpush.bf16.msra.mxu0 %v4150_v5  ;;  %1689 = vmatpush.bf16.msra.mxu1 %v4152_v55 }
 0x524   :  { %1702 = vmatpush.bf16.msra.mxu2 %v4154_v63  ;;  %1715 = vmatpush.bf16.msra.mxu3 %v4157_v19 }
 0x527   :  { %1677 = vmatpush.bf16.msra.mxu0 %v4162_v42  ;;  %1690 = vmatpush.bf16.msra.mxu1 %v4164_v28 }
 0x528   :  { %1703 = vmatpush.bf16.msra.mxu2 %v4166_v50  ;;  %1716 = vmatpush.bf16.msra.mxu3 %v4169_v35 }
 0x52b   :  { %1678 = vmatpush.bf16.msra.mxu0 %v4174_v58  ;;  %1691 = vmatpush.bf16.msra.mxu1 %v4176_v41 }
 0x52c   :  { %1704 = vmatpush.bf16.msra.mxu2 %v4178_v20  ;;  %1717 = vmatpush.bf16.msra.mxu3 %v4181_v53 }
 0x52f   :  { %1679 = vmatpush.bf16.msra.mxu0 %v4186_v0  ;;  %1692 = vmatpush.bf16.msra.mxu1 %v4188_v10 }
 0x530   :  { %1705 = vmatpush.bf16.msra.mxu2 %v4190_v31  ;;  %1718 = vmatpush.bf16.msra.mxu3 %v4193_v22 }
 0x533   :  { %1680 = vmatpush.bf16.msra.mxu0 %v4198_v34  ;;  %1693 = vmatpush.bf16.msra.mxu1 %v4200_v51 }
 0x534   :  { %1706 = vmatpush.bf16.msra.mxu2 %v4202_v56  ;;  %1719 = vmatpush.bf16.msra.mxu3 %v4205_v21 }
 0x537   :  { %1681 = vmatpush.bf16.msra.mxu0 %v4210_v11  ;;  %1694 = vmatpush.bf16.msra.mxu1 %v4212_v24 }
 0x538   :  { %1707 = vmatpush.bf16.msra.mxu2 %v4214_v17  ;;  %1720 = vmatpush.bf16.msra.mxu3 %v4220_v45 }
 0x53b   :  { %1682 = vmatpush.bf16.msra.mxu0 %v4225_v38  ;;  %1695 = vmatpush.bf16.msra.mxu1 %v4227_v48 }
 0x53c   :  { %1708 = vmatpush.bf16.msra.mxu2 %v4229_v59  ;;  %1721 = vmatpush.bf16.msra.mxu3 %v4232_v1 }
 0x59a   :  { %v1548_v52 = vpop.f32.mrf.mxu0  ;;  %v1561_v14 = vpop.f32.mrf.mxu1 }
 0x59b   :  { %v1549_v18 = vadd.f32 %v1548_v52, %v4308_v61  ;;  %v1562_v26 = vadd.f32 %v1561_v14, %v4310_v6 }
 0x59d   :  { %3541 = vtanh.f32 %v1549_v18 }
 0x59e   :  { %3543 = vtanh.f32 %v1562_v26 }
 0x5a1   :  { %v1574_v39 = vpop.f32.mrf.mxu2  ;;  %v1587_v40 = vpop.f32.mrf.mxu3 }
 0x5a2   :  { %v1575_v49 = vadd.f32 %v1574_v39, %v4314_v27  ;;  %v1550_v7 = vpop.f32.mrf.mxu0  ;;  %v1563_v13 = vpop.f32.mrf.mxu1  ;;  %v1588_v33 = vadd.f32 %v1587_v40, %v4316_v30 }
 0x5a3   :  { %v3542_v32 = vpop.eup %3541 }
 0x5a4   :  { %v3544_v9 = vpop.eup %3543  ;;  %3545 = vtanh.f32 %v1575_v49  ;;  %v1592_v54 = vmul.f32 0.5, %v3542_v32 }
 0x5a5   :  { %v1595_v23 = vmul.f32 0.5, %v3544_v9  ;;  %3547 = vtanh.f32 %v1588_v33 }
 0x5a6   :  { %v1593_v4 = vadd.f32 0.5, %v1592_v54 }
 0x5a7   :  { %v1596_v3 = vadd.f32 0.5, %v1595_v23 }
 0x5a9   :  { %v1576_v43 = vpop.f32.mrf.mxu2  ;;  %v1589_v46 = vpop.f32.mrf.mxu3  ;;  %v1601_v62 = vmul.f32 %v1596_v3, %v4321_v15 }
 0x5aa   :  { %v3546_v25 = vpop.eup %3545 }
 0x5ab   :  { %v1602_v36 = vmul.f32 %v3546_v25, %v1593_v4  ;;  %v3548_v8 = vpop.eup %3547 }
 0x5ac   :  { %v1599_v37 = vmul.f32 0.5, %v3548_v8 }
 0x5ad   :  { %v4361_v12 = vadd.f32 %v1602_v36, %v1601_v62 }
 0x5ae   :  { %v1600_v47 = vadd.f32 0.5, %v1599_v37 }
 0x5af   :  { %3549 = vtanh.f32 %v4361_v12 }
 0x5b5   :  { %v3550_v60 = vpop.eup %3549 }
 0x5b6   :  { %v1605_v29 = vmul.f32 %v3550_v60, %v1600_v47 }
 0x5b8   :  { %v1606_v52 = vpack.c.bf16 %v1605_v29, %v1605_v29 }
 0x5ba   :  { %1615 = vmatmul.bf16.vlgmr.msrb.gmra.mxu0 %v1606_v52  ;;  %1628 = vmatmul.bf16.vlgmr.msrb.gmra.mxu1 %v1606_v52 }
 0x5bb   :  { %1641 = vmatmul.bf16.vlgmr.msrb.gmra.mxu2 %v1606_v52  ;;  %1654 = vmatmul.bf16.vlgmr.msrb.gmra.mxu3 %v1606_v52 }
 0x5bc   :  { %1743 = vmatpush.bf16.msrb.mxu0 %v4138_v44  ;;  %1756 = vmatpush.bf16.msrb.mxu1 %v4140_v57 }
 0x5bd   :  { %1769 = vmatpush.bf16.msrb.mxu2 %v4142_v2  ;;  %1782 = vmatpush.bf16.msrb.mxu3 %v4145_v16 }
 0x5c0   :  { %1744 = vmatpush.bf16.msrb.mxu0 %v4150_v5  ;;  %1757 = vmatpush.bf16.msrb.mxu1 %v4152_v55 }
 0x5c1   :  { %1770 = vmatpush.bf16.msrb.mxu2 %v4154_v63  ;;  %1783 = vmatpush.bf16.msrb.mxu3 %v4157_v19 }
 0x5c4   :  { %1745 = vmatpush.bf16.msrb.mxu0 %v4162_v42  ;;  %1758 = vmatpush.bf16.msrb.mxu1 %v4164_v28 }
 0x5c5   :  { %1771 = vmatpush.bf16.msrb.mxu2 %v4166_v50  ;;  %1784 = vmatpush.bf16.msrb.mxu3 %v4169_v35 }
 0x5c8   :  { %1746 = vmatpush.bf16.msrb.mxu0 %v4174_v58  ;;  %1759 = vmatpush.bf16.msrb.mxu1 %v4176_v41 }
 0x5c9   :  { %1772 = vmatpush.bf16.msrb.mxu2 %v4178_v20  ;;  %1785 = vmatpush.bf16.msrb.mxu3 %v4181_v53 }
 0x5cc   :  { %1747 = vmatpush.bf16.msrb.mxu0 %v4186_v0  ;;  %1760 = vmatpush.bf16.msrb.mxu1 %v4188_v10 }
 0x5cd   :  { %1773 = vmatpush.bf16.msrb.mxu2 %v4190_v31  ;;  %1786 = vmatpush.bf16.msrb.mxu3 %v4193_v22 }
 0x5d0   :  { %1748 = vmatpush.bf16.msrb.mxu0 %v4198_v34  ;;  %1761 = vmatpush.bf16.msrb.mxu1 %v4200_v51 }
 0x5d1   :  { %1774 = vmatpush.bf16.msrb.mxu2 %v4202_v56  ;;  %1787 = vmatpush.bf16.msrb.mxu3 %v4205_v21 }
 0x5d4   :  { %1749 = vmatpush.bf16.msrb.mxu0 %v4210_v11  ;;  %1762 = vmatpush.bf16.msrb.mxu1 %v4212_v24 }
 0x5d5   :  { %1775 = vmatpush.bf16.msrb.mxu2 %v4214_v17  ;;  %1788 = vmatpush.bf16.msrb.mxu3 %v4220_v45 }
 0x5d8   :  { %1750 = vmatpush.bf16.msrb.mxu0 %v4225_v38  ;;  %1763 = vmatpush.bf16.msrb.mxu1 %v4227_v48 }
 0x5d9   :  { %1776 = vmatpush.bf16.msrb.mxu2 %v4229_v59  ;;  %1789 = vmatpush.bf16.msrb.mxu3 %v4232_v1 }
 0x637   :  { %v1616_v15 = vpop.f32.mrf.mxu0  ;;  %v1629_v14 = vpop.f32.mrf.mxu1 }
 0x638   :  { %v1617_v18 = vadd.f32 %v1616_v15, %v4308_v61  ;;  %v1630_v26 = vadd.f32 %v1629_v14, %v4310_v6 }
 0x63a   :  { %3551 = vtanh.f32 %v1617_v18 }
 0x63b   :  { %3553 = vtanh.f32 %v1630_v26 }
 0x63e   :  { %v1642_v39 = vpop.f32.mrf.mxu2  ;;  %v1655_v40 = vpop.f32.mrf.mxu3 }
 0x63f   :  { %v1643_v49 = vadd.f32 %v1642_v39, %v4314_v27  ;;  %v1618_v7 = vpop.f32.mrf.mxu0  ;;  %v1631_v13 = vpop.f32.mrf.mxu1  ;;  %v1656_v33 = vadd.f32 %v1655_v40, %v4316_v30 }
 0x640   :  { %v3552_v32 = vpop.eup %3551 }
 0x641   :  { %v3554_v9 = vpop.eup %3553  ;;  %3555 = vtanh.f32 %v1643_v49  ;;  %v1660_v54 = vmul.f32 0.5, %v3552_v32 }
 0x642   :  { %v1663_v23 = vmul.f32 0.5, %v3554_v9  ;;  %3557 = vtanh.f32 %v1656_v33 }
 0x643   :  { %v1661_v4 = vadd.f32 0.5, %v1660_v54 }
 0x644   :  { %v1664_v3 = vadd.f32 0.5, %v1663_v23 }
 0x646   :  { %v1644_v43 = vpop.f32.mrf.mxu2  ;;  %v1657_v46 = vpop.f32.mrf.mxu3  ;;  %v1669_v62 = vmul.f32 %v1664_v3, %v4361_v12 }
 0x647   :  { %v3556_v25 = vpop.eup %3555 }
 0x648   :  { %v1670_v36 = vmul.f32 %v3556_v25, %v1661_v4  ;;  %v3558_v8 = vpop.eup %3557 }
 0x649   :  { %v1667_v47 = vmul.f32 0.5, %v3558_v8 }
 0x64a   :  { %v4401_v37 = vadd.f32 %v1670_v36, %v1669_v62 }
 0x64b   :  { %v1668_v60 = vadd.f32 0.5, %v1667_v47 }
 0x64c   :  { %3559 = vtanh.f32 %v4401_v37 }
 0x652   :  { %v3560_v29 = vpop.eup %3559 }
 0x653   :  { %v1673_v52 = vmul.f32 %v3560_v29, %v1668_v60 }
 0x655   :  { %v1674_v15 = vpack.c.bf16 %v1673_v52, %v1673_v52 }
 0x657   :  { %1683 = vmatmul.bf16.vlgmr.msra.gmra.mxu0 %v1674_v15  ;;  %1696 = vmatmul.bf16.vlgmr.msra.gmra.mxu1 %v1674_v15 }
 0x658   :  { %1709 = vmatmul.bf16.vlgmr.msra.gmra.mxu2 %v1674_v15  ;;  %1722 = vmatmul.bf16.vlgmr.msra.gmra.mxu3 %v1674_v15 }
 0x659   :  { %1811 = vmatpush.bf16.msra.mxu0 %v4138_v44  ;;  %1824 = vmatpush.bf16.msra.mxu1 %v4140_v57 }
 0x65a   :  { %1837 = vmatpush.bf16.msra.mxu2 %v4142_v2  ;;  %1850 = vmatpush.bf16.msra.mxu3 %v4145_v16 }
 0x65d   :  { %1812 = vmatpush.bf16.msra.mxu0 %v4150_v5  ;;  %1825 = vmatpush.bf16.msra.mxu1 %v4152_v55 }
 0x65e   :  { %1838 = vmatpush.bf16.msra.mxu2 %v4154_v63  ;;  %1851 = vmatpush.bf16.msra.mxu3 %v4157_v19 }
 0x661   :  { %1813 = vmatpush.bf16.msra.mxu0 %v4162_v42  ;;  %1826 = vmatpush.bf16.msra.mxu1 %v4164_v28 }
 0x662   :  { %1839 = vmatpush.bf16.msra.mxu2 %v4166_v50  ;;  %1852 = vmatpush.bf16.msra.mxu3 %v4169_v35 }
 0x665   :  { %1814 = vmatpush.bf16.msra.mxu0 %v4174_v58  ;;  %1827 = vmatpush.bf16.msra.mxu1 %v4176_v41 }
 0x666   :  { %1840 = vmatpush.bf16.msra.mxu2 %v4178_v20  ;;  %1853 = vmatpush.bf16.msra.mxu3 %v4181_v53 }
 0x669   :  { %1815 = vmatpush.bf16.msra.mxu0 %v4186_v0  ;;  %1828 = vmatpush.bf16.msra.mxu1 %v4188_v10 }
 0x66a   :  { %1841 = vmatpush.bf16.msra.mxu2 %v4190_v31  ;;  %1854 = vmatpush.bf16.msra.mxu3 %v4193_v22 }
 0x66d   :  { %1816 = vmatpush.bf16.msra.mxu0 %v4198_v34  ;;  %1829 = vmatpush.bf16.msra.mxu1 %v4200_v51 }
 0x66e   :  { %1842 = vmatpush.bf16.msra.mxu2 %v4202_v56  ;;  %1855 = vmatpush.bf16.msra.mxu3 %v4205_v21 }
 0x671   :  { %1817 = vmatpush.bf16.msra.mxu0 %v4210_v11  ;;  %1830 = vmatpush.bf16.msra.mxu1 %v4212_v24 }
 0x672   :  { %1843 = vmatpush.bf16.msra.mxu2 %v4214_v17  ;;  %1856 = vmatpush.bf16.msra.mxu3 %v4220_v45 }
 0x675   :  { %1818 = vmatpush.bf16.msra.mxu0 %v4225_v38  ;;  %1831 = vmatpush.bf16.msra.mxu1 %v4227_v48 }
 0x676   :  { %1844 = vmatpush.bf16.msra.mxu2 %v4229_v59  ;;  %1857 = vmatpush.bf16.msra.mxu3 %v4232_v1 }
 0x6d4   :  { %v1684_v12 = vpop.f32.mrf.mxu0  ;;  %v1697_v14 = vpop.f32.mrf.mxu1 }
 0x6d5   :  { %v1685_v18 = vadd.f32 %v1684_v12, %v4308_v61  ;;  %v1698_v26 = vadd.f32 %v1697_v14, %v4310_v6 }
 0x6d7   :  { %3561 = vtanh.f32 %v1685_v18 }
 0x6d8   :  { %3563 = vtanh.f32 %v1698_v26 }
 0x6db   :  { %v1710_v39 = vpop.f32.mrf.mxu2  ;;  %v1723_v40 = vpop.f32.mrf.mxu3 }
 0x6dc   :  { %v1711_v49 = vadd.f32 %v1710_v39, %v4314_v27  ;;  %v1686_v7 = vpop.f32.mrf.mxu0  ;;  %v1699_v13 = vpop.f32.mrf.mxu1  ;;  %v1724_v33 = vadd.f32 %v1723_v40, %v4316_v30 }
 0x6dd   :  { %v3562_v32 = vpop.eup %3561 }
 0x6de   :  { %v3564_v9 = vpop.eup %3563  ;;  %3565 = vtanh.f32 %v1711_v49  ;;  %v1728_v54 = vmul.f32 0.5, %v3562_v32 }
 0x6df   :  { %v1731_v23 = vmul.f32 0.5, %v3564_v9  ;;  %3567 = vtanh.f32 %v1724_v33 }
 0x6e0   :  { %v1729_v4 = vadd.f32 0.5, %v1728_v54 }
 0x6e1   :  { %v1732_v3 = vadd.f32 0.5, %v1731_v23 }
 0x6e3   :  { %v1712_v43 = vpop.f32.mrf.mxu2  ;;  %v1725_v46 = vpop.f32.mrf.mxu3  ;;  %v1737_v62 = vmul.f32 %v1732_v3, %v4401_v37 }
 0x6e4   :  { %v3566_v25 = vpop.eup %3565 }
 0x6e5   :  { %v1738_v36 = vmul.f32 %v3566_v25, %v1729_v4  ;;  %v3568_v8 = vpop.eup %3567 }
 0x6e6   :  { %v1735_v60 = vmul.f32 0.5, %v3568_v8 }
 0x6e7   :  { %v4441_v47 = vadd.f32 %v1738_v36, %v1737_v62 }
 0x6e8   :  { %v1736_v29 = vadd.f32 0.5, %v1735_v60 }
 0x6e9   :  { %3569 = vtanh.f32 %v4441_v47 }
 0x6ef   :  { %v3570_v52 = vpop.eup %3569 }
 0x6f0   :  { %v1741_v15 = vmul.f32 %v3570_v52, %v1736_v29 }
 0x6f2   :  { %v1742_v12 = vpack.c.bf16 %v1741_v15, %v1741_v15 }
 0x6f4   :  { %1751 = vmatmul.bf16.vlgmr.msrb.gmra.mxu0 %v1742_v12  ;;  %1764 = vmatmul.bf16.vlgmr.msrb.gmra.mxu1 %v1742_v12 }
 0x6f5   :  { %1777 = vmatmul.bf16.vlgmr.msrb.gmra.mxu2 %v1742_v12  ;;  %1790 = vmatmul.bf16.vlgmr.msrb.gmra.mxu3 %v1742_v12 }
 0x6f6   :  { %1879 = vmatpush.bf16.msrb.mxu0 %v4138_v44  ;;  %1892 = vmatpush.bf16.msrb.mxu1 %v4140_v57 }
 0x6f7   :  { %1905 = vmatpush.bf16.msrb.mxu2 %v4142_v2  ;;  %1918 = vmatpush.bf16.msrb.mxu3 %v4145_v16 }
 0x6fa   :  { %1880 = vmatpush.bf16.msrb.mxu0 %v4150_v5  ;;  %1893 = vmatpush.bf16.msrb.mxu1 %v4152_v55 }
 0x6fb   :  { %1906 = vmatpush.bf16.msrb.mxu2 %v4154_v63  ;;  %1919 = vmatpush.bf16.msrb.mxu3 %v4157_v19 }
 0x6fe   :  { %1881 = vmatpush.bf16.msrb.mxu0 %v4162_v42  ;;  %1894 = vmatpush.bf16.msrb.mxu1 %v4164_v28 }
 0x6ff   :  { %1907 = vmatpush.bf16.msrb.mxu2 %v4166_v50  ;;  %1920 = vmatpush.bf16.msrb.mxu3 %v4169_v35 }
 0x702   :  { %1882 = vmatpush.bf16.msrb.mxu0 %v4174_v58  ;;  %1895 = vmatpush.bf16.msrb.mxu1 %v4176_v41 }
 0x703   :  { %1908 = vmatpush.bf16.msrb.mxu2 %v4178_v20  ;;  %1921 = vmatpush.bf16.msrb.mxu3 %v4181_v53 }
 0x706   :  { %1883 = vmatpush.bf16.msrb.mxu0 %v4186_v0  ;;  %1896 = vmatpush.bf16.msrb.mxu1 %v4188_v10 }
 0x707   :  { %1909 = vmatpush.bf16.msrb.mxu2 %v4190_v31  ;;  %1922 = vmatpush.bf16.msrb.mxu3 %v4193_v22 }
 0x70a   :  { %1884 = vmatpush.bf16.msrb.mxu0 %v4198_v34  ;;  %1897 = vmatpush.bf16.msrb.mxu1 %v4200_v51 }
 0x70b   :  { %1910 = vmatpush.bf16.msrb.mxu2 %v4202_v56  ;;  %1923 = vmatpush.bf16.msrb.mxu3 %v4205_v21 }
 0x70e   :  { %1885 = vmatpush.bf16.msrb.mxu0 %v4210_v11  ;;  %1898 = vmatpush.bf16.msrb.mxu1 %v4212_v24 }
 0x70f   :  { %1911 = vmatpush.bf16.msrb.mxu2 %v4214_v17  ;;  %1924 = vmatpush.bf16.msrb.mxu3 %v4220_v45 }
 0x712   :  { %1886 = vmatpush.bf16.msrb.mxu0 %v4225_v38  ;;  %1899 = vmatpush.bf16.msrb.mxu1 %v4227_v48 }
 0x713   :  { %1912 = vmatpush.bf16.msrb.mxu2 %v4229_v59  ;;  %1925 = vmatpush.bf16.msrb.mxu3 %v4232_v1 }
 0x771   :  { %v1752_v44 = vpop.f32.mrf.mxu0  ;;  %v1765_v57 = vpop.f32.mrf.mxu1 }
 0x772   :  { %v1753_v2 = vadd.f32 %v1752_v44, %v4308_v61  ;;  %v1766_v16 = vadd.f32 %v1765_v57, %v4310_v6 }
 0x774   :  { %3571 = vtanh.f32 %v1753_v2 }
 0x775   :  { %3573 = vtanh.f32 %v1766_v16 }
 0x778   :  { %v1778_v5 = vpop.f32.mrf.mxu2  ;;  %v1791_v55 = vpop.f32.mrf.mxu3 }
 0x779   :  { %v1779_v63 = vadd.f32 %v1778_v5, %v4314_v27  ;;  %v1754_v19 = vpop.f32.mrf.mxu0  ;;  %v1767_v42 = vpop.f32.mrf.mxu1  ;;  %v1792_v50 = vadd.f32 %v1791_v55, %v4316_v30 }
 0x77a   :  { %v3572_v28 = vpop.eup %3571 }
 0x77b   :  { %v3574_v35 = vpop.eup %3573  ;;  %3575 = vtanh.f32 %v1779_v63  ;;  %v1796_v58 = vmul.f32 0.5, %v3572_v28 }
 0x77c   :  { %v1799_v41 = vmul.f32 0.5, %v3574_v35  ;;  %3577 = vtanh.f32 %v1792_v50 }
 0x77d   :  { %v1797_v53 = vadd.f32 0.5, %v1796_v58 }
 0x77e   :  { %v1800_v20 = vadd.f32 0.5, %v1799_v41 }
 0x780   :  { %v1780_v0 = vpop.f32.mrf.mxu2  ;;  %v1793_v10 = vpop.f32.mrf.mxu3  ;;  %v1805_v22 = vmul.f32 %v1800_v20, %v4441_v47 }
 0x781   :  { %v3576_v31 = vpop.eup %3575 }
 0x782   :  { %v1806_v34 = vmul.f32 %v3576_v31, %v1797_v53  ;;  %v3578_v51 = vpop.eup %3577 }
 0x783   :  { %v1803_v21 = vmul.f32 0.5, %v3578_v51 }
 0x784   :  { %v1807_v56 = vadd.f32 %v1806_v34, %v1805_v22 }
 0x785   :  { %v1804_v11 = vadd.f32 0.5, %v1803_v21 }
 0x786   :  { %3579 = vtanh.f32 %v1807_v56 }
 0x78c   :  { %v3580_v24 = vpop.eup %3579 }
 0x78d   :  { %v1809_v17 = vmul.f32 %v3580_v24, %v1804_v11 }
 0x78f   :  { %v1810_v45 = vpack.c.bf16 %v1809_v17, %v1809_v17 }
 0x791   :  { %1819 = vmatmul.bf16.vlgmr.msra.gmra.mxu0 %v1810_v45  ;;  %1832 = vmatmul.bf16.vlgmr.msra.gmra.mxu1 %v1810_v45 }
 0x792   :  { %1845 = vmatmul.bf16.vlgmr.msra.gmra.mxu2 %v1810_v45  ;;  %1858 = vmatmul.bf16.vlgmr.msra.gmra.mxu3 %v1810_v45 }
 0x80e   :  { %v1820_v38 = vpop.f32.mrf.mxu0  ;;  %v1833_v48 = vpop.f32.mrf.mxu1 }
 0x80f   :  { %v1821_v59 = vadd.f32 %v1820_v38, %v4308_v61  ;;  %v1834_v1 = vadd.f32 %v1833_v48, %v4310_v6 }
 0x811   :  { %3581 = vtanh.f32 %v1821_v59 }
 0x812   :  { %3583 = vtanh.f32 %v1834_v1 }
 0x815   :  { %v1846_v37 = vpop.f32.mrf.mxu2  ;;  %v1859_v14 = vpop.f32.mrf.mxu3 }
 0x816   :  { %v1847_v18 = vadd.f32 %v1846_v37, %v4314_v27  ;;  %v1822_v26 = vpop.f32.mrf.mxu0  ;;  %v1835_v39 = vpop.f32.mrf.mxu1  ;;  %v1860_v49 = vadd.f32 %v1859_v14, %v4316_v30 }
 0x817   :  { %v3582_v40 = vpop.eup %3581 }
 0x818   :  { %v3584_v7 = vpop.eup %3583  ;;  %3585 = vtanh.f32 %v1847_v18  ;;  %v1864_v13 = vmul.f32 0.5, %v3582_v40 }
 0x819   :  { %v1867_v32 = vmul.f32 0.5, %v3584_v7  ;;  %3587 = vtanh.f32 %v1860_v49 }
 0x81a   :  { %v1865_v9 = vadd.f32 0.5, %v1864_v13 }
 0x81b   :  { %v1868_v33 = vadd.f32 0.5, %v1867_v32 }
 0x81d   :  { %v1848_v54 = vpop.f32.mrf.mxu2  ;;  %v1861_v23 = vpop.f32.mrf.mxu3  ;;  %v1873_v4 = vmul.f32 %v1868_v33, %v1807_v56 }
 0x81e   :  { %v3586_v3 = vpop.eup %3585 }
 0x81f   :  { %v1874_v43 = vmul.f32 %v3586_v3, %v1865_v9  ;;  %v3588_v46 = vpop.eup %3587 }
 0x820   :  { %v1871_v62 = vmul.f32 0.5, %v3588_v46 }
 0x821   :  { %v1875_v25 = vadd.f32 %v1874_v43, %v1873_v4 }
 0x822   :  { %v1872_v36 = vadd.f32 0.5, %v1871_v62 }
 0x823   :  { %3589 = vtanh.f32 %v1875_v25 }
 0x829   :  { %v3590_v8 = vpop.eup %3589 }
 0x82a   :  { %v1877_v47 = vmul.f32 %v3590_v8, %v1872_v36 }
 0x82c   :  { %v1878_v60 = vpack.c.bf16 %v1877_v47, %v1877_v47 }
 0x82e   :  { %1887 = vmatmul.bf16.vlgmr.msrb.gmra.mxu0 %v1878_v60  ;;  %1900 = vmatmul.bf16.vlgmr.msrb.gmra.mxu1 %v1878_v60 }
 0x82f   :  { %1913 = vmatmul.bf16.vlgmr.msrb.gmra.mxu2 %v1878_v60  ;;  %1926 = vmatmul.bf16.vlgmr.msrb.gmra.mxu3 %v1878_v60 }
 0x8ab   :  { %v1888_v29 = vpop.f32.mrf.mxu0  ;;  %v1901_v52 = vpop.f32.mrf.mxu1 }
 0x8ac   :  { %v1889_v15 = vadd.f32 %v1888_v29, %v4308_v61  ;;  %v1902_v12 = vadd.f32 %v1901_v52, %v4310_v6 }
 0x8ae   :  { %3591 = vtanh.f32 %v1889_v15 }
 0x8af   :  { %3593 = vtanh.f32 %v1902_v12 }
 0x8b2   :  { %v1914_v44 = vpop.f32.mrf.mxu2  ;;  %v1927_v57 = vpop.f32.mrf.mxu3 }
 0x8b3   :  { %v1915_v2 = vadd.f32 %v1914_v44, %v4314_v27  ;;  %v1890_v16 = vpop.f32.mrf.mxu0  ;;  %v1903_v5 = vpop.f32.mrf.mxu1  ;;  %v1928_v63 = vadd.f32 %v1927_v57, %v4316_v30 }
 0x8b4   :  { %v3592_v55 = vpop.eup %3591 }
 0x8b5   :  { %v3594_v19 = vpop.eup %3593  ;;  %3595 = vtanh.f32 %v1915_v2  ;;  %v1932_v42 = vmul.f32 0.5, %v3592_v55 }
 0x8b6   :  { %v1935_v28 = vmul.f32 0.5, %v3594_v19  ;;  %3597 = vtanh.f32 %v1928_v63 }
 0x8b7   :  { %v1933_v61 = vadd.f32 0.5, %v1932_v42 }
 0x8b8   :  { %v1936_v50 = vadd.f32 0.5, %v1935_v28 }
 0x8ba   :  { %v1916_v35 = vpop.f32.mrf.mxu2  ;;  %v1929_v6 = vpop.f32.mrf.mxu3  ;;  %v1941_v41 = vmul.f32 %v1936_v50, %v1875_v25 }
 0x8bb   :  { %v3596_v58 = vpop.eup %3595 }
 0x8bc   :  { %v1942_v20 = vmul.f32 %v3596_v58, %v1933_v61  ;;  %v3598_v53 = vpop.eup %3597 }
 0x8bd   :  { %v1939_v27 = vmul.f32 0.5, %v3598_v53 }
 0x8be   :  { %v1943_v0 = vadd.f32 %v1942_v20, %v1941_v41 }
 0x8bf   :  { %v1940_v10 = vadd.f32 0.5, %v1939_v27 }
 0x8c0   :  { %3599 = vtanh.f32 %v1943_v0 }
 0x8c6   :  { %v3600_v31 = vpop.eup %3599 }
 0x8c7   :  { %v4492_v22 = vmul.f32 %v3600_v31, %v1940_v10 }
 0x8c8   :  { %3727 = dma.done.wait [#allocation3], 8192 }
 0x8c9   :  { %3728 = vsyncadd [#allocation3], 4294959104  ;;  %v3228_v30 = vld [vmem:[#allocation2 + $0x1c0] sm:$0xf]  ;;  %v3446_v51 = vld [vmem:[#allocation2 + $0x1c4] sm:$0xf] }
 0x8ca   :  { %v3450_v34 = vld [vmem:[#allocation2 + $0x1dc] sm:$0xf0]  ;;  %v3230_v21 = vld [vmem:[#allocation2 + $0x1e0] sm:$0xf0]  ;;  %v3236_v11 = vld [vmem:[#allocation2 + $0x1c8] sm:$0xf] }
 0x8cb   :  { %v3229_v56 = vor.u32 %v3450_v34, %v3228_v30  ;;  %v3451_v24 = vld [vmem:[#allocation2 + $0x1e4] sm:$0xf0]  ;;  %v3233_v17 = vor.u32 %v3446_v51, %v3230_v21  ;;  %v3447_v38 = vld [vmem:[#allocation2 + $0x1cc] sm:$0xf]  ;;  %v3196_v59 = vld [vmem:[#allocation2 + $0x180] sm:$0xf] }
 0x8cc   :  { %v3237_v45 = vor.u32 %v3451_v24, %v3236_v11  ;;  %v3238_v48 = vld [vmem:[#allocation2 + $0x1e8] sm:$0xf0]  ;;  %v3442_v37 = vld [vmem:[#allocation2 + $0x19c] sm:$0xf0]  ;;  %v3438_v14 = vld [vmem:[#allocation2 + $0x184] sm:$0xf] }
 0x8cd   :  { %2353 = vmatpush.bf16.msra.mxu0 %v3229_v56  ;;  %v3241_v1 = vor.u32 %v3447_v38, %v3238_v48  ;;  %v3198_v18 = vld [vmem:[#allocation2 + $0x1a0] sm:$0xf0]  ;;  %2366 = vmatpush.bf16.msra.mxu1 %v3233_v17  ;;  %v3197_v26 = vor.u32 %v3442_v37, %v3196_v59  ;;  %v3204_v40 = vld [vmem:[#allocation2 + $0x188] sm:$0xf]  ;;  %v3439_v7 = vld [vmem:[#allocation2 + $0x18c] sm:$0xf] }
 0x8ce   :  { %2379 = vmatpush.bf16.msra.mxu2 %v3237_v45  ;;  %v3201_v39 = vor.u32 %v3438_v14, %v3198_v18  ;;  %v3443_v49 = vld [vmem:[#allocation2 + $0x1a4] sm:$0xf0]  ;;  %v3206_v32 = vld [vmem:[#allocation2 + $0x1a8] sm:$0xf0]  ;;  %v3164_v33 = vld [vmem:[#allocation2 + $0x140] sm:$0xf] }
 0x8cf   :  { %2392 = vmatpush.bf16.msra.mxu3 %v3241_v1  ;;  %v3205_v13 = vor.u32 %v3443_v49, %v3204_v40  ;;  %v3434_v9 = vld [vmem:[#allocation2 + $0x15c] sm:$0xf0]  ;;  %v3209_v54 = vor.u32 %v3439_v7, %v3206_v32  ;;  %v3430_v23 = vld [vmem:[#allocation2 + $0x144] sm:$0xf]  ;;  %v3172_v4 = vld [vmem:[#allocation2 + $0x148] sm:$0xf] }
 0x8d0   :  { %v3166_v3 = vld [vmem:[#allocation2 + $0x160] sm:$0xf0]  ;;  %v3165_v43 = vor.u32 %v3434_v9, %v3164_v33  ;;  %v3435_v46 = vld [vmem:[#allocation2 + $0x164] sm:$0xf0]  ;;  %v3431_v25 = vld [vmem:[#allocation2 + $0x14c] sm:$0xf] }
 0x8d1   :  { %2354 = vmatpush.bf16.msra.mxu0 %v3197_v26  ;;  %v3174_v62 = vld [vmem:[#allocation2 + $0x168] sm:$0xf0]  ;;  %2367 = vmatpush.bf16.msra.mxu1 %v3201_v39  ;;  %v3169_v36 = vor.u32 %v3430_v23, %v3166_v3  ;;  %v3173_v8 = vor.u32 %v3435_v46, %v3172_v4  ;;  %v3132_v47 = vld [vmem:[#allocation2 + $0x100] sm:$0xf]  ;;  %v3422_v29 = vld [vmem:[#allocation2 + $0x104] sm:$0xf] }
 0x8d2   :  { %2380 = vmatpush.bf16.msra.mxu2 %v3205_v13  ;;  %v3426_v60 = vld [vmem:[#allocation2 + $0x11c] sm:$0xf0]  ;;  %v3177_v52 = vor.u32 %v3431_v25, %v3174_v62  ;;  %v3134_v15 = vld [vmem:[#allocation2 + $0x120] sm:$0xf0]  ;;  %v3140_v12 = vld [vmem:[#allocation2 + $0x108] sm:$0xf] }
 0x8d3   :  { %2393 = vmatpush.bf16.msra.mxu3 %v3209_v54  ;;  %v3427_v44 = vld [vmem:[#allocation2 + $0x124] sm:$0xf0]  ;;  %v3423_v57 = vld [vmem:[#allocation2 + $0x10c] sm:$0xf]  ;;  %v3133_v16 = vor.u32 %v3426_v60, %v3132_v47  ;;  %v3137_v5 = vor.u32 %v3422_v29, %v3134_v15  ;;  %v3100_v63 = vld [vmem:[#allocation2 + $0xc0] sm:$0xf] }
 0x8d4   :  { %v3142_v2 = vld [vmem:[#allocation2 + $0x128] sm:$0xf0]  ;;  %v3141_v55 = vor.u32 %v3427_v44, %v3140_v12  ;;  %v3418_v19 = vld [vmem:[#allocation2 + $0xdc] sm:$0xf0]  ;;  %v3414_v42 = vld [vmem:[#allocation2 + $0xc4] sm:$0xf] }
 0x8d5   :  { %2355 = vmatpush.bf16.msra.mxu0 %v3165_v43  ;;  %2368 = vmatpush.bf16.msra.mxu1 %v3169_v36  ;;  %v3145_v28 = vor.u32 %v3423_v57, %v3142_v2  ;;  %v3102_v50 = vld [vmem:[#allocation2 + $0xe0] sm:$0xf0]  ;;  %v3108_v61 = vld [vmem:[#allocation2 + $0xc8] sm:$0xf]  ;;  %v3415_v6 = vld [vmem:[#allocation2 + $0xcc] sm:$0xf]  ;;  %v3101_v41 = vor.u32 %v3418_v19, %v3100_v63 }
 0x8d6   :  { %2381 = vmatpush.bf16.msra.mxu2 %v3173_v8  ;;  %v3419_v35 = vld [vmem:[#allocation2 + $0xe4] sm:$0xf0]  ;;  %v3110_v58 = vld [vmem:[#allocation2 + $0xe8] sm:$0xf0]  ;;  %v3105_v20 = vor.u32 %v3414_v42, %v3102_v50  ;;  %v3068_v0 = vld [vmem:[#allocation2 + $0x80] sm:$0xf]  ;;  %v4496_v50 = vpack.c.bf16 %v4492_v22, %v4492_v22 }
 0x8d7   :  { %2394 = vmatpush.bf16.msra.mxu3 %v3177_v52  ;;  %v3109_v53 = vor.u32 %v3419_v35, %v3108_v61  ;;  %v3410_v27 = vld [vmem:[#allocation2 + $0x9c] sm:$0xf0]  ;;  %v3406_v10 = vld [vmem:[#allocation2 + $0x84] sm:$0xf]  ;;  %v3113_v31 = vor.u32 %v3415_v6, %v3110_v58  ;;  %v3076_v34 = vld [vmem:[#allocation2 + $0x88] sm:$0xf] }
 0x8d8   :  { %v3070_v30 = vld [vmem:[#allocation2 + $0xa0] sm:$0xf0]  ;;  %v3411_v51 = vld [vmem:[#allocation2 + $0xa4] sm:$0xf0]  ;;  %v3407_v56 = vld [vmem:[#allocation2 + $0x8c] sm:$0xf]  ;;  %v3069_v11 = vor.u32 %v3410_v27, %v3068_v0 }
 0x8d9   :  { %2356 = vmatpush.bf16.msra.mxu0 %v3133_v16  ;;  %2369 = vmatpush.bf16.msra.mxu1 %v3137_v5  ;;  %v3078_v21 = vld [vmem:[#allocation2 + $0xa8] sm:$0xf0]  ;;  %v3073_v24 = vor.u32 %v3406_v10, %v3070_v30  ;;  %v3077_v17 = vor.u32 %v3411_v51, %v3076_v34  ;;  %v3036_v45 = vld [vmem:[#allocation2 + $0x40] sm:$0xf]  ;;  %v3398_v48 = vld [vmem:[#allocation2 + $0x44] sm:$0xf] }
 0x8da   :  { %2382 = vmatpush.bf16.msra.mxu2 %v3141_v55  ;;  %v3402_v38 = vld [vmem:[#allocation2 + $0x5c] sm:$0xf0]  ;;  %v3081_v59 = vor.u32 %v3407_v56, %v3078_v21  ;;  %v3038_v1 = vld [vmem:[#allocation2 + $0x60] sm:$0xf0]  ;;  %v3044_v37 = vld [vmem:[#allocation2 + $0x48] sm:$0xf] }
 0x8db   :  { %2395 = vmatpush.bf16.msra.mxu3 %v3145_v28  ;;  %v3403_v14 = vld [vmem:[#allocation2 + $0x64] sm:$0xf0]  ;;  %v3399_v18 = vld [vmem:[#allocation2 + $0x4c] sm:$0xf]  ;;  %v3037_v39 = vor.u32 %v3402_v38, %v3036_v45  ;;  %v3004_v40 = vld [vmem:[#allocation2] sm:$0xf]  ;;  %v3041_v7 = vor.u32 %v3398_v48, %v3038_v1 }
 0x8dc   :  { %v3046_v26 = vld [vmem:[#allocation2 + $0x68] sm:$0xf0]  ;;  %v3394_v49 = vld [vmem:[#allocation2 + $0x1c] sm:$0xf0]  ;;  %v3045_v13 = vor.u32 %v3403_v14, %v3044_v37  ;;  %v3390_v32 = vld [vmem:[#allocation2 + $0x4] sm:$0xf] }
 0x8dd   :  { %2357 = vmatpush.bf16.msra.mxu0 %v3101_v41  ;;  %2370 = vmatpush.bf16.msra.mxu1 %v3105_v20  ;;  %v3006_v33 = vld [vmem:[#allocation2 + $0x20] sm:$0xf0]  ;;  %v3012_v9 = vld [vmem:[#allocation2 + $0x8] sm:$0xf]  ;;  %v3049_v54 = vor.u32 %v3399_v18, %v3046_v26  ;;  %v3391_v3 = vld [vmem:[#allocation2 + $0xc] sm:$0xf]  ;;  %v3005_v62 = vor.u32 %v3394_v49, %v3004_v40 }
 0x8de   :  { %2383 = vmatpush.bf16.msra.mxu2 %v3109_v53  ;;  %v3395_v23 = vld [vmem:[#allocation2 + $0x24] sm:$0xf0]  ;;  %v3014_v4 = vld [vmem:[#allocation2 + $0x28] sm:$0xf0]  ;;  %v3244_v43 = vld [vmem:[#allocation2 + $0x1d0] sm:$0xf]  ;;  %v3009_v60 = vor.u32 %v3390_v32, %v3006_v33 }
 0x8df   :  { %2396 = vmatpush.bf16.msra.mxu3 %v3113_v31  ;;  %v3452_v46 = vld [vmem:[#allocation2 + $0x1ec] sm:$0xf0]  ;;  %v3448_v25 = vld [vmem:[#allocation2 + $0x1d4] sm:$0xf]  ;;  %v3252_v8 = vld [vmem:[#allocation2 + $0x1d8] sm:$0xf]  ;;  %v3013_v29 = vor.u32 %v3395_v23, %v3012_v9  ;;  %v3017_v12 = vor.u32 %v3391_v3, %v3014_v4 }
 0x8e0   :  { %v3246_v36 = vld [vmem:[#allocation2 + $0x1f0] sm:$0xf0]  ;;  %v3453_v47 = vld [vmem:[#allocation2 + $0x1f4] sm:$0xf0]  ;;  %v3449_v52 = vld [vmem:[#allocation2 + $0x1dc] sm:$0xf]  ;;  %v3245_v44 = vor.u32 %v3452_v46, %v3244_v43 }
 0x8e1   :  { %2358 = vmatpush.bf16.msra.mxu0 %v3069_v11  ;;  %2371 = vmatpush.bf16.msra.mxu1 %v3073_v24  ;;  %v3254_v15 = vld [vmem:[#allocation2 + $0x1f8] sm:$0xf0]  ;;  %v3249_v57 = vor.u32 %v3448_v25, %v3246_v36  ;;  %v3253_v2 = vor.u32 %v3453_v47, %v3252_v8  ;;  %v3212_v16 = vld [vmem:[#allocation2 + $0x190] sm:$0xf]  ;;  %v3440_v55 = vld [vmem:[#allocation2 + $0x194] sm:$0xf] }
 0x8e2   :  { %2384 = vmatpush.bf16.msra.mxu2 %v3077_v17  ;;  %v3444_v5 = vld [vmem:[#allocation2 + $0x1ac] sm:$0xf0]  ;;  %v3257_v63 = vor.u32 %v3449_v52, %v3254_v15  ;;  %v3214_v19 = vld [vmem:[#allocation2 + $0x1b0] sm:$0xf0]  ;;  %v3220_v42 = vld [vmem:[#allocation2 + $0x198] sm:$0xf] }
 0x8e3   :  { %2397 = vmatpush.bf16.msra.mxu3 %v3081_v59  ;;  %v3445_v28 = vld [vmem:[#allocation2 + $0x1b4] sm:$0xf0]  ;;  %v3441_v61 = vld [vmem:[#allocation2 + $0x19c] sm:$0xf]  ;;  %v3213_v6 = vor.u32 %v3444_v5, %v3212_v16  ;;  %v3217_v58 = vor.u32 %v3440_v55, %v3214_v19  ;;  %v3180_v20 = vld [vmem:[#allocation2 + $0x150] sm:$0xf] }
 0x8e4   :  { %v3222_v35 = vld [vmem:[#allocation2 + $0x1b8] sm:$0xf0]  ;;  %v3221_v41 = vor.u32 %v3445_v28, %v3220_v42  ;;  %v3436_v53 = vld [vmem:[#allocation2 + $0x16c] sm:$0xf0]  ;;  %v3432_v0 = vld [vmem:[#allocation2 + $0x154] sm:$0xf] }
 0x8e5   :  { %2359 = vmatpush.bf16.msra.mxu0 %v3037_v39  ;;  %2372 = vmatpush.bf16.msra.mxu1 %v3041_v7  ;;  %v3225_v27 = vor.u32 %v3441_v61, %v3222_v35  ;;  %v3182_v22 = vld [vmem:[#allocation2 + $0x170] sm:$0xf0]  ;;  %v3188_v10 = vld [vmem:[#allocation2 + $0x158] sm:$0xf]  ;;  %v3433_v30 = vld [vmem:[#allocation2 + $0x15c] sm:$0xf]  ;;  %v3181_v51 = vor.u32 %v3436_v53, %v3180_v20 }
 0x8e6   :  { %2385 = vmatpush.bf16.msra.mxu2 %v3045_v13  ;;  %v3437_v31 = vld [vmem:[#allocation2 + $0x174] sm:$0xf0]  ;;  %v3190_v34 = vld [vmem:[#allocation2 + $0x178] sm:$0xf0]  ;;  %v3185_v56 = vor.u32 %v3432_v0, %v3182_v22  ;;  %v3148_v11 = vld [vmem:[#allocation2 + $0x110] sm:$0xf] }
 0x8e7   :  { %2398 = vmatpush.bf16.msra.mxu3 %v3049_v54  ;;  %v3189_v21 = vor.u32 %v3437_v31, %v3188_v10  ;;  %v3428_v24 = vld [vmem:[#allocation2 + $0x12c] sm:$0xf0]  ;;  %v3424_v17 = vld [vmem:[#allocation2 + $0x114] sm:$0xf]  ;;  %v3193_v45 = vor.u32 %v3433_v30, %v3190_v34  ;;  %v3156_v48 = vld [vmem:[#allocation2 + $0x118] sm:$0xf] }
 0x8e8   :  { %v3150_v38 = vld [vmem:[#allocation2 + $0x130] sm:$0xf0]  ;;  %v3429_v59 = vld [vmem:[#allocation2 + $0x134] sm:$0xf0]  ;;  %v3425_v1 = vld [vmem:[#allocation2 + $0x11c] sm:$0xf]  ;;  %v3149_v14 = vor.u32 %v3428_v24, %v3148_v11 }
 0x8e9   :  { %2360 = vmatpush.bf16.msra.mxu0 %v3005_v62  ;;  %2373 = vmatpush.bf16.msra.mxu1 %v3009_v60  ;;  %v3158_v37 = vld [vmem:[#allocation2 + $0x138] sm:$0xf0]  ;;  %v3153_v18 = vor.u32 %v3424_v17, %v3150_v38  ;;  %v3157_v26 = vor.u32 %v3429_v59, %v3156_v48  ;;  %v3116_v39 = vld [vmem:[#allocation2 + $0xd0] sm:$0xf]  ;;  %v3416_v49 = vld [vmem:[#allocation2 + $0xd4] sm:$0xf] }
 0x8ea   :  { %2386 = vmatpush.bf16.msra.mxu2 %v3013_v29  ;;  %v3420_v40 = vld [vmem:[#allocation2 + $0xec] sm:$0xf0]  ;;  %v3161_v7 = vor.u32 %v3425_v1, %v3158_v37  ;;  %v3118_v13 = vld [vmem:[#allocation2 + $0xf0] sm:$0xf0]  ;;  %v3124_v32 = vld [vmem:[#allocation2 + $0xd8] sm:$0xf] }
 0x8eb   :  { %2399 = vmatpush.bf16.msra.mxu3 %v3017_v12  ;;  %v3421_v33 = vld [vmem:[#allocation2 + $0xf4] sm:$0xf0]  ;;  %v3417_v9 = vld [vmem:[#allocation2 + $0xdc] sm:$0xf]  ;;  %v3117_v23 = vor.u32 %v3420_v40, %v3116_v39  ;;  %v3121_v3 = vor.u32 %v3416_v49, %v3118_v13  ;;  %v3084_v43 = vld [vmem:[#allocation2 + $0x90] sm:$0xf] }
 0x8ec   :  { %2361 = vmatmul.bf16.vlgmr.msra.gmra.mxu0 %v4496_v50  ;;  %2374 = vmatmul.bf16.vlgmr.msra.gmra.mxu1 %v4496_v50  ;;  %v3126_v54 = vld [vmem:[#allocation2 + $0xf8] sm:$0xf0]  ;;  %v3125_v4 = vor.u32 %v3421_v33, %v3124_v32  ;;  %v3412_v46 = vld [vmem:[#allocation2 + $0xac] sm:$0xf0]  ;;  %v3408_v25 = vld [vmem:[#allocation2 + $0x94] sm:$0xf] }
 0x8ed   :  { %2405 = vmatpush.bf16.msrb.mxu0 %v3245_v44  ;;  %2418 = vmatpush.bf16.msrb.mxu1 %v3249_v57  ;;  %v3129_v62 = vor.u32 %v3417_v9, %v3126_v54  ;;  %v3086_v36 = vld [vmem:[#allocation2 + $0xb0] sm:$0xf0]  ;;  %v3092_v8 = vld [vmem:[#allocation2 + $0x98] sm:$0xf]  ;;  %v3409_v60 = vld [vmem:[#allocation2 + $0x9c] sm:$0xf]  ;;  %v3085_v52 = vor.u32 %v3412_v46, %v3084_v43 }
 0x8ee   :  { %2431 = vmatpush.bf16.msrb.mxu2 %v3253_v2  ;;  %2400 = vmatmul.bf16.vlgmr.msra.gmra.mxu3 %v4496_v50  ;;  %v3413_v47 = vld [vmem:[#allocation2 + $0xb4] sm:$0xf0]  ;;  %v3094_v29 = vld [vmem:[#allocation2 + $0xb8] sm:$0xf0]  ;;  %v3089_v15 = vor.u32 %v3408_v25, %v3086_v36  ;;  %v3052_v44 = vld [vmem:[#allocation2 + $0x50] sm:$0xf] }
 0x8ef   :  { %2444 = vmatpush.bf16.msrb.mxu3 %v3257_v63  ;;  %2387 = vmatmul.bf16.vlgmr.msra.gmra.mxu2 %v4496_v50  ;;  %v3093_v12 = vor.u32 %v3413_v47, %v3092_v8  ;;  %v3404_v57 = vld [vmem:[#allocation2 + $0x6c] sm:$0xf0]  ;;  %v3400_v2 = vld [vmem:[#allocation2 + $0x54] sm:$0xf]  ;;  %v3097_v16 = vor.u32 %v3409_v60, %v3094_v29  ;;  %v3060_v55 = vld [vmem:[#allocation2 + $0x58] sm:$0xf] }
 0x8f0   :  { %v3054_v5 = vld [vmem:[#allocation2 + $0x70] sm:$0xf0]  ;;  %v3405_v63 = vld [vmem:[#allocation2 + $0x74] sm:$0xf0]  ;;  %v3401_v19 = vld [vmem:[#allocation2 + $0x5c] sm:$0xf]  ;;  %v3053_v28 = vor.u32 %v3404_v57, %v3052_v44 }
 0x8f1   :  { %2406 = vmatpush.bf16.msrb.mxu0 %v3213_v6  ;;  %2419 = vmatpush.bf16.msrb.mxu1 %v3217_v58  ;;  %v3062_v42 = vld [vmem:[#allocation2 + $0x78] sm:$0xf0]  ;;  %v3057_v61 = vor.u32 %v3400_v2, %v3054_v5  ;;  %v3061_v35 = vor.u32 %v3405_v63, %v3060_v55  ;;  %v3020_v6 = vld [vmem:[#allocation2 + $0x10] sm:$0xf]  ;;  %v3022_v53 = vld [vmem:[#allocation2 + $0x30] sm:$0xf0] }
 0x8f2   :  { %2432 = vmatpush.bf16.msrb.mxu2 %v3221_v41  ;;  %v3396_v58 = vld [vmem:[#allocation2 + $0x2c] sm:$0xf0]  ;;  %v3392_v41 = vld [vmem:[#allocation2 + $0x14] sm:$0xf]  ;;  %v3065_v20 = vor.u32 %v3401_v19, %v3062_v42  ;;  %v3028_v0 = vld [vmem:[#allocation2 + $0x18] sm:$0xf] }
 0x8f3   :  { %2445 = vmatpush.bf16.msrb.mxu3 %v3225_v27  ;;  %v3397_v27 = vld [vmem:[#allocation2 + $0x34] sm:$0xf0]  ;;  %v3393_v22 = vld [vmem:[#allocation2 + $0x1c] sm:$0xf]  ;;  %v3021_v31 = vor.u32 %v3396_v58, %v3020_v6  ;;  %v3025_v30 = vor.u32 %v3392_v41, %v3022_v53 }
 0x8f4   :  { %v3030_v10 = vld [vmem:[#allocation2 + $0x38] sm:$0xf0]  ;;  %v3029_v34 = vor.u32 %v3397_v27, %v3028_v0 }
 0x8f5   :  { %2407 = vmatpush.bf16.msrb.mxu0 %v3181_v51  ;;  %2420 = vmatpush.bf16.msrb.mxu1 %v3185_v56  ;;  %v3033_v51 = vor.u32 %v3393_v22, %v3030_v10  ;;  %v2014_v56 = vld [vmem:[%s4542_s9] sm:$0xff] }
 0x8f6   :  { %2433 = vmatpush.bf16.msrb.mxu2 %v3189_v21  ;;  %v2017_v21 = vperm.slane %v2014_v56, 0  ;;  %v2018_v11 = vperm.slane %v2014_v56, 1  ;;  %v2019_v48 = vperm.slane %v2014_v56, 2  ;;  %v2020_v59 = vperm.slane %v2014_v56, 3 }
 0x8f7   :  { %2446 = vmatpush.bf16.msrb.mxu3 %v3193_v45  ;;  %v2021_v49 = vperm.slane %v2014_v56, 4  ;;  %v2023_v54 = vperm.slane %v2014_v56, 6 }
 0x8f9   :  { %2408 = vmatpush.bf16.msrb.mxu0 %v3149_v14  ;;  %2421 = vmatpush.bf16.msrb.mxu1 %v3153_v18 }
 0x8fa   :  { %2434 = vmatpush.bf16.msrb.mxu2 %v3157_v26 }
 0x8fb   :  { %2447 = vmatpush.bf16.msrb.mxu3 %v3161_v7  ;;  %v2022_v7 = vperm.slane %v2014_v56, 5 }
 0x8fd   :  { %2409 = vmatpush.bf16.msrb.mxu0 %v3117_v23  ;;  %2422 = vmatpush.bf16.msrb.mxu1 %v3121_v3  ;;  %v2024_v23 = vperm.slane %v2014_v56, 7 }
 0x8fe   :  { %2435 = vmatpush.bf16.msrb.mxu2 %v3125_v4 }
 0x8ff   :  { %2448 = vmatpush.bf16.msrb.mxu3 %v3129_v62 }
 0x901   :  { %2410 = vmatpush.bf16.msrb.mxu0 %v3085_v52  ;;  %2423 = vmatpush.bf16.msrb.mxu1 %v3089_v15 }
 0x902   :  { %2436 = vmatpush.bf16.msrb.mxu2 %v3093_v12 }
 0x903   :  { %2449 = vmatpush.bf16.msrb.mxu3 %v3097_v16 }
 0x905   :  { %2411 = vmatpush.bf16.msrb.mxu0 %v3053_v28  ;;  %2424 = vmatpush.bf16.msrb.mxu1 %v3057_v61 }
 0x906   :  { %2437 = vmatpush.bf16.msrb.mxu2 %v3061_v35 }
 0x907   :  { %2450 = vmatpush.bf16.msrb.mxu3 %v3065_v20 }
 0x909   :  { %2412 = vmatpush.bf16.msrb.mxu0 %v3021_v31  ;;  %2425 = vmatpush.bf16.msrb.mxu1 %v3025_v30 }
 0x90a   :  { %2438 = vmatpush.bf16.msrb.mxu2 %v3029_v34 }
 0x90b   :  { %2451 = vmatpush.bf16.msrb.mxu3 %v3033_v51 }
 0x90c   :  { %2413 = vmatmul.bf16.vlgmr.msrb.gmra.mxu0 %v4496_v50  ;;  %2426 = vmatmul.bf16.vlgmr.msrb.gmra.mxu1 %v4496_v50 }
 0x90d   :  { %2439 = vmatmul.bf16.vlgmr.msrb.gmra.mxu2 %v4496_v50 }
 0x90e   :  { %2452 = vmatmul.bf16.vlgmr.msrb.gmra.mxu3 %v4496_v50 }
 0x969   :  { %v2362_v24 = vpop.f32.mrf.mxu0  ;;  %v2375_v45 = vpop.f32.mrf.mxu1 }
 0x96a   :  { %v2363_v17 = vadd.f32 %v2362_v24, %v2017_v21  ;;  %v2376_v38 = vadd.f32 %v2375_v45, %v2018_v11 }
 0x96c   :  { %2457 = vst [vmem:[%s4543_s10] sm:$0xff] %v2363_v17 }
 0x96d   :  { %2458 = vst [vmem:[%s4543_s10 + $0x8] sm:$0xff] %v2376_v38 }
 0x971   :  { %v2401_v37 = vpop.f32.mrf.mxu3  ;;  %v2364_v18 = vpop.f32.mrf.mxu0 }
 0x972   :  { %v2388_v50 = vpop.f32.mrf.mxu2  ;;  %v2402_v14 = vadd.f32 %v2401_v37, %v2020_v59  ;;  %v2377_v26 = vpop.f32.mrf.mxu1 }
 0x973   :  { %v2389_v1 = vadd.f32 %v2388_v50, %v2019_v48 }
 0x974   :  { %2460 = vst [vmem:[%s4543_s10 + $0x18] sm:$0xff] %v2402_v14 }
 0x975   :  { %2459 = vst [vmem:[%s4543_s10 + $0x10] sm:$0xff] %v2389_v1 }
 0x979   :  { %v2403_v40 = vpop.f32.mrf.mxu3 }
 0x97a   :  { %v2390_v39 = vpop.f32.mrf.mxu2 }
 0x989   :  { %v2414_v13 = vpop.f32.mrf.mxu0  ;;  %v2427_v33 = vpop.f32.mrf.mxu1 }
 0x98a   :  { %v2415_v32 = vadd.f32 %v2414_v13, %v2021_v49  ;;  %v2428_v9 = vadd.f32 %v2427_v33, %v2022_v7 }
 0x98c   :  { %2461 = vst [vmem:[%s4543_s10 + $0x20] sm:$0xff] %v2415_v32 }
 0x98d   :  { %2462 = vst [vmem:[%s4543_s10 + $0x28] sm:$0xff] %v2428_v9 }
 0x990   :  { %v2440_v3 = vpop.f32.mrf.mxu2 }
 0x991   :  { %v2441_v4 = vadd.f32 %v2440_v3, %v2023_v54  ;;  %v2453_v43 = vpop.f32.mrf.mxu3  ;;  %v2416_v46 = vpop.f32.mrf.mxu0 }
 0x992   :  { %v2454_v25 = vadd.f32 %v2453_v43, %v2024_v23  ;;  %v2429_v62 = vpop.f32.mrf.mxu1 }
 0x993   :  { %2463 = vst [vmem:[%s4543_s10 + $0x30] sm:$0xff] %v2441_v4 }
 0x994   :  { %2464 = vst [vmem:[%s4543_s10 + $0x38] sm:$0xff] %v2454_v25 }
 0x998   :  { %v2442_v36 = vpop.f32.mrf.mxu2 }
 0x999   :  { %v2455_v8 = vpop.f32.mrf.mxu3 }
 0x99a   :  { %2469 = vsyncpa [#allocation6], 1 }
 0x99b   :  { %2470 = vsyncpa [#allocation8], 1 }
 0x99c   :  { %2471 = vsyncpa [#allocation11], 1 }
 0x99d   :  { %2472 = vsyncmov [#allocation3] }
 0x9a0   :  { %s2473_s16 = vpop.sfrf %2472 }
 0x9a1   :  { %p3258_p0 = scmp.ne.s32.totalorder %s2473_s16, 0 }
 0x9a3   :  { %2477 = shalt.err (%p3258_p0)  }

</bundles_post_ra>
